<compile_context>
chip_gen: v7x
topology: tpu7x:2x2x1
jax: 0.10.0
libtpu: 0.0.40
codegen_flags: <defaults>
</compile_context>

<pallas_src>
import functools

import jax
import jax.numpy as jnp
from jax import lax
from jax.experimental import pallas as pl
from jax.experimental.pallas import tpu as pltpu


def _round_up(n, m):
    return ((n + m - 1) // m) * m


def _shift_masks(K, H, W, HWp):
    """(K*K, HWp) f32 masks: 1.0 where the (dy,dx)-shifted tap is in-image."""
    P = (K - 1) // 2
    y = jnp.arange(H)[:, None]
    x = jnp.arange(W)[None, :]
    rows = []
    for dy in range(-P, P + 1):
        for dx in range(-P, P + 1):
            valid = ((y + dy >= 0) & (y + dy < H) &
                     (x + dx >= 0) & (x + dx < W)).reshape(H * W)
            rows.append(jnp.pad(valid, (0, HWp - H * W)))
    return jnp.stack(rows).astype(jnp.float32)


def _pick_bblk(B, HWp, bytes_per_lane):
    """Images per grid step (batch-on-lanes).

    Keeps >=2 parallel grid steps when possible (v7x has 2 TensorCores) and
    keeps the per-step VMEM footprint well under v7x's 64 MiB."""
    budget = 24 * 1024 * 1024
    max_by_vmem = max(1, budget // max(bytes_per_lane * HWp, 1))
    max_by_lanes = max(1, 2048 // HWp)
    bblk = max(1, min(B, max_by_vmem, max_by_lanes))
    if B >= 2:
        bblk = max(1, min(bblk, B // 2))    # >=2 grid steps for megacore
    while B % bblk:
        bblk -= 1
    return bblk


# ----------------------------------------------------------------------------
# Fused Inception kernel: Bblk images (lane-concatenated) per grid step.
# ----------------------------------------------------------------------------
def _inception_kernel(x_ref, m3_ref, m5_ref, n3_ref, w1_ref, b1_ref,
                      w3_ref, b3_ref, w5_ref, b5_ref, wp_ref, bp_ref,
                      o_ref, p5_ref, p3_ref=None, *,
                      W, HWp, Bblk, c1p, c3p, c5p,
                      ch1x1, ch3x3, ch5x5, pool_proj, use_reg3):
    f32, bf16 = jnp.float32, jnp.bfloat16
    LB = Bblk * HWp
    x2 = x_ref[...]                                   # (cin_p, LB) bf16

    offs3 = [(dy, dx) for dy in (-1, 0, 1) for dx in (-1, 0, 1)]
    offs5 = [(dy, dx) for dy in (-2, -1, 0, 1, 2) for dx in (-2, -1, 0, 1, 2)]

    def tap(v, dy, dx):
        # Want out[:, i] = v[:, i + dy*W + dx].  pltpu.roll follows np.roll
        # semantics (out[i] = in[i - shift]) so pass shift = -offset.  Every
        # wrapped / cross-image / out-of-image lane is masked by the caller.
        off = dy * W + dx
        return pltpu.roll(v, (-off) % LB, 1) if off else v

    # --- fused 1x1 convs: branch1 + 3x3-reduce + 5x5-reduce in ONE matmul ----
    y = jnp.dot(w1_ref[...], x2, preferred_element_type=f32) + b1_ref[...]
    br1 = y[0:ch1x1]                                  # (ch1x1, LB) f32
    r3 = y[c1p:c1p + c3p]                             # (c3p, LB)  f32 (pad rows = 0)
    r5 = y[c1p + c3p:c1p + c3p + c5p]                 # (c5p, LB)  f32

    # --- branch 2: 3x3 'same' conv -> im2col (registers or VMEM) + matmul ----
    def tap3(k, dy, dx):
        if dy == 0 and dx == 0:                       # center tap: mask all-ones
            return r3.astype(bf16)
        return (tap(r3, dy, dx) * m3_ref[k:k + 1, :]).astype(bf16)

    if use_reg3:
        patch3 = jnp.concatenate(
            [tap3(k, dy, dx) for k, (dy, dx) in enumerate(offs3)], axis=0)
    else:
        for k, (dy, dx) in enumerate(offs3):
            p3_ref[k * c3p:(k + 1) * c3p, :] = tap3(k, dy, dx)
        patch3 = p3_ref[...]
    br2 = jnp.dot(w3_ref[...], patch3, preferred_element_type=f32) + b3_ref[...]

    # --- branch 3: 5x5 'same' conv -> bf16 im2col in VMEM + ONE matmul -------
    for k, (dy, dx) in enumerate(offs5):
        if dy == 0 and dx == 0:
            p5_ref[k * c5p:(k + 1) * c5p, :] = r5.astype(bf16)
        else:
            p5_ref[k * c5p:(k + 1) * c5p, :] = (
                tap(r5, dy, dx) * m5_ref[k:k + 1, :]).astype(bf16)
    br3 = jnp.dot(w5_ref[...], p5_ref[...],
                  preferred_element_type=f32) + b5_ref[...]

    # --- branch 4: 3x3/s1/p1 max pool (additive -1e30 mask) + 1x1 conv -------
    xf = x2.astype(f32)
    pooled = xf                                       # center tap, always valid
    for k, (dy, dx) in enumerate(offs3):
        if dy == 0 and dx == 0:
            continue
        pooled = jnp.maximum(pooled, tap(xf, dy, dx) + n3_ref[k:k + 1, :])
    br4 = jnp.dot(wp_ref[...], pooled.astype(bf16),
                  preferred_element_type=f32) + bp_ref[...]

    # --- write every image's branches straight into the NC(H*W) output -------
    c1, c2, c3 = ch1x1, ch1x1 + ch3x3, ch1x1 + ch3x3 + ch5x5
    for b in range(Bblk):
        sl = slice(b * HWp, (b + 1) * HWp)
        o_ref[b, 0:c1, :] = br1[:, sl]
        o_ref[b, c1:c2, :] = br2[:, sl]
        o_ref[b, c2:c3, :] = br3[:, sl]
        o_ref[b, c3:c3 + pool_proj, :] = br4[:, sl]


# ----------------------------------------------------------------------------
# Parameters (HWIO conv weights, matching the PyTorch module's init style)
# ----------------------------------------------------------------------------
def init_inception_params(key, in_channels, ch1x1, ch3x3red, ch3x3,
                          ch5x5red, ch5x5, pool_proj):
    def conv_params(k, K, cin, cout):
        kw, kb = jax.random.split(k)
        bound = 1.0 / ((cin * K * K) ** 0.5)
        w = jax.random.uniform(kw, (K, K, cin, cout), jnp.float32, -bound, bound)
        b = jax.random.uniform(kb, (cout,), jnp.float32, -bound, bound)
        return w, b

    keys = jax.random.split(key, 6)
    return {
        "b1":  conv_params(keys[0], 1, in_channels, ch1x1),
        "b2a": conv_params(keys[1], 1, in_channels, ch3x3red),
        "b2b": conv_params(keys[2], 3, ch3x3red, ch3x3),
        "b3a": conv_params(keys[3], 1, in_channels, ch5x5red),
        "b3b": conv_params(keys[4], 5, ch5x5red, ch5x5),
        "b4":  conv_params(keys[5], 1, in_channels, pool_proj),
    }


# ----------------------------------------------------------------------------
# Forward wrapper (NCHW in, NCHW out == torch.cat([b1,b2,b3,b4], dim=1))
# ----------------------------------------------------------------------------
def inception_forward(params, x_nchw):
    B, Cin, H, W = x_nchw.shape
    HW = H * W
    HWp = _round_up(HW, 128)            # lane-dense stores / aligned rolls
    cin_p = _round_up(Cin, 8)
    bf16 = jnp.bfloat16

    w1, bb1 = params["b1"]
    w2a, b2a = params["b2a"]
    w2b, b2b = params["b2b"]
    w3a, b3a = params["b3a"]
    w3b, b3b = params["b3b"]
    w4, b4 = params["b4"]

    ch1x1 = w1.shape[-1]
    ch3x3red, ch3x3 = w2b.shape[2], w2b.shape[3]
    ch5x5red, ch5x5 = w3b.shape[2], w3b.shape[3]
    pool_proj = w4.shape[-1]
    # reduce-channel pads: 16 keeps every bf16 im2col scratch store tile-aligned
    c1p = _round_up(ch1x1, 8)
    c3p = _round_up(ch3x3red, 16)
    c5p = _round_up(ch5x5red, 16)
    ctot = ch1x1 + ch3x3 + ch5x5 + pool_proj

    def prep1(w, b, rows_pad):
        # (1,1,cin,cout) -> (rows_pad, cin_p) bf16 weight, (rows_pad, 1) f32 bias
        cin, cout = w.shape[2], w.shape[3]
        wm = jnp.pad(w.reshape(cin, cout).T,
                     ((0, rows_pad - cout), (0, cin_p - cin))).astype(bf16)
        bm = jnp.pad(b.reshape(cout, 1), ((0, rows_pad - cout), (0, 0)))
        return wm, bm

    def prepK(w, b, cin_pad):
        # (K,K,cin,cout) -> (cout, K*K*cin_pad) bf16 weight, (cout, 1) f32 bias
        K = w.shape[0]
        cin, cout = w.shape[2], w.shape[3]
        wpad = jnp.pad(w, ((0, 0), (0, 0), (0, cin_pad - cin), (0, 0)))
        return (wpad.reshape(K * K * cin_pad, cout).T.astype(bf16),
                b.reshape(cout, 1))

    w1m, b1m = prep1(w1, bb1, c1p)
    w2am, b2am = prep1(w2a, b2a, c3p)
    w3am, b3am = prep1(w3a, b3a, c5p)
    w1_all = jnp.concatenate([w1m, w2am, w3am], axis=0)   # (c1p+c3p+c5p, cin_p)
    b1_all = jnp.concatenate([b1m, b2am, b3am], axis=0)
    w3m, b3m = prepK(w2b, b2b, c3p)                        # (ch3x3, 9*c3p)
    w5m, b5m = prepK(w3b, b3b, c5p)                        # (ch5x5, 25*c5p)
    wpm, bpm = prep1(w4, b4, pool_proj)                    # (pool_proj, cin_p)

    # ---- pick how many images share one grid step (batch-on-lanes) ----------
    bytes_per_lane = (2 * cin_p * 2                    # x block, bf16, 2x buffered
                      + 2 * ctot * 4                   # out block, f32, 2x buffered
                      + 25 * c5p * 2 + 9 * c3p * 2     # bf16 im2col scratch
                      + (16 + 32 + 16) * 4)            # f32 masks
    Bblk = _pick_bblk(B, HWp, bytes_per_lane)
    nb = B // Bblk
    LB = Bblk * HWp
    # in-register 3x3 patches only while they stay comfortably inside 64 vregs
    use_reg3 = 9 * c3p * LB * 2 <= 96 * 1024

    # ---- masks: sublane-dense 2-D, tiled over the Bblk images on lanes ------
    m3 = jnp.tile(jnp.pad(_shift_masks(3, H, W, HWp), ((0, 16 - 9), (0, 0))),
                  (1, Bblk))                           # (16, LB) f32, 0/1
    m5 = jnp.tile(jnp.pad(_shift_masks(5, H, W, HWp), ((0, 32 - 25), (0, 0))),
                  (1, Bblk))                           # (32, LB) f32, 0/1
    n3 = (m3 - 1.0) * 1e30                             # 0 valid / -1e30 invalid

    # ---- channels-on-sublanes / (batch*spatial)-on-lanes bf16 input ---------
    x_p = jnp.pad(x_nchw.reshape(B, Cin, HW),
                  ((0, 0), (0, cin_p - Cin), (0, HWp - HW))).astype(bf16)
    x2d = jnp.transpose(x_p, (1, 0, 2)).reshape(cin_p, B * HWp)

    kernel = functools.partial(
        _inception_kernel, W=W, HWp=HWp, Bblk=Bblk,
        c1p=c1p, c3p=c3p, c5p=c5p, ch1x1=ch1x1, ch3x3=ch3x3, ch5x5=ch5x5,
        pool_proj=pool_proj, use_reg3=use_reg3)

    flops = 2 * B * HWp * (cin_p * (c1p + c3p + c5p) + 9 * c3p * ch3x3
                           + 25 * c5p * ch5x5 + cin_p * pool_proj)
    bytes_accessed = (2 * (x2d.size + w1_all.size + w3m.size + w5m.size + wpm.size)
                      + 4 * (m3.size + m5.size + n3.size + b1_all.size
                             + b3m.size + b5m.size + bpm.size)
                      + 4 * B * ctot * HWp)

    scratch = [pltpu.VMEM((25 * c5p, LB), bf16)]       # 5x5 im2col patches
    if not use_reg3:
        scratch.append(pltpu.VMEM((9 * c3p, LB), bf16))  # 3x3 im2col patches

    def run(single_buffer_consts):
        def const_spec(shape):
            kwargs = {}
            if single_buffer_consts:
                # grid-invariant operand -> no need for double buffering
                kwargs["pipeline_mode"] = pl.Buffered(1)
            return pl.BlockSpec(shape, lambda i: (0,) * len(shape), **kwargs)

        return pl.pallas_call(
            kernel,
            out_shape=jax.ShapeDtypeStruct((B, ctot, HWp), jnp.float32),
            grid=(nb,),
            in_specs=[
                pl.BlockSpec((cin_p, LB), lambda i: (0, i)),
                const_spec(m3.shape), const_spec(m5.shape), const_spec(n3.shape),
                const_spec(w1_all.shape), const_spec(b1_all.shape),
                const_spec(w3m.shape), const_spec(b3m.shape),
                const_spec(w5m.shape), const_spec(b5m.shape),
                const_spec(wpm.shape), const_spec(bpm.shape),
            ],
            out_specs=pl.BlockSpec((Bblk, ctot, HWp), lambda i: (i, 0, 0)),
            scratch_shapes=scratch,
            compiler_params=pltpu.CompilerParams(
                dimension_semantics=("parallel",),
                vmem_limit_bytes=64 * 1024 * 1024),
            cost_estimate=pl.CostEstimate(flops=flops, transcendentals=0,
                                          bytes_accessed=bytes_accessed),
        )(x2d, m3, m5, n3, w1_all, b1_all, w3m, b3m, w5m, b5m, wpm, bpm)

    try:
        out = run(True)            # single-buffer the grid-invariant operands
    except Exception:              # pipeline_mode not supported -> default
        out = run(False)

    if HWp != HW:
        out = out[..., :HW]
    # (B, Ctot, H*W) is already channel-major: the NCHW reshape is free.
    return out.reshape(B, ctot, H, W)


# ----------------------------------------------------------------------------
# Pure-JAX f32 reference (correctness check)
# ----------------------------------------------------------------------------
def _conv_ref(x_nhwc, w, b):
    K = w.shape[0]
    P = (K - 1) // 2
    y = lax.conv_general_dilated(x_nhwc, w, (1, 1), ((P, P), (P, P)),
                                 dimension_numbers=("NHWC", "HWIO", "NHWC"))
    return y + b


def _maxpool_ref(x_nhwc):
    return lax.reduce_window(x_nhwc, -jnp.inf, lax.max,
                             (1, 3, 3, 1), (1, 1, 1, 1),
                             padding=((0, 0), (1, 1), (1, 1), (0, 0)))


def _inception_ref(params, x_nchw):
    x = jnp.transpose(x_nchw, (0, 2, 3, 1))
    r1 = _conv_ref(x, *params["b1"])
    r2 = _conv_ref(_conv_ref(x, *params["b2a"]), *params["b2b"])
    r3 = _conv_ref(_conv_ref(x, *params["b3a"]), *params["b3b"])
    r4 = _conv_ref(_maxpool_ref(x), *params["b4"])
    return jnp.transpose(jnp.concatenate([r1, r2, r3, r4], axis=-1), (0, 3, 1, 2))


# ----------------------------------------------------------------------------
if __name__ == "__main__":
    key = jax.random.PRNGKey(0)
    kx1, kx2, kp = jax.random.split(key, 3)

    # Inception(4, 8, 4, 8, 4, 8, 8) at small spatial size.
    B, C, H, W = 2, 4, 16, 16
    ch1x1, ch3x3red, ch3x3, ch5x5red, ch5x5, pool_proj = 8, 4, 8, 4, 8, 8
    params = init_inception_params(kp, C, ch1x1, ch3x3red, ch3x3,
                                   ch5x5red, ch5x5, pool_proj)

    # Main check (B=2, 16x16): 2 parallel grid steps, in-register 3x3 patches.
    x = jax.random.normal(kx1, (B, C, H, W), jnp.float32)
    out = jax.block_until_ready(inception_forward(params, x))
    assert out.shape == (B, ch1x1 + ch3x3 + ch5x5 + pool_proj, H, W), out.shape
    ref = _inception_ref(params, x)
    err = float(jnp.max(jnp.abs(out - ref)))
    # bf16 MXU inputs with f32 accumulation -> expect ~1e-3..1e-2 abs error.
    assert jnp.allclose(out, ref, atol=3e-2, rtol=3e-2), err

    # Second check (B=8, 8x8): exercises batch-on-lanes (4 images / grid step),
    # the VMEM-scratch 3x3 path and lane padding of H*W=64 up to 128.
    x2 = jax.random.normal(kx2, (8, C, 8, 8), jnp.float32)
    out2 = jax.block_until_ready(inception_forward(params, x2))
    ref2 = _inception_ref(params, x2)
    err2 = float(jnp.max(jnp.abs(out2 - ref2)))
    assert out2.shape == ref2.shape, out2.shape
    assert jnp.allclose(out2, ref2, atol=3e-2, rtol=3e-2), err2

    print("KERNEL_OK")
</pallas_src>

<mosaic_0001>
module attributes {stable_mosaic.version = 11 : i64} {
  func.func @_inception_kernel(%arg0: i32, %arg1: memref<8x256xbf16, #tpu.memory_space<vmem>>, %arg2: memref<16x256xf32, #tpu.memory_space<vmem>>, %arg3: memref<32x256xf32, #tpu.memory_space<vmem>>, %arg4: memref<16x256xf32, #tpu.memory_space<vmem>>, %arg5: memref<40x8xbf16, #tpu.memory_space<vmem>>, %arg6: memref<40x1xf32, #tpu.memory_space<vmem>>, %arg7: memref<8x144xbf16, #tpu.memory_space<vmem>>, %arg8: memref<8x1xf32, #tpu.memory_space<vmem>>, %arg9: memref<8x400xbf16, #tpu.memory_space<vmem>>, %arg10: memref<8x1xf32, #tpu.memory_space<vmem>>, %arg11: memref<8x8xbf16, #tpu.memory_space<vmem>>, %arg12: memref<8x1xf32, #tpu.memory_space<vmem>>, %arg13: memref<1x32x256xf32, #tpu.memory_space<vmem>>, %arg14: memref<400x256xbf16, #tpu.memory_space<vmem>>) attributes {dimension_semantics = [#tpu.dimension_semantics<parallel>], iteration_bounds = array<i64: 2>, scalar_prefetch = 0 : i64, scratch_operands = 1 : i64, tpu.core_type = #tpu.core_type<tc>, window_params = [{transform_indices = @transform_0, window_bounds = array<i64: 8, 256>}, {pipeline_mode = #tpu.pipeline_mode<synchronous>, transform_indices = @transform_1, window_bounds = array<i64: 16, 256>}, {pipeline_mode = #tpu.pipeline_mode<synchronous>, transform_indices = @transform_2, window_bounds = array<i64: 32, 256>}, {pipeline_mode = #tpu.pipeline_mode<synchronous>, transform_indices = @transform_3, window_bounds = array<i64: 16, 256>}, {pipeline_mode = #tpu.pipeline_mode<synchronous>, transform_indices = @transform_4, window_bounds = array<i64: 40, 8>}, {pipeline_mode = #tpu.pipeline_mode<synchronous>, transform_indices = @transform_5, window_bounds = array<i64: 40, 1>}, {pipeline_mode = #tpu.pipeline_mode<synchronous>, transform_indices = @transform_6, window_bounds = array<i64: 8, 144>}, {pipeline_mode = #tpu.pipeline_mode<synchronous>, transform_indices = @transform_7, window_bounds = array<i64: 8, 1>}, {pipeline_mode = #tpu.pipeline_mode<synchronous>, transform_indices = @transform_8, window_bounds = array<i64: 8, 400>}, {pipeline_mode = #tpu.pipeline_mode<synchronous>, transform_indices = @transform_9, window_bounds = array<i64: 8, 1>}, {pipeline_mode = #tpu.pipeline_mode<synchronous>, transform_indices = @transform_10, window_bounds = array<i64: 8, 8>}, {pipeline_mode = #tpu.pipeline_mode<synchronous>, transform_indices = @transform_11, window_bounds = array<i64: 8, 1>}, {transform_indices = @transform_12, window_bounds = array<i64: 1, 32, 256>}]} {
    %c0 = arith.constant 0 : index
    %c0_0 = arith.constant 0 : index
    %0 = vector.load %arg1[%c0, %c0_0] : memref<8x256xbf16, #tpu.memory_space<vmem>>, vector<8x256xbf16>
    %c0_1 = arith.constant 0 : index
    %c0_2 = arith.constant 0 : index
    %1 = vector.load %arg5[%c0_1, %c0_2] : memref<40x8xbf16, #tpu.memory_space<vmem>>, vector<40x8xbf16>
    %cst = arith.constant dense<0.000000e+00> : vector<40x256xf32>
    %2 = tpu.matmul %1, %0, %cst {dimension_numbers = #tpu.dot_dimension_numbers<[1], [0], [0], [1], [0, 0, 1, 1], [], []>} : vector<40x8xbf16>, vector<8x256xbf16>, vector<40x256xf32> -> vector<40x256xf32>
    %c0_3 = arith.constant 0 : index
    %c0_4 = arith.constant 0 : index
    %3 = vector.load %arg6[%c0_3, %c0_4] : memref<40x1xf32, #tpu.memory_space<vmem>>, vector<40x1xf32>
    %4 = vector.broadcast %3 : vector<40x1xf32> to vector<40x256xf32>
    %5 = arith.addf %2, %4 : vector<40x256xf32>
    %6 = vector.extract_strided_slice %5 {offsets = [0, 0], sizes = [8, 256], strides = [1, 1]} : vector<40x256xf32> to vector<8x256xf32>
    %7 = vector.extract_strided_slice %5 {offsets = [8, 0], sizes = [16, 256], strides = [1, 1]} : vector<40x256xf32> to vector<16x256xf32>
    %8 = vector.extract_strided_slice %5 {offsets = [24, 0], sizes = [16, 256], strides = [1, 1]} : vector<40x256xf32> to vector<16x256xf32>
    %c17_i32 = arith.constant 17 : i32
    %9 = tpu.dynamic_rotate %7 by %c17_i32 dim 1 : vector<16x256xf32>, i32 -> vector<16x256xf32>
    %c0_5 = arith.constant 0 : index
    %c0_6 = arith.constant 0 : index
    %10 = vector.load %arg2[%c0_5, %c0_6] : memref<16x256xf32, #tpu.memory_space<vmem>>, vector<1x256xf32>
    %11 = vector.broadcast %10 : vector<1x256xf32> to vector<16x256xf32>
    %12 = arith.mulf %9, %11 : vector<16x256xf32>
    %13 = arith.truncf %12 : vector<16x256xf32> to vector<16x256xbf16>
    %c16_i32 = arith.constant 16 : i32
    %14 = tpu.dynamic_rotate %7 by %c16_i32 dim 1 : vector<16x256xf32>, i32 -> vector<16x256xf32>
    %c1 = arith.constant 1 : index
    %c0_7 = arith.constant 0 : index
    %15 = vector.load %arg2[%c1, %c0_7] : memref<16x256xf32, #tpu.memory_space<vmem>>, vector<1x256xf32>
    %16 = vector.broadcast %15 : vector<1x256xf32> to vector<16x256xf32>
    %17 = arith.mulf %14, %16 : vector<16x256xf32>
    %18 = arith.truncf %17 : vector<16x256xf32> to vector<16x256xbf16>
    %c15_i32 = arith.constant 15 : i32
    %19 = tpu.dynamic_rotate %7 by %c15_i32 dim 1 : vector<16x256xf32>, i32 -> vector<16x256xf32>
    %c2 = arith.constant 2 : index
    %c0_8 = arith.constant 0 : index
    %20 = vector.load %arg2[%c2, %c0_8] : memref<16x256xf32, #tpu.memory_space<vmem>>, vector<1x256xf32>
    %21 = vector.broadcast %20 : vector<1x256xf32> to vector<16x256xf32>
    %22 = arith.mulf %19, %21 : vector<16x256xf32>
    %23 = arith.truncf %22 : vector<16x256xf32> to vector<16x256xbf16>
    %c1_i32 = arith.constant 1 : i32
    %24 = tpu.dynamic_rotate %7 by %c1_i32 dim 1 : vector<16x256xf32>, i32 -> vector<16x256xf32>
    %c3 = arith.constant 3 : index
    %c0_9 = arith.constant 0 : index
    %25 = vector.load %arg2[%c3, %c0_9] : memref<16x256xf32, #tpu.memory_space<vmem>>, vector<1x256xf32>
    %26 = vector.broadcast %25 : vector<1x256xf32> to vector<16x256xf32>
    %27 = arith.mulf %24, %26 : vector<16x256xf32>
    %28 = arith.truncf %27 : vector<16x256xf32> to vector<16x256xbf16>
    %29 = arith.truncf %7 : vector<16x256xf32> to vector<16x256xbf16>
    %c255_i32 = arith.constant 255 : i32
    %30 = tpu.dynamic_rotate %7 by %c255_i32 dim 1 : vector<16x256xf32>, i32 -> vector<16x256xf32>
    %c5 = arith.constant 5 : index
    %c0_10 = arith.constant 0 : index
    %31 = vector.load %arg2[%c5, %c0_10] : memref<16x256xf32, #tpu.memory_space<vmem>>, vector<1x256xf32>
    %32 = vector.broadcast %31 : vector<1x256xf32> to vector<16x256xf32>
    %33 = arith.mulf %30, %32 : vector<16x256xf32>
    %34 = arith.truncf %33 : vector<16x256xf32> to vector<16x256xbf16>
    %c241_i32 = arith.constant 241 : i32
    %35 = tpu.dynamic_rotate %7 by %c241_i32 dim 1 : vector<16x256xf32>, i32 -> vector<16x256xf32>
    %c6 = arith.constant 6 : index
    %c0_11 = arith.constant 0 : index
    %36 = vector.load %arg2[%c6, %c0_11] : memref<16x256xf32, #tpu.memory_space<vmem>>, vector<1x256xf32>
    %37 = vector.broadcast %36 : vector<1x256xf32> to vector<16x256xf32>
    %38 = arith.mulf %35, %37 : vector<16x256xf32>
    %39 = arith.truncf %38 : vector<16x256xf32> to vector<16x256xbf16>
    %c240_i32 = arith.constant 240 : i32
    %40 = tpu.dynamic_rotate %7 by %c240_i32 dim 1 : vector<16x256xf32>, i32 -> vector<16x256xf32>
    %c7 = arith.constant 7 : index
    %c0_12 = arith.constant 0 : index
    %41 = vector.load %arg2[%c7, %c0_12] : memref<16x256xf32, #tpu.memory_space<vmem>>, vector<1x256xf32>
    %42 = vector.broadcast %41 : vector<1x256xf32> to vector<16x256xf32>
    %43 = arith.mulf %40, %42 : vector<16x256xf32>
    %44 = arith.truncf %43 : vector<16x256xf32> to vector<16x256xbf16>
    %c239_i32 = arith.constant 239 : i32
    %45 = tpu.dynamic_rotate %7 by %c239_i32 dim 1 : vector<16x256xf32>, i32 -> vector<16x256xf32>
    %c8 = arith.constant 8 : index
    %c0_13 = arith.constant 0 : index
    %46 = vector.load %arg2[%c8, %c0_13] : memref<16x256xf32, #tpu.memory_space<vmem>>, vector<1x256xf32>
    %47 = vector.broadcast %46 : vector<1x256xf32> to vector<16x256xf32>
    %48 = arith.mulf %45, %47 : vector<16x256xf32>
    %49 = arith.truncf %48 : vector<16x256xf32> to vector<16x256xbf16>
    %50 = tpu.concatenate %13, %18, %23, %28, %29, %34, %39, %44, %49 in 0 : vector<16x256xbf16>, vector<16x256xbf16>, vector<16x256xbf16>, vector<16x256xbf16>, vector<16x256xbf16>, vector<16x256xbf16>, vector<16x256xbf16>, vector<16x256xbf16>, vector<16x256xbf16> -> vector<144x256xbf16>
    %c0_14 = arith.constant 0 : index
    %c0_15 = arith.constant 0 : index
    %51 = vector.load %arg7[%c0_14, %c0_15] : memref<8x144xbf16, #tpu.memory_space<vmem>>, vector<8x144xbf16>
    %cst_16 = arith.constant dense<0.000000e+00> : vector<8x256xf32>
    %52 = tpu.matmul %51, %50, %cst_16 {dimension_numbers = #tpu.dot_dimension_numbers<[1], [0], [0], [1], [0, 0, 1, 1], [], []>} : vector<8x144xbf16>, vector<144x256xbf16>, vector<8x256xf32> -> vector<8x256xf32>
    %c0_17 = arith.constant 0 : index
    %c0_18 = arith.constant 0 : index
    %53 = vector.load %arg8[%c0_17, %c0_18] : memref<8x1xf32, #tpu.memory_space<vmem>>, vector<8x1xf32>
    %54 = vector.broadcast %53 : vector<8x1xf32> to vector<8x256xf32>
    %55 = arith.addf %52, %54 : vector<8x256xf32>
    %c34_i32 = arith.constant 34 : i32
    %56 = tpu.dynamic_rotate %8 by %c34_i32 dim 1 : vector<16x256xf32>, i32 -> vector<16x256xf32>
    %c0_19 = arith.constant 0 : index
    %c0_20 = arith.constant 0 : index
    %57 = vector.load %arg3[%c0_19, %c0_20] : memref<32x256xf32, #tpu.memory_space<vmem>>, vector<1x256xf32>
    %58 = vector.broadcast %57 : vector<1x256xf32> to vector<16x256xf32>
    %59 = arith.mulf %56, %58 : vector<16x256xf32>
    %60 = arith.truncf %59 : vector<16x256xf32> to vector<16x256xbf16>
    %c0_21 = arith.constant 0 : index
    %c0_22 = arith.constant 0 : index
    %61 = vector.load %arg14[%c0_21, %c0_22] : memref<400x256xbf16, #tpu.memory_space<vmem>>, vector<16x256xbf16>
    tpu.vector_store %arg14[%c0_21, %c0_22], %60 {strides = array<i32>} : memref<400x256xbf16, #tpu.memory_space<vmem>>, vector<16x256xbf16>,
    %c33_i32 = arith.constant 33 : i32
    %62 = tpu.dynamic_rotate %8 by %c33_i32 dim 1 : vector<16x256xf32>, i32 -> vector<16x256xf32>
    %c1_23 = arith.constant 1 : index
    %c0_24 = arith.constant 0 : index
    %63 = vector.load %arg3[%c1_23, %c0_24] : memref<32x256xf32, #tpu.memory_space<vmem>>, vector<1x256xf32>
    %64 = vector.broadcast %63 : vector<1x256xf32> to vector<16x256xf32>
    %65 = arith.mulf %62, %64 : vector<16x256xf32>
    %66 = arith.truncf %65 : vector<16x256xf32> to vector<16x256xbf16>
    %c16 = arith.constant 16 : index
    %c0_25 = arith.constant 0 : index
    %67 = vector.load %arg14[%c16, %c0_25] : memref<400x256xbf16, #tpu.memory_space<vmem>>, vector<16x256xbf16>
    tpu.vector_store %arg14[%c16, %c0_25], %66 {strides = array<i32>} : memref<400x256xbf16, #tpu.memory_space<vmem>>, vector<16x256xbf16>,
    %c32_i32 = arith.constant 32 : i32
    %68 = tpu.dynamic_rotate %8 by %c32_i32 dim 1 : vector<16x256xf32>, i32 -> vector<16x256xf32>
    %c2_26 = arith.constant 2 : index
    %c0_27 = arith.constant 0 : index
    %69 = vector.load %arg3[%c2_26, %c0_27] : memref<32x256xf32, #tpu.memory_space<vmem>>, vector<1x256xf32>
    %70 = vector.broadcast %69 : vector<1x256xf32> to vector<16x256xf32>
    %71 = arith.mulf %68, %70 : vector<16x256xf32>
    %72 = arith.truncf %71 : vector<16x256xf32> to vector<16x256xbf16>
    %c32 = arith.constant 32 : index
    %c0_28 = arith.constant 0 : index
    %73 = vector.load %arg14[%c32, %c0_28] : memref<400x256xbf16, #tpu.memory_space<vmem>>, vector<16x256xbf16>
    tpu.vector_store %arg14[%c32, %c0_28], %72 {strides = array<i32>} : memref<400x256xbf16, #tpu.memory_space<vmem>>, vector<16x256xbf16>,
    %c31_i32 = arith.constant 31 : i32
    %74 = tpu.dynamic_rotate %8 by %c31_i32 dim 1 : vector<16x256xf32>, i32 -> vector<16x256xf32>
    %c3_29 = arith.constant 3 : index
    %c0_30 = arith.constant 0 : index
    %75 = vector.load %arg3[%c3_29, %c0_30] : memref<32x256xf32, #tpu.memory_space<vmem>>, vector<1x256xf32>
    %76 = vector.broadcast %75 : vector<1x256xf32> to vector<16x256xf32>
    %77 = arith.mulf %74, %76 : vector<16x256xf32>
    %78 = arith.truncf %77 : vector<16x256xf32> to vector<16x256xbf16>
    %c48 = arith.constant 48 : index
    %c0_31 = arith.constant 0 : index
    %79 = vector.load %arg14[%c48, %c0_31] : memref<400x256xbf16, #tpu.memory_space<vmem>>, vector<16x256xbf16>
    tpu.vector_store %arg14[%c48, %c0_31], %78 {strides = array<i32>} : memref<400x256xbf16, #tpu.memory_space<vmem>>, vector<16x256xbf16>,
    %c30_i32 = arith.constant 30 : i32
    %80 = tpu.dynamic_rotate %8 by %c30_i32 dim 1 : vector<16x256xf32>, i32 -> vector<16x256xf32>
    %c4 = arith.constant 4 : index
    %c0_32 = arith.constant 0 : index
    %81 = vector.load %arg3[%c4, %c0_32] : memref<32x256xf32, #tpu.memory_space<vmem>>, vector<1x256xf32>
    %82 = vector.broadcast %81 : vector<1x256xf32> to vector<16x256xf32>
    %83 = arith.mulf %80, %82 : vector<16x256xf32>
    %84 = arith.truncf %83 : vector<16x256xf32> to vector<16x256xbf16>
    %c64 = arith.constant 64 : index
    %c0_33 = arith.constant 0 : index
    %85 = vector.load %arg14[%c64, %c0_33] : memref<400x256xbf16, #tpu.memory_space<vmem>>, vector<16x256xbf16>
    tpu.vector_store %arg14[%c64, %c0_33], %84 {strides = array<i32>} : memref<400x256xbf16, #tpu.memory_space<vmem>>, vector<16x256xbf16>,
    %c18_i32 = arith.constant 18 : i32
    %86 = tpu.dynamic_rotate %8 by %c18_i32 dim 1 : vector<16x256xf32>, i32 -> vector<16x256xf32>
    %c5_34 = arith.constant 5 : index
    %c0_35 = arith.constant 0 : index
    %87 = vector.load %arg3[%c5_34, %c0_35] : memref<32x256xf32, #tpu.memory_space<vmem>>, vector<1x256xf32>
    %88 = vector.broadcast %87 : vector<1x256xf32> to vector<16x256xf32>
    %89 = arith.mulf %86, %88 : vector<16x256xf32>
    %90 = arith.truncf %89 : vector<16x256xf32> to vector<16x256xbf16>
    %c80 = arith.constant 80 : index
    %c0_36 = arith.constant 0 : index
    %91 = vector.load %arg14[%c80, %c0_36] : memref<400x256xbf16, #tpu.memory_space<vmem>>, vector<16x256xbf16>
    tpu.vector_store %arg14[%c80, %c0_36], %90 {strides = array<i32>} : memref<400x256xbf16, #tpu.memory_space<vmem>>, vector<16x256xbf16>,
    %c17_i32_37 = arith.constant 17 : i32
    %92 = tpu.dynamic_rotate %8 by %c17_i32_37 dim 1 : vector<16x256xf32>, i32 -> vector<16x256xf32>
    %c6_38 = arith.constant 6 : index
    %c0_39 = arith.constant 0 : index
    %93 = vector.load %arg3[%c6_38, %c0_39] : memref<32x256xf32, #tpu.memory_space<vmem>>, vector<1x256xf32>
    %94 = vector.broadcast %93 : vector<1x256xf32> to vector<16x256xf32>
    %95 = arith.mulf %92, %94 : vector<16x256xf32>
    %96 = arith.truncf %95 : vector<16x256xf32> to vector<16x256xbf16>
    %c96 = arith.constant 96 : index
    %c0_40 = arith.constant 0 : index
    %97 = vector.load %arg14[%c96, %c0_40] : memref<400x256xbf16, #tpu.memory_space<vmem>>, vector<16x256xbf16>
    tpu.vector_store %arg14[%c96, %c0_40], %96 {strides = array<i32>} : memref<400x256xbf16, #tpu.memory_space<vmem>>, vector<16x256xbf16>,
    %c16_i32_41 = arith.constant 16 : i32
    %98 = tpu.dynamic_rotate %8 by %c16_i32_41 dim 1 : vector<16x256xf32>, i32 -> vector<16x256xf32>
    %c7_42 = arith.constant 7 : index
    %c0_43 = arith.constant 0 : index
    %99 = vector.load %arg3[%c7_42, %c0_43] : memref<32x256xf32, #tpu.memory_space<vmem>>, vector<1x256xf32>
    %100 = vector.broadcast %99 : vector<1x256xf32> to vector<16x256xf32>
    %101 = arith.mulf %98, %100 : vector<16x256xf32>
    %102 = arith.truncf %101 : vector<16x256xf32> to vector<16x256xbf16>
    %c112 = arith.constant 112 : index
    %c0_44 = arith.constant 0 : index
    %103 = vector.load %arg14[%c112, %c0_44] : memref<400x256xbf16, #tpu.memory_space<vmem>>, vector<16x256xbf16>
    tpu.vector_store %arg14[%c112, %c0_44], %102 {strides = array<i32>} : memref<400x256xbf16, #tpu.memory_space<vmem>>, vector<16x256xbf16>,
    %c15_i32_45 = arith.constant 15 : i32
    %104 = tpu.dynamic_rotate %8 by %c15_i32_45 dim 1 : vector<16x256xf32>, i32 -> vector<16x256xf32>
    %c8_46 = arith.constant 8 : index
    %c0_47 = arith.constant 0 : index
    %105 = vector.load %arg3[%c8_46, %c0_47] : memref<32x256xf32, #tpu.memory_space<vmem>>, vector<1x256xf32>
    %106 = vector.broadcast %105 : vector<1x256xf32> to vector<16x256xf32>
    %107 = arith.mulf %104, %106 : vector<16x256xf32>
    %108 = arith.truncf %107 : vector<16x256xf32> to vector<16x256xbf16>
    %c128 = arith.constant 128 : index
    %c0_48 = arith.constant 0 : index
    %109 = vector.load %arg14[%c128, %c0_48] : memref<400x256xbf16, #tpu.memory_space<vmem>>, vector<16x256xbf16>
    tpu.vector_store %arg14[%c128, %c0_48], %108 {strides = array<i32>} : memref<400x256xbf16, #tpu.memory_space<vmem>>, vector<16x256xbf16>,
    %c14_i32 = arith.constant 14 : i32
    %110 = tpu.dynamic_rotate %8 by %c14_i32 dim 1 : vector<16x256xf32>, i32 -> vector<16x256xf32>
    %c9 = arith.constant 9 : index
    %c0_49 = arith.constant 0 : index
    %111 = vector.load %arg3[%c9, %c0_49] : memref<32x256xf32, #tpu.memory_space<vmem>>, vector<1x256xf32>
    %112 = vector.broadcast %111 : vector<1x256xf32> to vector<16x256xf32>
    %113 = arith.mulf %110, %112 : vector<16x256xf32>
    %114 = arith.truncf %113 : vector<16x256xf32> to vector<16x256xbf16>
    %c144 = arith.constant 144 : index
    %c0_50 = arith.constant 0 : index
    %115 = vector.load %arg14[%c144, %c0_50] : memref<400x256xbf16, #tpu.memory_space<vmem>>, vector<16x256xbf16>
    tpu.vector_store %arg14[%c144, %c0_50], %114 {strides = array<i32>} : memref<400x256xbf16, #tpu.memory_space<vmem>>, vector<16x256xbf16>,
    %c2_i32 = arith.constant 2 : i32
    %116 = tpu.dynamic_rotate %8 by %c2_i32 dim 1 : vector<16x256xf32>, i32 -> vector<16x256xf32>
    %c10 = arith.constant 10 : index
    %c0_51 = arith.constant 0 : index
    %117 = vector.load %arg3[%c10, %c0_51] : memref<32x256xf32, #tpu.memory_space<vmem>>, vector<1x256xf32>
    %118 = vector.broadcast %117 : vector<1x256xf32> to vector<16x256xf32>
    %119 = arith.mulf %116, %118 : vector<16x256xf32>
    %120 = arith.truncf %119 : vector<16x256xf32> to vector<16x256xbf16>
    %c160 = arith.constant 160 : index
    %c0_52 = arith.constant 0 : index
    %121 = vector.load %arg14[%c160, %c0_52] : memref<400x256xbf16, #tpu.memory_space<vmem>>, vector<16x256xbf16>
    tpu.vector_store %arg14[%c160, %c0_52], %120 {strides = array<i32>} : memref<400x256xbf16, #tpu.memory_space<vmem>>, vector<16x256xbf16>,
    %c1_i32_53 = arith.constant 1 : i32
    %122 = tpu.dynamic_rotate %8 by %c1_i32_53 dim 1 : vector<16x256xf32>, i32 -> vector<16x256xf32>
    %c11 = arith.constant 11 : index
    %c0_54 = arith.constant 0 : index
    %123 = vector.load %arg3[%c11, %c0_54] : memref<32x256xf32, #tpu.memory_space<vmem>>, vector<1x256xf32>
    %124 = vector.broadcast %123 : vector<1x256xf32> to vector<16x256xf32>
    %125 = arith.mulf %122, %124 : vector<16x256xf32>
    %126 = arith.truncf %125 : vector<16x256xf32> to vector<16x256xbf16>
    %c176 = arith.constant 176 : index
    %c0_55 = arith.constant 0 : index
    %127 = vector.load %arg14[%c176, %c0_55] : memref<400x256xbf16, #tpu.memory_space<vmem>>, vector<16x256xbf16>
    tpu.vector_store %arg14[%c176, %c0_55], %126 {strides = array<i32>} : memref<400x256xbf16, #tpu.memory_space<vmem>>, vector<16x256xbf16>,
    %128 = arith.truncf %8 : vector<16x256xf32> to vector<16x256xbf16>
    %c192 = arith.constant 192 : index
    %c0_56 = arith.constant 0 : index
    %129 = vector.load %arg14[%c192, %c0_56] : memref<400x256xbf16, #tpu.memory_space<vmem>>, vector<16x256xbf16>
    tpu.vector_store %arg14[%c192, %c0_56], %128 {strides = array<i32>} : memref<400x256xbf16, #tpu.memory_space<vmem>>, vector<16x256xbf16>,
    %c255_i32_57 = arith.constant 255 : i32
    %130 = tpu.dynamic_rotate %8 by %c255_i32_57 dim 1 : vector<16x256xf32>, i32 -> vector<16x256xf32>
    %c13 = arith.constant 13 : index
    %c0_58 = arith.constant 0 : index
    %131 = vector.load %arg3[%c13, %c0_58] : memref<32x256xf32, #tpu.memory_space<vmem>>, vector<1x256xf32>
    %132 = vector.broadcast %131 : vector<1x256xf32> to vector<16x256xf32>
    %133 = arith.mulf %130, %132 : vector<16x256xf32>
    %134 = arith.truncf %133 : vector<16x256xf32> to vector<16x256xbf16>
    %c208 = arith.constant 208 : index
    %c0_59 = arith.constant 0 : index
    %135 = vector.load %arg14[%c208, %c0_59] : memref<400x256xbf16, #tpu.memory_space<vmem>>, vector<16x256xbf16>
    tpu.vector_store %arg14[%c208, %c0_59], %134 {strides = array<i32>} : memref<400x256xbf16, #tpu.memory_space<vmem>>, vector<16x256xbf16>,
    %c254_i32 = arith.constant 254 : i32
    %136 = tpu.dynamic_rotate %8 by %c254_i32 dim 1 : vector<16x256xf32>, i32 -> vector<16x256xf32>
    %c14 = arith.constant 14 : index
    %c0_60 = arith.constant 0 : index
    %137 = vector.load %arg3[%c14, %c0_60] : memref<32x256xf32, #tpu.memory_space<vmem>>, vector<1x256xf32>
    %138 = vector.broadcast %137 : vector<1x256xf32> to vector<16x256xf32>
    %139 = arith.mulf %136, %138 : vector<16x256xf32>
    %140 = arith.truncf %139 : vector<16x256xf32> to vector<16x256xbf16>
    %c224 = arith.constant 224 : index
    %c0_61 = arith.constant 0 : index
    %141 = vector.load %arg14[%c224, %c0_61] : memref<400x256xbf16, #tpu.memory_space<vmem>>, vector<16x256xbf16>
    tpu.vector_store %arg14[%c224, %c0_61], %140 {strides = array<i32>} : memref<400x256xbf16, #tpu.memory_space<vmem>>, vector<16x256xbf16>,
    %c242_i32 = arith.constant 242 : i32
    %142 = tpu.dynamic_rotate %8 by %c242_i32 dim 1 : vector<16x256xf32>, i32 -> vector<16x256xf32>
    %c15 = arith.constant 15 : index
    %c0_62 = arith.constant 0 : index
    %143 = vector.load %arg3[%c15, %c0_62] : memref<32x256xf32, #tpu.memory_space<vmem>>, vector<1x256xf32>
    %144 = vector.broadcast %143 : vector<1x256xf32> to vector<16x256xf32>
    %145 = arith.mulf %142, %144 : vector<16x256xf32>
    %146 = arith.truncf %145 : vector<16x256xf32> to vector<16x256xbf16>
    %c240 = arith.constant 240 : index
    %c0_63 = arith.constant 0 : index
    %147 = vector.load %arg14[%c240, %c0_63] : memref<400x256xbf16, #tpu.memory_space<vmem>>, vector<16x256xbf16>
    tpu.vector_store %arg14[%c240, %c0_63], %146 {strides = array<i32>} : memref<400x256xbf16, #tpu.memory_space<vmem>>, vector<16x256xbf16>,
    %c241_i32_64 = arith.constant 241 : i32
    %148 = tpu.dynamic_rotate %8 by %c241_i32_64 dim 1 : vector<16x256xf32>, i32 -> vector<16x256xf32>
    %c16_65 = arith.constant 16 : index
    %c0_66 = arith.constant 0 : index
    %149 = vector.load %arg3[%c16_65, %c0_66] : memref<32x256xf32, #tpu.memory_space<vmem>>, vector<1x256xf32>
    %150 = vector.broadcast %149 : vector<1x256xf32> to vector<16x256xf32>
    %151 = arith.mulf %148, %150 : vector<16x256xf32>
    %152 = arith.truncf %151 : vector<16x256xf32> to vector<16x256xbf16>
    %c256 = arith.constant 256 : index
    %c0_67 = arith.constant 0 : index
    %153 = vector.load %arg14[%c256, %c0_67] : memref<400x256xbf16, #tpu.memory_space<vmem>>, vector<16x256xbf16>
    tpu.vector_store %arg14[%c256, %c0_67], %152 {strides = array<i32>} : memref<400x256xbf16, #tpu.memory_space<vmem>>, vector<16x256xbf16>,
    %c240_i32_68 = arith.constant 240 : i32
    %154 = tpu.dynamic_rotate %8 by %c240_i32_68 dim 1 : vector<16x256xf32>, i32 -> vector<16x256xf32>
    %c17 = arith.constant 17 : index
    %c0_69 = arith.constant 0 : index
    %155 = vector.load %arg3[%c17, %c0_69] : memref<32x256xf32, #tpu.memory_space<vmem>>, vector<1x256xf32>
    %156 = vector.broadcast %155 : vector<1x256xf32> to vector<16x256xf32>
    %157 = arith.mulf %154, %156 : vector<16x256xf32>
    %158 = arith.truncf %157 : vector<16x256xf32> to vector<16x256xbf16>
    %c272 = arith.constant 272 : index
    %c0_70 = arith.constant 0 : index
    %159 = vector.load %arg14[%c272, %c0_70] : memref<400x256xbf16, #tpu.memory_space<vmem>>, vector<16x256xbf16>
    tpu.vector_store %arg14[%c272, %c0_70], %158 {strides = array<i32>} : memref<400x256xbf16, #tpu.memory_space<vmem>>, vector<16x256xbf16>,
    %c239_i32_71 = arith.constant 239 : i32
    %160 = tpu.dynamic_rotate %8 by %c239_i32_71 dim 1 : vector<16x256xf32>, i32 -> vector<16x256xf32>
    %c18 = arith.constant 18 : index
    %c0_72 = arith.constant 0 : index
    %161 = vector.load %arg3[%c18, %c0_72] : memref<32x256xf32, #tpu.memory_space<vmem>>, vector<1x256xf32>
    %162 = vector.broadcast %161 : vector<1x256xf32> to vector<16x256xf32>
    %163 = arith.mulf %160, %162 : vector<16x256xf32>
    %164 = arith.truncf %163 : vector<16x256xf32> to vector<16x256xbf16>
    %c288 = arith.constant 288 : index
    %c0_73 = arith.constant 0 : index
    %165 = vector.load %arg14[%c288, %c0_73] : memref<400x256xbf16, #tpu.memory_space<vmem>>, vector<16x256xbf16>
    tpu.vector_store %arg14[%c288, %c0_73], %164 {strides = array<i32>} : memref<400x256xbf16, #tpu.memory_space<vmem>>, vector<16x256xbf16>,
    %c238_i32 = arith.constant 238 : i32
    %166 = tpu.dynamic_rotate %8 by %c238_i32 dim 1 : vector<16x256xf32>, i32 -> vector<16x256xf32>
    %c19 = arith.constant 19 : index
    %c0_74 = arith.constant 0 : index
    %167 = vector.load %arg3[%c19, %c0_74] : memref<32x256xf32, #tpu.memory_space<vmem>>, vector<1x256xf32>
    %168 = vector.broadcast %167 : vector<1x256xf32> to vector<16x256xf32>
    %169 = arith.mulf %166, %168 : vector<16x256xf32>
    %170 = arith.truncf %169 : vector<16x256xf32> to vector<16x256xbf16>
    %c304 = arith.constant 304 : index
    %c0_75 = arith.constant 0 : index
    %171 = vector.load %arg14[%c304, %c0_75] : memref<400x256xbf16, #tpu.memory_space<vmem>>, vector<16x256xbf16>
    tpu.vector_store %arg14[%c304, %c0_75], %170 {strides = array<i32>} : memref<400x256xbf16, #tpu.memory_space<vmem>>, vector<16x256xbf16>,
    %c226_i32 = arith.constant 226 : i32
    %172 = tpu.dynamic_rotate %8 by %c226_i32 dim 1 : vector<16x256xf32>, i32 -> vector<16x256xf32>
    %c20 = arith.constant 20 : index
    %c0_76 = arith.constant 0 : index
    %173 = vector.load %arg3[%c20, %c0_76] : memref<32x256xf32, #tpu.memory_space<vmem>>, vector<1x256xf32>
    %174 = vector.broadcast %173 : vector<1x256xf32> to vector<16x256xf32>
    %175 = arith.mulf %172, %174 : vector<16x256xf32>
    %176 = arith.truncf %175 : vector<16x256xf32> to vector<16x256xbf16>
    %c320 = arith.constant 320 : index
    %c0_77 = arith.constant 0 : index
    %177 = vector.load %arg14[%c320, %c0_77] : memref<400x256xbf16, #tpu.memory_space<vmem>>, vector<16x256xbf16>
    tpu.vector_store %arg14[%c320, %c0_77], %176 {strides = array<i32>} : memref<400x256xbf16, #tpu.memory_space<vmem>>, vector<16x256xbf16>,
    %c225_i32 = arith.constant 225 : i32
    %178 = tpu.dynamic_rotate %8 by %c225_i32 dim 1 : vector<16x256xf32>, i32 -> vector<16x256xf32>
    %c21 = arith.constant 21 : index
    %c0_78 = arith.constant 0 : index
    %179 = vector.load %arg3[%c21, %c0_78] : memref<32x256xf32, #tpu.memory_space<vmem>>, vector<1x256xf32>
    %180 = vector.broadcast %179 : vector<1x256xf32> to vector<16x256xf32>
    %181 = arith.mulf %178, %180 : vector<16x256xf32>
    %182 = arith.truncf %181 : vector<16x256xf32> to vector<16x256xbf16>
    %c336 = arith.constant 336 : index
    %c0_79 = arith.constant 0 : index
    %183 = vector.load %arg14[%c336, %c0_79] : memref<400x256xbf16, #tpu.memory_space<vmem>>, vector<16x256xbf16>
    tpu.vector_store %arg14[%c336, %c0_79], %182 {strides = array<i32>} : memref<400x256xbf16, #tpu.memory_space<vmem>>, vector<16x256xbf16>,
    %c224_i32 = arith.constant 224 : i32
    %184 = tpu.dynamic_rotate %8 by %c224_i32 dim 1 : vector<16x256xf32>, i32 -> vector<16x256xf32>
    %c22 = arith.constant 22 : index
    %c0_80 = arith.constant 0 : index
    %185 = vector.load %arg3[%c22, %c0_80] : memref<32x256xf32, #tpu.memory_space<vmem>>, vector<1x256xf32>
    %186 = vector.broadcast %185 : vector<1x256xf32> to vector<16x256xf32>
    %187 = arith.mulf %184, %186 : vector<16x256xf32>
    %188 = arith.truncf %187 : vector<16x256xf32> to vector<16x256xbf16>
    %c352 = arith.constant 352 : index
    %c0_81 = arith.constant 0 : index
    %189 = vector.load %arg14[%c352, %c0_81] : memref<400x256xbf16, #tpu.memory_space<vmem>>, vector<16x256xbf16>
    tpu.vector_store %arg14[%c352, %c0_81], %188 {strides = array<i32>} : memref<400x256xbf16, #tpu.memory_space<vmem>>, vector<16x256xbf16>,
    %c223_i32 = arith.constant 223 : i32
    %190 = tpu.dynamic_rotate %8 by %c223_i32 dim 1 : vector<16x256xf32>, i32 -> vector<16x256xf32>
    %c23 = arith.constant 23 : index
    %c0_82 = arith.constant 0 : index
    %191 = vector.load %arg3[%c23, %c0_82] : memref<32x256xf32, #tpu.memory_space<vmem>>, vector<1x256xf32>
    %192 = vector.broadcast %191 : vector<1x256xf32> to vector<16x256xf32>
    %193 = arith.mulf %190, %192 : vector<16x256xf32>
    %194 = arith.truncf %193 : vector<16x256xf32> to vector<16x256xbf16>
    %c368 = arith.constant 368 : index
    %c0_83 = arith.constant 0 : index
    %195 = vector.load %arg14[%c368, %c0_83] : memref<400x256xbf16, #tpu.memory_space<vmem>>, vector<16x256xbf16>
    tpu.vector_store %arg14[%c368, %c0_83], %194 {strides = array<i32>} : memref<400x256xbf16, #tpu.memory_space<vmem>>, vector<16x256xbf16>,
    %c222_i32 = arith.constant 222 : i32
    %196 = tpu.dynamic_rotate %8 by %c222_i32 dim 1 : vector<16x256xf32>, i32 -> vector<16x256xf32>
    %c24 = arith.constant 24 : index
    %c0_84 = arith.constant 0 : index
    %197 = vector.load %arg3[%c24, %c0_84] : memref<32x256xf32, #tpu.memory_space<vmem>>, vector<1x256xf32>
    %198 = vector.broadcast %197 : vector<1x256xf32> to vector<16x256xf32>
    %199 = arith.mulf %196, %198 : vector<16x256xf32>
    %200 = arith.truncf %199 : vector<16x256xf32> to vector<16x256xbf16>
    %c384 = arith.constant 384 : index
    %c0_85 = arith.constant 0 : index
    %201 = vector.load %arg14[%c384, %c0_85] : memref<400x256xbf16, #tpu.memory_space<vmem>>, vector<16x256xbf16>
    tpu.vector_store %arg14[%c384, %c0_85], %200 {strides = array<i32>} : memref<400x256xbf16, #tpu.memory_space<vmem>>, vector<16x256xbf16>,
    %c0_86 = arith.constant 0 : index
    %c0_87 = arith.constant 0 : index
    %202 = vector.load %arg9[%c0_86, %c0_87] : memref<8x400xbf16, #tpu.memory_space<vmem>>, vector<8x400xbf16>
    %c0_88 = arith.constant 0 : index
    %c0_89 = arith.constant 0 : index
    %203 = vector.load %arg14[%c0_88, %c0_89] : memref<400x256xbf16, #tpu.memory_space<vmem>>, vector<400x256xbf16>
    %cst_90 = arith.constant dense<0.000000e+00> : vector<8x256xf32>
    %204 = tpu.matmul %202, %203, %cst_90 {dimension_numbers = #tpu.dot_dimension_numbers<[1], [0], [0], [1], [0, 0, 1, 1], [], []>} : vector<8x400xbf16>, vector<400x256xbf16>, vector<8x256xf32> -> vector<8x256xf32>
    %c0_91 = arith.constant 0 : index
    %c0_92 = arith.constant 0 : index
    %205 = vector.load %arg10[%c0_91, %c0_92] : memref<8x1xf32, #tpu.memory_space<vmem>>, vector<8x1xf32>
    %206 = vector.broadcast %205 : vector<8x1xf32> to vector<8x256xf32>
    %207 = arith.addf %204, %206 : vector<8x256xf32>
    %208 = arith.extf %0 : vector<8x256xbf16> to vector<8x256xf32>
    %c17_i32_93 = arith.constant 17 : i32
    %209 = tpu.dynamic_rotate %208 by %c17_i32_93 dim 1 : vector<8x256xf32>, i32 -> vector<8x256xf32>
    %c0_94 = arith.constant 0 : index
    %c0_95 = arith.constant 0 : index
    %210 = vector.load %arg4[%c0_94, %c0_95] : memref<16x256xf32, #tpu.memory_space<vmem>>, vector<1x256xf32>
    %211 = vector.broadcast %210 : vector<1x256xf32> to vector<8x256xf32>
    %212 = arith.addf %209, %211 : vector<8x256xf32>
    %213 = arith.maximumf %208, %212 : vector<8x256xf32>
    %c16_i32_96 = arith.constant 16 : i32
    %214 = tpu.dynamic_rotate %208 by %c16_i32_96 dim 1 : vector<8x256xf32>, i32 -> vector<8x256xf32>
    %c1_97 = arith.constant 1 : index
    %c0_98 = arith.constant 0 : index
    %215 = vector.load %arg4[%c1_97, %c0_98] : memref<16x256xf32, #tpu.memory_space<vmem>>, vector<1x256xf32>
    %216 = vector.broadcast %215 : vector<1x256xf32> to vector<8x256xf32>
    %217 = arith.addf %214, %216 : vector<8x256xf32>
    %218 = arith.maximumf %213, %217 : vector<8x256xf32>
    %c15_i32_99 = arith.constant 15 : i32
    %219 = tpu.dynamic_rotate %208 by %c15_i32_99 dim 1 : vector<8x256xf32>, i32 -> vector<8x256xf32>
    %c2_100 = arith.constant 2 : index
    %c0_101 = arith.constant 0 : index
    %220 = vector.load %arg4[%c2_100, %c0_101] : memref<16x256xf32, #tpu.memory_space<vmem>>, vector<1x256xf32>
    %221 = vector.broadcast %220 : vector<1x256xf32> to vector<8x256xf32>
    %222 = arith.addf %219, %221 : vector<8x256xf32>
    %223 = arith.maximumf %218, %222 : vector<8x256xf32>
    %c1_i32_102 = arith.constant 1 : i32
    %224 = tpu.dynamic_rotate %208 by %c1_i32_102 dim 1 : vector<8x256xf32>, i32 -> vector<8x256xf32>
    %c3_103 = arith.constant 3 : index
    %c0_104 = arith.constant 0 : index
    %225 = vector.load %arg4[%c3_103, %c0_104] : memref<16x256xf32, #tpu.memory_space<vmem>>, vector<1x256xf32>
    %226 = vector.broadcast %225 : vector<1x256xf32> to vector<8x256xf32>
    %227 = arith.addf %224, %226 : vector<8x256xf32>
    %228 = arith.maximumf %223, %227 : vector<8x256xf32>
    %c255_i32_105 = arith.constant 255 : i32
    %229 = tpu.dynamic_rotate %208 by %c255_i32_105 dim 1 : vector<8x256xf32>, i32 -> vector<8x256xf32>
    %c5_106 = arith.constant 5 : index
    %c0_107 = arith.constant 0 : index
    %230 = vector.load %arg4[%c5_106, %c0_107] : memref<16x256xf32, #tpu.memory_space<vmem>>, vector<1x256xf32>
    %231 = vector.broadcast %230 : vector<1x256xf32> to vector<8x256xf32>
    %232 = arith.addf %229, %231 : vector<8x256xf32>
    %233 = arith.maximumf %228, %232 : vector<8x256xf32>
    %c241_i32_108 = arith.constant 241 : i32
    %234 = tpu.dynamic_rotate %208 by %c241_i32_108 dim 1 : vector<8x256xf32>, i32 -> vector<8x256xf32>
    %c6_109 = arith.constant 6 : index
    %c0_110 = arith.constant 0 : index
    %235 = vector.load %arg4[%c6_109, %c0_110] : memref<16x256xf32, #tpu.memory_space<vmem>>, vector<1x256xf32>
    %236 = vector.broadcast %235 : vector<1x256xf32> to vector<8x256xf32>
    %237 = arith.addf %234, %236 : vector<8x256xf32>
    %238 = arith.maximumf %233, %237 : vector<8x256xf32>
    %c240_i32_111 = arith.constant 240 : i32
    %239 = tpu.dynamic_rotate %208 by %c240_i32_111 dim 1 : vector<8x256xf32>, i32 -> vector<8x256xf32>
    %c7_112 = arith.constant 7 : index
    %c0_113 = arith.constant 0 : index
    %240 = vector.load %arg4[%c7_112, %c0_113] : memref<16x256xf32, #tpu.memory_space<vmem>>, vector<1x256xf32>
    %241 = vector.broadcast %240 : vector<1x256xf32> to vector<8x256xf32>
    %242 = arith.addf %239, %241 : vector<8x256xf32>
    %243 = arith.maximumf %238, %242 : vector<8x256xf32>
    %c239_i32_114 = arith.constant 239 : i32
    %244 = tpu.dynamic_rotate %208 by %c239_i32_114 dim 1 : vector<8x256xf32>, i32 -> vector<8x256xf32>
    %c8_115 = arith.constant 8 : index
    %c0_116 = arith.constant 0 : index
    %245 = vector.load %arg4[%c8_115, %c0_116] : memref<16x256xf32, #tpu.memory_space<vmem>>, vector<1x256xf32>
    %246 = vector.broadcast %245 : vector<1x256xf32> to vector<8x256xf32>
    %247 = arith.addf %244, %246 : vector<8x256xf32>
    %248 = arith.maximumf %243, %247 : vector<8x256xf32>
    %c0_117 = arith.constant 0 : index
    %c0_118 = arith.constant 0 : index
    %249 = vector.load %arg11[%c0_117, %c0_118] : memref<8x8xbf16, #tpu.memory_space<vmem>>, vector<8x8xbf16>
    %250 = arith.truncf %248 : vector<8x256xf32> to vector<8x256xbf16>
    %cst_119 = arith.constant dense<0.000000e+00> : vector<8x256xf32>
    %251 = tpu.matmul %249, %250, %cst_119 {dimension_numbers = #tpu.dot_dimension_numbers<[1], [0], [0], [1], [0, 0, 1, 1], [], []>} : vector<8x8xbf16>, vector<8x256xbf16>, vector<8x256xf32> -> vector<8x256xf32>
    %c0_120 = arith.constant 0 : index
    %c0_121 = arith.constant 0 : index
    %252 = vector.load %arg12[%c0_120, %c0_121] : memref<8x1xf32, #tpu.memory_space<vmem>>, vector<8x1xf32>
    %253 = vector.broadcast %252 : vector<8x1xf32> to vector<8x256xf32>
    %254 = arith.addf %251, %253 : vector<8x256xf32>
    %c0_122 = arith.constant 0 : index
    %c0_123 = arith.constant 0 : index
    %c0_124 = arith.constant 0 : index
    %255 = vector.load %arg13[%c0_122, %c0_123, %c0_124] : memref<1x32x256xf32, #tpu.memory_space<vmem>>, vector<1x8x256xf32>
    %256 = vector.shape_cast %255 : vector<1x8x256xf32> to vector<8x256xf32>
    %257 = vector.shape_cast %6 : vector<8x256xf32> to vector<1x8x256xf32>
    tpu.vector_store %arg13[%c0_122, %c0_123, %c0_124], %257 {strides = array<i32>} : memref<1x32x256xf32, #tpu.memory_space<vmem>>, vector<1x8x256xf32>,
    %c0_125 = arith.constant 0 : index
    %c8_126 = arith.constant 8 : index
    %c0_127 = arith.constant 0 : index
    %258 = vector.load %arg13[%c0_125, %c8_126, %c0_127] : memref<1x32x256xf32, #tpu.memory_space<vmem>>, vector<1x8x256xf32>
    %259 = vector.shape_cast %258 : vector<1x8x256xf32> to vector<8x256xf32>
    %260 = vector.shape_cast %55 : vector<8x256xf32> to vector<1x8x256xf32>
    tpu.vector_store %arg13[%c0_125, %c8_126, %c0_127], %260 {strides = array<i32>} : memref<1x32x256xf32, #tpu.memory_space<vmem>>, vector<1x8x256xf32>,
    %c0_128 = arith.constant 0 : index
    %c16_129 = arith.constant 16 : index
    %c0_130 = arith.constant 0 : index
    %261 = vector.load %arg13[%c0_128, %c16_129, %c0_130] : memref<1x32x256xf32, #tpu.memory_space<vmem>>, vector<1x8x256xf32>
    %262 = vector.shape_cast %261 : vector<1x8x256xf32> to vector<8x256xf32>
    %263 = vector.shape_cast %207 : vector<8x256xf32> to vector<1x8x256xf32>
    tpu.vector_store %arg13[%c0_128, %c16_129, %c0_130], %263 {strides = array<i32>} : memref<1x32x256xf32, #tpu.memory_space<vmem>>, vector<1x8x256xf32>,
    %c0_131 = arith.constant 0 : index
    %c24_132 = arith.constant 24 : index
    %c0_133 = arith.constant 0 : index
    %264 = vector.load %arg13[%c0_131, %c24_132, %c0_133] : memref<1x32x256xf32, #tpu.memory_space<vmem>>, vector<1x8x256xf32>
    %265 = vector.shape_cast %264 : vector<1x8x256xf32> to vector<8x256xf32>
    %266 = vector.shape_cast %254 : vector<8x256xf32> to vector<1x8x256xf32>
    tpu.vector_store %arg13[%c0_131, %c24_132, %c0_133], %266 {strides = array<i32>} : memref<1x32x256xf32, #tpu.memory_space<vmem>>, vector<1x8x256xf32>,
    return
  }
  func.func @transform_0(%arg0: i32) -> (i32, i32) {
    %c0_i32 = arith.constant 0 : i32
    %c0_i32_0 = arith.constant 0 : i32
    return %c0_i32, %arg0 : i32, i32
  }
  func.func @transform_1(%arg0: i32) -> (i32, i32) {
    %c0_i32 = arith.constant 0 : i32
    %c0_i32_0 = arith.constant 0 : i32
    %c0_i32_1 = arith.constant 0 : i32
    return %c0_i32, %c0_i32_0 : i32, i32
  }
  func.func @transform_2(%arg0: i32) -> (i32, i32) {
    %c0_i32 = arith.constant 0 : i32
    %c0_i32_0 = arith.constant 0 : i32
    %c0_i32_1 = arith.constant 0 : i32
    return %c0_i32, %c0_i32_0 : i32, i32
  }
  func.func @transform_3(%arg0: i32) -> (i32, i32) {
    %c0_i32 = arith.constant 0 : i32
    %c0_i32_0 = arith.constant 0 : i32
    %c0_i32_1 = arith.constant 0 : i32
    return %c0_i32, %c0_i32_0 : i32, i32
  }
  func.func @transform_4(%arg0: i32) -> (i32, i32) {
    %c0_i32 = arith.constant 0 : i32
    %c0_i32_0 = arith.constant 0 : i32
    %c0_i32_1 = arith.constant 0 : i32
    return %c0_i32, %c0_i32_0 : i32, i32
  }
  func.func @transform_5(%arg0: i32) -> (i32, i32) {
    %c0_i32 = arith.constant 0 : i32
    %c0_i32_0 = arith.constant 0 : i32
    %c0_i32_1 = arith.constant 0 : i32
    return %c0_i32, %c0_i32_0 : i32, i32
  }
  func.func @transform_6(%arg0: i32) -> (i32, i32) {
    %c0_i32 = arith.constant 0 : i32
    %c0_i32_0 = arith.constant 0 : i32
    %c0_i32_1 = arith.constant 0 : i32
    return %c0_i32, %c0_i32_0 : i32, i32
  }
  func.func @transform_7(%arg0: i32) -> (i32, i32) {
    %c0_i32 = arith.constant 0 : i32
    %c0_i32_0 = arith.constant 0 : i32
    %c0_i32_1 = arith.constant 0 : i32
    return %c0_i32, %c0_i32_0 : i32, i32
  }
  func.func @transform_8(%arg0: i32) -> (i32, i32) {
    %c0_i32 = arith.constant 0 : i32
    %c0_i32_0 = arith.constant 0 : i32
    %c0_i32_1 = arith.constant 0 : i32
    return %c0_i32, %c0_i32_0 : i32, i32
  }
  func.func @transform_9(%arg0: i32) -> (i32, i32) {
    %c0_i32 = arith.constant 0 : i32
    %c0_i32_0 = arith.constant 0 : i32
    %c0_i32_1 = arith.constant 0 : i32
    return %c0_i32, %c0_i32_0 : i32, i32
  }
  func.func @transform_10(%arg0: i32) -> (i32, i32) {
    %c0_i32 = arith.constant 0 : i32
    %c0_i32_0 = arith.constant 0 : i32
    %c0_i32_1 = arith.constant 0 : i32
    return %c0_i32, %c0_i32_0 : i32, i32
  }
  func.func @transform_11(%arg0: i32) -> (i32, i32) {
    %c0_i32 = arith.constant 0 : i32
    %c0_i32_0 = arith.constant 0 : i32
    %c0_i32_1 = arith.constant 0 : i32
    return %c0_i32, %c0_i32_0 : i32, i32
  }
  func.func @transform_12(%arg0: i32) -> (i32, i32, i32) {
    %c0_i32 = arith.constant 0 : i32
    %c0_i32_0 = arith.constant 0 : i32
    %c0_i32_1 = arith.constant 0 : i32
    return %arg0, %c0_i32, %c0_i32_0 : i32, i32, i32
  }
}

module attributes {stable_mosaic.version = 11 : i64} {
  func.func @_inception_kernel(%arg0: i32, %arg1: memref<8x256xbf16, #tpu.memory_space<vmem>>, %arg2: memref<16x256xf32, #tpu.memory_space<vmem>>, %arg3: memref<32x256xf32, #tpu.memory_space<vmem>>, %arg4: memref<16x256xf32, #tpu.memory_space<vmem>>, %arg5: memref<40x8xbf16, #tpu.memory_space<vmem>>, %arg6: memref<40x1xf32, #tpu.memory_space<vmem>>, %arg7: memref<8x144xbf16, #tpu.memory_space<vmem>>, %arg8: memref<8x1xf32, #tpu.memory_space<vmem>>, %arg9: memref<8x400xbf16, #tpu.memory_space<vmem>>, %arg10: memref<8x1xf32, #tpu.memory_space<vmem>>, %arg11: memref<8x8xbf16, #tpu.memory_space<vmem>>, %arg12: memref<8x1xf32, #tpu.memory_space<vmem>>, %arg13: memref<1x32x256xf32, #tpu.memory_space<vmem>>, %arg14: memref<400x256xbf16, #tpu.memory_space<vmem>>) attributes {dimension_semantics = [#tpu.dimension_semantics<parallel>], iteration_bounds = array<i64: 2>, scalar_prefetch = 0 : i64, scratch_operands = 1 : i64, tpu.core_type = #tpu.core_type<tc>, window_params = [{transform_indices = @transform_0, window_bounds = array<i64: 8, 256>}, {pipeline_mode = #tpu.pipeline_mode<synchronous>, transform_indices = @transform_1, window_bounds = array<i64: 16, 256>}, {pipeline_mode = #tpu.pipeline_mode<synchronous>, transform_indices = @transform_2, window_bounds = array<i64: 32, 256>}, {pipeline_mode = #tpu.pipeline_mode<synchronous>, transform_indices = @transform_3, window_bounds = array<i64: 16, 256>}, {pipeline_mode = #tpu.pipeline_mode<synchronous>, transform_indices = @transform_4, window_bounds = array<i64: 40, 8>}, {pipeline_mode = #tpu.pipeline_mode<synchronous>, transform_indices = @transform_5, window_bounds = array<i64: 40, 1>}, {pipeline_mode = #tpu.pipeline_mode<synchronous>, transform_indices = @transform_6, window_bounds = array<i64: 8, 144>}, {pipeline_mode = #tpu.pipeline_mode<synchronous>, transform_indices = @transform_7, window_bounds = array<i64: 8, 1>}, {pipeline_mode = #tpu.pipeline_mode<synchronous>, transform_indices = @transform_8, window_bounds = array<i64: 8, 400>}, {pipeline_mode = #tpu.pipeline_mode<synchronous>, transform_indices = @transform_9, window_bounds = array<i64: 8, 1>}, {pipeline_mode = #tpu.pipeline_mode<synchronous>, transform_indices = @transform_10, window_bounds = array<i64: 8, 8>}, {pipeline_mode = #tpu.pipeline_mode<synchronous>, transform_indices = @transform_11, window_bounds = array<i64: 8, 1>}, {transform_indices = @transform_12, window_bounds = array<i64: 1, 32, 256>}]} {
    %c0 = arith.constant 0 : index
    %c0_0 = arith.constant 0 : index
    %0 = vector.load %arg1[%c0, %c0_0] : memref<8x256xbf16, #tpu.memory_space<vmem>>, vector<8x256xbf16>
    %c0_1 = arith.constant 0 : index
    %c0_2 = arith.constant 0 : index
    %1 = vector.load %arg5[%c0_1, %c0_2] : memref<40x8xbf16, #tpu.memory_space<vmem>>, vector<40x8xbf16>
    %cst = arith.constant dense<0.000000e+00> : vector<40x256xf32>
    %2 = tpu.matmul %1, %0, %cst {dimension_numbers = #tpu.dot_dimension_numbers<[1], [0], [0], [1], [0, 0, 1, 1], [], []>} : vector<40x8xbf16>, vector<8x256xbf16>, vector<40x256xf32> -> vector<40x256xf32>
    %c0_3 = arith.constant 0 : index
    %c0_4 = arith.constant 0 : index
    %3 = vector.load %arg6[%c0_3, %c0_4] : memref<40x1xf32, #tpu.memory_space<vmem>>, vector<40x1xf32>
    %4 = vector.broadcast %3 : vector<40x1xf32> to vector<40x256xf32>
    %5 = arith.addf %2, %4 : vector<40x256xf32>
    %6 = vector.extract_strided_slice %5 {offsets = [0, 0], sizes = [8, 256], strides = [1, 1]} : vector<40x256xf32> to vector<8x256xf32>
    %7 = vector.extract_strided_slice %5 {offsets = [8, 0], sizes = [16, 256], strides = [1, 1]} : vector<40x256xf32> to vector<16x256xf32>
    %8 = vector.extract_strided_slice %5 {offsets = [24, 0], sizes = [16, 256], strides = [1, 1]} : vector<40x256xf32> to vector<16x256xf32>
    %c17_i32 = arith.constant 17 : i32
    %9 = tpu.dynamic_rotate %7 by %c17_i32 dim 1 : vector<16x256xf32>, i32 -> vector<16x256xf32>
    %c0_5 = arith.constant 0 : index
    %c0_6 = arith.constant 0 : index
    %10 = vector.load %arg2[%c0_5, %c0_6] : memref<16x256xf32, #tpu.memory_space<vmem>>, vector<1x256xf32>
    %11 = vector.broadcast %10 : vector<1x256xf32> to vector<16x256xf32>
    %12 = arith.mulf %9, %11 : vector<16x256xf32>
    %13 = arith.truncf %12 : vector<16x256xf32> to vector<16x256xbf16>
    %c16_i32 = arith.constant 16 : i32
    %14 = tpu.dynamic_rotate %7 by %c16_i32 dim 1 : vector<16x256xf32>, i32 -> vector<16x256xf32>
    %c1 = arith.constant 1 : index
    %c0_7 = arith.constant 0 : index
    %15 = vector.load %arg2[%c1, %c0_7] : memref<16x256xf32, #tpu.memory_space<vmem>>, vector<1x256xf32>
    %16 = vector.broadcast %15 : vector<1x256xf32> to vector<16x256xf32>
    %17 = arith.mulf %14, %16 : vector<16x256xf32>
    %18 = arith.truncf %17 : vector<16x256xf32> to vector<16x256xbf16>
    %c15_i32 = arith.constant 15 : i32
    %19 = tpu.dynamic_rotate %7 by %c15_i32 dim 1 : vector<16x256xf32>, i32 -> vector<16x256xf32>
    %c2 = arith.constant 2 : index
    %c0_8 = arith.constant 0 : index
    %20 = vector.load %arg2[%c2, %c0_8] : memref<16x256xf32, #tpu.memory_space<vmem>>, vector<1x256xf32>
    %21 = vector.broadcast %20 : vector<1x256xf32> to vector<16x256xf32>
    %22 = arith.mulf %19, %21 : vector<16x256xf32>
    %23 = arith.truncf %22 : vector<16x256xf32> to vector<16x256xbf16>
    %c1_i32 = arith.constant 1 : i32
    %24 = tpu.dynamic_rotate %7 by %c1_i32 dim 1 : vector<16x256xf32>, i32 -> vector<16x256xf32>
    %c3 = arith.constant 3 : index
    %c0_9 = arith.constant 0 : index
    %25 = vector.load %arg2[%c3, %c0_9] : memref<16x256xf32, #tpu.memory_space<vmem>>, vector<1x256xf32>
    %26 = vector.broadcast %25 : vector<1x256xf32> to vector<16x256xf32>
    %27 = arith.mulf %24, %26 : vector<16x256xf32>
    %28 = arith.truncf %27 : vector<16x256xf32> to vector<16x256xbf16>
    %29 = arith.truncf %7 : vector<16x256xf32> to vector<16x256xbf16>
    %c255_i32 = arith.constant 255 : i32
    %30 = tpu.dynamic_rotate %7 by %c255_i32 dim 1 : vector<16x256xf32>, i32 -> vector<16x256xf32>
    %c5 = arith.constant 5 : index
    %c0_10 = arith.constant 0 : index
    %31 = vector.load %arg2[%c5, %c0_10] : memref<16x256xf32, #tpu.memory_space<vmem>>, vector<1x256xf32>
    %32 = vector.broadcast %31 : vector<1x256xf32> to vector<16x256xf32>
    %33 = arith.mulf %30, %32 : vector<16x256xf32>
    %34 = arith.truncf %33 : vector<16x256xf32> to vector<16x256xbf16>
    %c241_i32 = arith.constant 241 : i32
    %35 = tpu.dynamic_rotate %7 by %c241_i32 dim 1 : vector<16x256xf32>, i32 -> vector<16x256xf32>
    %c6 = arith.constant 6 : index
    %c0_11 = arith.constant 0 : index
    %36 = vector.load %arg2[%c6, %c0_11] : memref<16x256xf32, #tpu.memory_space<vmem>>, vector<1x256xf32>
    %37 = vector.broadcast %36 : vector<1x256xf32> to vector<16x256xf32>
    %38 = arith.mulf %35, %37 : vector<16x256xf32>
    %39 = arith.truncf %38 : vector<16x256xf32> to vector<16x256xbf16>
    %c240_i32 = arith.constant 240 : i32
    %40 = tpu.dynamic_rotate %7 by %c240_i32 dim 1 : vector<16x256xf32>, i32 -> vector<16x256xf32>
    %c7 = arith.constant 7 : index
    %c0_12 = arith.constant 0 : index
    %41 = vector.load %arg2[%c7, %c0_12] : memref<16x256xf32, #tpu.memory_space<vmem>>, vector<1x256xf32>
    %42 = vector.broadcast %41 : vector<1x256xf32> to vector<16x256xf32>
    %43 = arith.mulf %40, %42 : vector<16x256xf32>
    %44 = arith.truncf %43 : vector<16x256xf32> to vector<16x256xbf16>
    %c239_i32 = arith.constant 239 : i32
    %45 = tpu.dynamic_rotate %7 by %c239_i32 dim 1 : vector<16x256xf32>, i32 -> vector<16x256xf32>
    %c8 = arith.constant 8 : index
    %c0_13 = arith.constant 0 : index
    %46 = vector.load %arg2[%c8, %c0_13] : memref<16x256xf32, #tpu.memory_space<vmem>>, vector<1x256xf32>
    %47 = vector.broadcast %46 : vector<1x256xf32> to vector<16x256xf32>
    %48 = arith.mulf %45, %47 : vector<16x256xf32>
    %49 = arith.truncf %48 : vector<16x256xf32> to vector<16x256xbf16>
    %50 = tpu.concatenate %13, %18, %23, %28, %29, %34, %39, %44, %49 in 0 : vector<16x256xbf16>, vector<16x256xbf16>, vector<16x256xbf16>, vector<16x256xbf16>, vector<16x256xbf16>, vector<16x256xbf16>, vector<16x256xbf16>, vector<16x256xbf16>, vector<16x256xbf16> -> vector<144x256xbf16>
    %c0_14 = arith.constant 0 : index
    %c0_15 = arith.constant 0 : index
    %51 = vector.load %arg7[%c0_14, %c0_15] : memref<8x144xbf16, #tpu.memory_space<vmem>>, vector<8x144xbf16>
    %cst_16 = arith.constant dense<0.000000e+00> : vector<8x256xf32>
    %52 = tpu.matmul %51, %50, %cst_16 {dimension_numbers = #tpu.dot_dimension_numbers<[1], [0], [0], [1], [0, 0, 1, 1], [], []>} : vector<8x144xbf16>, vector<144x256xbf16>, vector<8x256xf32> -> vector<8x256xf32>
    %c0_17 = arith.constant 0 : index
    %c0_18 = arith.constant 0 : index
    %53 = vector.load %arg8[%c0_17, %c0_18] : memref<8x1xf32, #tpu.memory_space<vmem>>, vector<8x1xf32>
    %54 = vector.broadcast %53 : vector<8x1xf32> to vector<8x256xf32>
    %55 = arith.addf %52, %54 : vector<8x256xf32>
    %c34_i32 = arith.constant 34 : i32
    %56 = tpu.dynamic_rotate %8 by %c34_i32 dim 1 : vector<16x256xf32>, i32 -> vector<16x256xf32>
    %c0_19 = arith.constant 0 : index
    %c0_20 = arith.constant 0 : index
    %57 = vector.load %arg3[%c0_19, %c0_20] : memref<32x256xf32, #tpu.memory_space<vmem>>, vector<1x256xf32>
    %58 = vector.broadcast %57 : vector<1x256xf32> to vector<16x256xf32>
    %59 = arith.mulf %56, %58 : vector<16x256xf32>
    %60 = arith.truncf %59 : vector<16x256xf32> to vector<16x256xbf16>
    %c0_21 = arith.constant 0 : index
    %c0_22 = arith.constant 0 : index
    %61 = vector.load %arg14[%c0_21, %c0_22] : memref<400x256xbf16, #tpu.memory_space<vmem>>, vector<16x256xbf16>
    tpu.vector_store %arg14[%c0_21, %c0_22], %60 {strides = array<i32>} : memref<400x256xbf16, #tpu.memory_space<vmem>>, vector<16x256xbf16>,
    %c33_i32 = arith.constant 33 : i32
    %62 = tpu.dynamic_rotate %8 by %c33_i32 dim 1 : vector<16x256xf32>, i32 -> vector<16x256xf32>
    %c1_23 = arith.constant 1 : index
    %c0_24 = arith.constant 0 : index
    %63 = vector.load %arg3[%c1_23, %c0_24] : memref<32x256xf32, #tpu.memory_space<vmem>>, vector<1x256xf32>
    %64 = vector.broadcast %63 : vector<1x256xf32> to vector<16x256xf32>
    %65 = arith.mulf %62, %64 : vector<16x256xf32>
    %66 = arith.truncf %65 : vector<16x256xf32> to vector<16x256xbf16>
    %c16 = arith.constant 16 : index
    %c0_25 = arith.constant 0 : index
    %67 = vector.load %arg14[%c16, %c0_25] : memref<400x256xbf16, #tpu.memory_space<vmem>>, vector<16x256xbf16>
    tpu.vector_store %arg14[%c16, %c0_25], %66 {strides = array<i32>} : memref<400x256xbf16, #tpu.memory_space<vmem>>, vector<16x256xbf16>,
    %c32_i32 = arith.constant 32 : i32
    %68 = tpu.dynamic_rotate %8 by %c32_i32 dim 1 : vector<16x256xf32>, i32 -> vector<16x256xf32>
    %c2_26 = arith.constant 2 : index
    %c0_27 = arith.constant 0 : index
    %69 = vector.load %arg3[%c2_26, %c0_27] : memref<32x256xf32, #tpu.memory_space<vmem>>, vector<1x256xf32>
    %70 = vector.broadcast %69 : vector<1x256xf32> to vector<16x256xf32>
    %71 = arith.mulf %68, %70 : vector<16x256xf32>
    %72 = arith.truncf %71 : vector<16x256xf32> to vector<16x256xbf16>
    %c32 = arith.constant 32 : index
    %c0_28 = arith.constant 0 : index
    %73 = vector.load %arg14[%c32, %c0_28] : memref<400x256xbf16, #tpu.memory_space<vmem>>, vector<16x256xbf16>
    tpu.vector_store %arg14[%c32, %c0_28], %72 {strides = array<i32>} : memref<400x256xbf16, #tpu.memory_space<vmem>>, vector<16x256xbf16>,
    %c31_i32 = arith.constant 31 : i32
    %74 = tpu.dynamic_rotate %8 by %c31_i32 dim 1 : vector<16x256xf32>, i32 -> vector<16x256xf32>
    %c3_29 = arith.constant 3 : index
    %c0_30 = arith.constant 0 : index
    %75 = vector.load %arg3[%c3_29, %c0_30] : memref<32x256xf32, #tpu.memory_space<vmem>>, vector<1x256xf32>
    %76 = vector.broadcast %75 : vector<1x256xf32> to vector<16x256xf32>
    %77 = arith.mulf %74, %76 : vector<16x256xf32>
    %78 = arith.truncf %77 : vector<16x256xf32> to vector<16x256xbf16>
    %c48 = arith.constant 48 : index
    %c0_31 = arith.constant 0 : index
    %79 = vector.load %arg14[%c48, %c0_31] : memref<400x256xbf16, #tpu.memory_space<vmem>>, vector<16x256xbf16>
    tpu.vector_store %arg14[%c48, %c0_31], %78 {strides = array<i32>} : memref<400x256xbf16, #tpu.memory_space<vmem>>, vector<16x256xbf16>,
    %c30_i32 = arith.constant 30 : i32
    %80 = tpu.dynamic_rotate %8 by %c30_i32 dim 1 : vector<16x256xf32>, i32 -> vector<16x256xf32>
    %c4 = arith.constant 4 : index
    %c0_32 = arith.constant 0 : index
    %81 = vector.load %arg3[%c4, %c0_32] : memref<32x256xf32, #tpu.memory_space<vmem>>, vector<1x256xf32>
    %82 = vector.broadcast %81 : vector<1x256xf32> to vector<16x256xf32>
    %83 = arith.mulf %80, %82 : vector<16x256xf32>
    %84 = arith.truncf %83 : vector<16x256xf32> to vector<16x256xbf16>
    %c64 = arith.constant 64 : index
    %c0_33 = arith.constant 0 : index
    %85 = vector.load %arg14[%c64, %c0_33] : memref<400x256xbf16, #tpu.memory_space<vmem>>, vector<16x256xbf16>
    tpu.vector_store %arg14[%c64, %c0_33], %84 {strides = array<i32>} : memref<400x256xbf16, #tpu.memory_space<vmem>>, vector<16x256xbf16>,
    %c18_i32 = arith.constant 18 : i32
    %86 = tpu.dynamic_rotate %8 by %c18_i32 dim 1 : vector<16x256xf32>, i32 -> vector<16x256xf32>
    %c5_34 = arith.constant 5 : index
    %c0_35 = arith.constant 0 : index
    %87 = vector.load %arg3[%c5_34, %c0_35] : memref<32x256xf32, #tpu.memory_space<vmem>>, vector<1x256xf32>
    %88 = vector.broadcast %87 : vector<1x256xf32> to vector<16x256xf32>
    %89 = arith.mulf %86, %88 : vector<16x256xf32>
    %90 = arith.truncf %89 : vector<16x256xf32> to vector<16x256xbf16>
    %c80 = arith.constant 80 : index
    %c0_36 = arith.constant 0 : index
    %91 = vector.load %arg14[%c80, %c0_36] : memref<400x256xbf16, #tpu.memory_space<vmem>>, vector<16x256xbf16>
    tpu.vector_store %arg14[%c80, %c0_36], %90 {strides = array<i32>} : memref<400x256xbf16, #tpu.memory_space<vmem>>, vector<16x256xbf16>,
    %c17_i32_37 = arith.constant 17 : i32
    %92 = tpu.dynamic_rotate %8 by %c17_i32_37 dim 1 : vector<16x256xf32>, i32 -> vector<16x256xf32>
    %c6_38 = arith.constant 6 : index
    %c0_39 = arith.constant 0 : index
    %93 = vector.load %arg3[%c6_38, %c0_39] : memref<32x256xf32, #tpu.memory_space<vmem>>, vector<1x256xf32>
    %94 = vector.broadcast %93 : vector<1x256xf32> to vector<16x256xf32>
    %95 = arith.mulf %92, %94 : vector<16x256xf32>
    %96 = arith.truncf %95 : vector<16x256xf32> to vector<16x256xbf16>
    %c96 = arith.constant 96 : index
    %c0_40 = arith.constant 0 : index
    %97 = vector.load %arg14[%c96, %c0_40] : memref<400x256xbf16, #tpu.memory_space<vmem>>, vector<16x256xbf16>
    tpu.vector_store %arg14[%c96, %c0_40], %96 {strides = array<i32>} : memref<400x256xbf16, #tpu.memory_space<vmem>>, vector<16x256xbf16>,
    %c16_i32_41 = arith.constant 16 : i32
    %98 = tpu.dynamic_rotate %8 by %c16_i32_41 dim 1 : vector<16x256xf32>, i32 -> vector<16x256xf32>
    %c7_42 = arith.constant 7 : index
    %c0_43 = arith.constant 0 : index
    %99 = vector.load %arg3[%c7_42, %c0_43] : memref<32x256xf32, #tpu.memory_space<vmem>>, vector<1x256xf32>
    %100 = vector.broadcast %99 : vector<1x256xf32> to vector<16x256xf32>
    %101 = arith.mulf %98, %100 : vector<16x256xf32>
    %102 = arith.truncf %101 : vector<16x256xf32> to vector<16x256xbf16>
    %c112 = arith.constant 112 : index
    %c0_44 = arith.constant 0 : index
    %103 = vector.load %arg14[%c112, %c0_44] : memref<400x256xbf16, #tpu.memory_space<vmem>>, vector<16x256xbf16>
    tpu.vector_store %arg14[%c112, %c0_44], %102 {strides = array<i32>} : memref<400x256xbf16, #tpu.memory_space<vmem>>, vector<16x256xbf16>,
    %c15_i32_45 = arith.constant 15 : i32
    %104 = tpu.dynamic_rotate %8 by %c15_i32_45 dim 1 : vector<16x256xf32>, i32 -> vector<16x256xf32>
    %c8_46 = arith.constant 8 : index
    %c0_47 = arith.constant 0 : index
    %105 = vector.load %arg3[%c8_46, %c0_47] : memref<32x256xf32, #tpu.memory_space<vmem>>, vector<1x256xf32>
    %106 = vector.broadcast %105 : vector<1x256xf32> to vector<16x256xf32>
    %107 = arith.mulf %104, %106 : vector<16x256xf32>
    %108 = arith.truncf %107 : vector<16x256xf32> to vector<16x256xbf16>
    %c128 = arith.constant 128 : index
    %c0_48 = arith.constant 0 : index
    %109 = vector.load %arg14[%c128, %c0_48] : memref<400x256xbf16, #tpu.memory_space<vmem>>, vector<16x256xbf16>
    tpu.vector_store %arg14[%c128, %c0_48], %108 {strides = array<i32>} : memref<400x256xbf16, #tpu.memory_space<vmem>>, vector<16x256xbf16>,
    %c14_i32 = arith.constant 14 : i32
    %110 = tpu.dynamic_rotate %8 by %c14_i32 dim 1 : vector<16x256xf32>, i32 -> vector<16x256xf32>
    %c9 = arith.constant 9 : index
    %c0_49 = arith.constant 0 : index
    %111 = vector.load %arg3[%c9, %c0_49] : memref<32x256xf32, #tpu.memory_space<vmem>>, vector<1x256xf32>
    %112 = vector.broadcast %111 : vector<1x256xf32> to vector<16x256xf32>
    %113 = arith.mulf %110, %112 : vector<16x256xf32>
    %114 = arith.truncf %113 : vector<16x256xf32> to vector<16x256xbf16>
    %c144 = arith.constant 144 : index
    %c0_50 = arith.constant 0 : index
    %115 = vector.load %arg14[%c144, %c0_50] : memref<400x256xbf16, #tpu.memory_space<vmem>>, vector<16x256xbf16>
    tpu.vector_store %arg14[%c144, %c0_50], %114 {strides = array<i32>} : memref<400x256xbf16, #tpu.memory_space<vmem>>, vector<16x256xbf16>,
    %c2_i32 = arith.constant 2 : i32
    %116 = tpu.dynamic_rotate %8 by %c2_i32 dim 1 : vector<16x256xf32>, i32 -> vector<16x256xf32>
    %c10 = arith.constant 10 : index
    %c0_51 = arith.constant 0 : index
    %117 = vector.load %arg3[%c10, %c0_51] : memref<32x256xf32, #tpu.memory_space<vmem>>, vector<1x256xf32>
    %118 = vector.broadcast %117 : vector<1x256xf32> to vector<16x256xf32>
    %119 = arith.mulf %116, %118 : vector<16x256xf32>
    %120 = arith.truncf %119 : vector<16x256xf32> to vector<16x256xbf16>
    %c160 = arith.constant 160 : index
    %c0_52 = arith.constant 0 : index
    %121 = vector.load %arg14[%c160, %c0_52] : memref<400x256xbf16, #tpu.memory_space<vmem>>, vector<16x256xbf16>
    tpu.vector_store %arg14[%c160, %c0_52], %120 {strides = array<i32>} : memref<400x256xbf16, #tpu.memory_space<vmem>>, vector<16x256xbf16>,
    %c1_i32_53 = arith.constant 1 : i32
    %122 = tpu.dynamic_rotate %8 by %c1_i32_53 dim 1 : vector<16x256xf32>, i32 -> vector<16x256xf32>
    %c11 = arith.constant 11 : index
    %c0_54 = arith.constant 0 : index
    %123 = vector.load %arg3[%c11, %c0_54] : memref<32x256xf32, #tpu.memory_space<vmem>>, vector<1x256xf32>
    %124 = vector.broadcast %123 : vector<1x256xf32> to vector<16x256xf32>
    %125 = arith.mulf %122, %124 : vector<16x256xf32>
    %126 = arith.truncf %125 : vector<16x256xf32> to vector<16x256xbf16>
    %c176 = arith.constant 176 : index
    %c0_55 = arith.constant 0 : index
    %127 = vector.load %arg14[%c176, %c0_55] : memref<400x256xbf16, #tpu.memory_space<vmem>>, vector<16x256xbf16>
    tpu.vector_store %arg14[%c176, %c0_55], %126 {strides = array<i32>} : memref<400x256xbf16, #tpu.memory_space<vmem>>, vector<16x256xbf16>,
    %128 = arith.truncf %8 : vector<16x256xf32> to vector<16x256xbf16>
    %c192 = arith.constant 192 : index
    %c0_56 = arith.constant 0 : index
    %129 = vector.load %arg14[%c192, %c0_56] : memref<400x256xbf16, #tpu.memory_space<vmem>>, vector<16x256xbf16>
    tpu.vector_store %arg14[%c192, %c0_56], %128 {strides = array<i32>} : memref<400x256xbf16, #tpu.memory_space<vmem>>, vector<16x256xbf16>,
    %c255_i32_57 = arith.constant 255 : i32
    %130 = tpu.dynamic_rotate %8 by %c255_i32_57 dim 1 : vector<16x256xf32>, i32 -> vector<16x256xf32>
    %c13 = arith.constant 13 : index
    %c0_58 = arith.constant 0 : index
    %131 = vector.load %arg3[%c13, %c0_58] : memref<32x256xf32, #tpu.memory_space<vmem>>, vector<1x256xf32>
    %132 = vector.broadcast %131 : vector<1x256xf32> to vector<16x256xf32>
    %133 = arith.mulf %130, %132 : vector<16x256xf32>
    %134 = arith.truncf %133 : vector<16x256xf32> to vector<16x256xbf16>
    %c208 = arith.constant 208 : index
    %c0_59 = arith.constant 0 : index
    %135 = vector.load %arg14[%c208, %c0_59] : memref<400x256xbf16, #tpu.memory_space<vmem>>, vector<16x256xbf16>
    tpu.vector_store %arg14[%c208, %c0_59], %134 {strides = array<i32>} : memref<400x256xbf16, #tpu.memory_space<vmem>>, vector<16x256xbf16>,
    %c254_i32 = arith.constant 254 : i32
    %136 = tpu.dynamic_rotate %8 by %c254_i32 dim 1 : vector<16x256xf32>, i32 -> vector<16x256xf32>
    %c14 = arith.constant 14 : index
    %c0_60 = arith.constant 0 : index
    %137 = vector.load %arg3[%c14, %c0_60] : memref<32x256xf32, #tpu.memory_space<vmem>>, vector<1x256xf32>
    %138 = vector.broadcast %137 : vector<1x256xf32> to vector<16x256xf32>
    %139 = arith.mulf %136, %138 : vector<16x256xf32>
    %140 = arith.truncf %139 : vector<16x256xf32> to vector<16x256xbf16>
    %c224 = arith.constant 224 : index
    %c0_61 = arith.constant 0 : index
    %141 = vector.load %arg14[%c224, %c0_61] : memref<400x256xbf16, #tpu.memory_space<vmem>>, vector<16x256xbf16>
    tpu.vector_store %arg14[%c224, %c0_61], %140 {strides = array<i32>} : memref<400x256xbf16, #tpu.memory_space<vmem>>, vector<16x256xbf16>,
    %c242_i32 = arith.constant 242 : i32
    %142 = tpu.dynamic_rotate %8 by %c242_i32 dim 1 : vector<16x256xf32>, i32 -> vector<16x256xf32>
    %c15 = arith.constant 15 : index
    %c0_62 = arith.constant 0 : index
    %143 = vector.load %arg3[%c15, %c0_62] : memref<32x256xf32, #tpu.memory_space<vmem>>, vector<1x256xf32>
    %144 = vector.broadcast %143 : vector<1x256xf32> to vector<16x256xf32>
    %145 = arith.mulf %142, %144 : vector<16x256xf32>
    %146 = arith.truncf %145 : vector<16x256xf32> to vector<16x256xbf16>
    %c240 = arith.constant 240 : index
    %c0_63 = arith.constant 0 : index
    %147 = vector.load %arg14[%c240, %c0_63] : memref<400x256xbf16, #tpu.memory_space<vmem>>, vector<16x256xbf16>
    tpu.vector_store %arg14[%c240, %c0_63], %146 {strides = array<i32>} : memref<400x256xbf16, #tpu.memory_space<vmem>>, vector<16x256xbf16>,
    %c241_i32_64 = arith.constant 241 : i32
    %148 = tpu.dynamic_rotate %8 by %c241_i32_64 dim 1 : vector<16x256xf32>, i32 -> vector<16x256xf32>
    %c16_65 = arith.constant 16 : index
    %c0_66 = arith.constant 0 : index
    %149 = vector.load %arg3[%c16_65, %c0_66] : memref<32x256xf32, #tpu.memory_space<vmem>>, vector<1x256xf32>
    %150 = vector.broadcast %149 : vector<1x256xf32> to vector<16x256xf32>
    %151 = arith.mulf %148, %150 : vector<16x256xf32>
    %152 = arith.truncf %151 : vector<16x256xf32> to vector<16x256xbf16>
    %c256 = arith.constant 256 : index
    %c0_67 = arith.constant 0 : index
    %153 = vector.load %arg14[%c256, %c0_67] : memref<400x256xbf16, #tpu.memory_space<vmem>>, vector<16x256xbf16>
    tpu.vector_store %arg14[%c256, %c0_67], %152 {strides = array<i32>} : memref<400x256xbf16, #tpu.memory_space<vmem>>, vector<16x256xbf16>,
    %c240_i32_68 = arith.constant 240 : i32
    %154 = tpu.dynamic_rotate %8 by %c240_i32_68 dim 1 : vector<16x256xf32>, i32 -> vector<16x256xf32>
    %c17 = arith.constant 17 : index
    %c0_69 = arith.constant 0 : index
    %155 = vector.load %arg3[%c17, %c0_69] : memref<32x256xf32, #tpu.memory_space<vmem>>, vector<1x256xf32>
    %156 = vector.broadcast %155 : vector<1x256xf32> to vector<16x256xf32>
    %157 = arith.mulf %154, %156 : vector<16x256xf32>
    %158 = arith.truncf %157 : vector<16x256xf32> to vector<16x256xbf16>
    %c272 = arith.constant 272 : index
    %c0_70 = arith.constant 0 : index
    %159 = vector.load %arg14[%c272, %c0_70] : memref<400x256xbf16, #tpu.memory_space<vmem>>, vector<16x256xbf16>
    tpu.vector_store %arg14[%c272, %c0_70], %158 {strides = array<i32>} : memref<400x256xbf16, #tpu.memory_space<vmem>>, vector<16x256xbf16>,
    %c239_i32_71 = arith.constant 239 : i32
    %160 = tpu.dynamic_rotate %8 by %c239_i32_71 dim 1 : vector<16x256xf32>, i32 -> vector<16x256xf32>
    %c18 = arith.constant 18 : index
    %c0_72 = arith.constant 0 : index
    %161 = vector.load %arg3[%c18, %c0_72] : memref<32x256xf32, #tpu.memory_space<vmem>>, vector<1x256xf32>
    %162 = vector.broadcast %161 : vector<1x256xf32> to vector<16x256xf32>
    %163 = arith.mulf %160, %162 : vector<16x256xf32>
    %164 = arith.truncf %163 : vector<16x256xf32> to vector<16x256xbf16>
    %c288 = arith.constant 288 : index
    %c0_73 = arith.constant 0 : index
    %165 = vector.load %arg14[%c288, %c0_73] : memref<400x256xbf16, #tpu.memory_space<vmem>>, vector<16x256xbf16>
    tpu.vector_store %arg14[%c288, %c0_73], %164 {strides = array<i32>} : memref<400x256xbf16, #tpu.memory_space<vmem>>, vector<16x256xbf16>,
    %c238_i32 = arith.constant 238 : i32
    %166 = tpu.dynamic_rotate %8 by %c238_i32 dim 1 : vector<16x256xf32>, i32 -> vector<16x256xf32>
    %c19 = arith.constant 19 : index
    %c0_74 = arith.constant 0 : index
    %167 = vector.load %arg3[%c19, %c0_74] : memref<32x256xf32, #tpu.memory_space<vmem>>, vector<1x256xf32>
    %168 = vector.broadcast %167 : vector<1x256xf32> to vector<16x256xf32>
    %169 = arith.mulf %166, %168 : vector<16x256xf32>
    %170 = arith.truncf %169 : vector<16x256xf32> to vector<16x256xbf16>
    %c304 = arith.constant 304 : index
    %c0_75 = arith.constant 0 : index
    %171 = vector.load %arg14[%c304, %c0_75] : memref<400x256xbf16, #tpu.memory_space<vmem>>, vector<16x256xbf16>
    tpu.vector_store %arg14[%c304, %c0_75], %170 {strides = array<i32>} : memref<400x256xbf16, #tpu.memory_space<vmem>>, vector<16x256xbf16>,
    %c226_i32 = arith.constant 226 : i32
    %172 = tpu.dynamic_rotate %8 by %c226_i32 dim 1 : vector<16x256xf32>, i32 -> vector<16x256xf32>
    %c20 = arith.constant 20 : index
    %c0_76 = arith.constant 0 : index
    %173 = vector.load %arg3[%c20, %c0_76] : memref<32x256xf32, #tpu.memory_space<vmem>>, vector<1x256xf32>
    %174 = vector.broadcast %173 : vector<1x256xf32> to vector<16x256xf32>
    %175 = arith.mulf %172, %174 : vector<16x256xf32>
    %176 = arith.truncf %175 : vector<16x256xf32> to vector<16x256xbf16>
    %c320 = arith.constant 320 : index
    %c0_77 = arith.constant 0 : index
    %177 = vector.load %arg14[%c320, %c0_77] : memref<400x256xbf16, #tpu.memory_space<vmem>>, vector<16x256xbf16>
    tpu.vector_store %arg14[%c320, %c0_77], %176 {strides = array<i32>} : memref<400x256xbf16, #tpu.memory_space<vmem>>, vector<16x256xbf16>,
    %c225_i32 = arith.constant 225 : i32
    %178 = tpu.dynamic_rotate %8 by %c225_i32 dim 1 : vector<16x256xf32>, i32 -> vector<16x256xf32>
    %c21 = arith.constant 21 : index
    %c0_78 = arith.constant 0 : index
    %179 = vector.load %arg3[%c21, %c0_78] : memref<32x256xf32, #tpu.memory_space<vmem>>, vector<1x256xf32>
    %180 = vector.broadcast %179 : vector<1x256xf32> to vector<16x256xf32>
    %181 = arith.mulf %178, %180 : vector<16x256xf32>
    %182 = arith.truncf %181 : vector<16x256xf32> to vector<16x256xbf16>
    %c336 = arith.constant 336 : index
    %c0_79 = arith.constant 0 : index
    %183 = vector.load %arg14[%c336, %c0_79] : memref<400x256xbf16, #tpu.memory_space<vmem>>, vector<16x256xbf16>
    tpu.vector_store %arg14[%c336, %c0_79], %182 {strides = array<i32>} : memref<400x256xbf16, #tpu.memory_space<vmem>>, vector<16x256xbf16>,
    %c224_i32 = arith.constant 224 : i32
    %184 = tpu.dynamic_rotate %8 by %c224_i32 dim 1 : vector<16x256xf32>, i32 -> vector<16x256xf32>
    %c22 = arith.constant 22 : index
    %c0_80 = arith.constant 0 : index
    %185 = vector.load %arg3[%c22, %c0_80] : memref<32x256xf32, #tpu.memory_space<vmem>>, vector<1x256xf32>
    %186 = vector.broadcast %185 : vector<1x256xf32> to vector<16x256xf32>
    %187 = arith.mulf %184, %186 : vector<16x256xf32>
    %188 = arith.truncf %187 : vector<16x256xf32> to vector<16x256xbf16>
    %c352 = arith.constant 352 : index
    %c0_81 = arith.constant 0 : index
    %189 = vector.load %arg14[%c352, %c0_81] : memref<400x256xbf16, #tpu.memory_space<vmem>>, vector<16x256xbf16>
    tpu.vector_store %arg14[%c352, %c0_81], %188 {strides = array<i32>} : memref<400x256xbf16, #tpu.memory_space<vmem>>, vector<16x256xbf16>,
    %c223_i32 = arith.constant 223 : i32
    %190 = tpu.dynamic_rotate %8 by %c223_i32 dim 1 : vector<16x256xf32>, i32 -> vector<16x256xf32>
    %c23 = arith.constant 23 : index
    %c0_82 = arith.constant 0 : index
    %191 = vector.load %arg3[%c23, %c0_82] : memref<32x256xf32, #tpu.memory_space<vmem>>, vector<1x256xf32>
    %192 = vector.broadcast %191 : vector<1x256xf32> to vector<16x256xf32>
    %193 = arith.mulf %190, %192 : vector<16x256xf32>
    %194 = arith.truncf %193 : vector<16x256xf32> to vector<16x256xbf16>
    %c368 = arith.constant 368 : index
    %c0_83 = arith.constant 0 : index
    %195 = vector.load %arg14[%c368, %c0_83] : memref<400x256xbf16, #tpu.memory_space<vmem>>, vector<16x256xbf16>
    tpu.vector_store %arg14[%c368, %c0_83], %194 {strides = array<i32>} : memref<400x256xbf16, #tpu.memory_space<vmem>>, vector<16x256xbf16>,
    %c222_i32 = arith.constant 222 : i32
    %196 = tpu.dynamic_rotate %8 by %c222_i32 dim 1 : vector<16x256xf32>, i32 -> vector<16x256xf32>
    %c24 = arith.constant 24 : index
    %c0_84 = arith.constant 0 : index
    %197 = vector.load %arg3[%c24, %c0_84] : memref<32x256xf32, #tpu.memory_space<vmem>>, vector<1x256xf32>
    %198 = vector.broadcast %197 : vector<1x256xf32> to vector<16x256xf32>
    %199 = arith.mulf %196, %198 : vector<16x256xf32>
    %200 = arith.truncf %199 : vector<16x256xf32> to vector<16x256xbf16>
    %c384 = arith.constant 384 : index
    %c0_85 = arith.constant 0 : index
    %201 = vector.load %arg14[%c384, %c0_85] : memref<400x256xbf16, #tpu.memory_space<vmem>>, vector<16x256xbf16>
    tpu.vector_store %arg14[%c384, %c0_85], %200 {strides = array<i32>} : memref<400x256xbf16, #tpu.memory_space<vmem>>, vector<16x256xbf16>,
    %c0_86 = arith.constant 0 : index
    %c0_87 = arith.constant 0 : index
    %202 = vector.load %arg9[%c0_86, %c0_87] : memref<8x400xbf16, #tpu.memory_space<vmem>>, vector<8x400xbf16>
    %c0_88 = arith.constant 0 : index
    %c0_89 = arith.constant 0 : index
    %203 = vector.load %arg14[%c0_88, %c0_89] : memref<400x256xbf16, #tpu.memory_space<vmem>>, vector<400x256xbf16>
    %cst_90 = arith.constant dense<0.000000e+00> : vector<8x256xf32>
    %204 = tpu.matmul %202, %203, %cst_90 {dimension_numbers = #tpu.dot_dimension_numbers<[1], [0], [0], [1], [0, 0, 1, 1], [], []>} : vector<8x400xbf16>, vector<400x256xbf16>, vector<8x256xf32> -> vector<8x256xf32>
    %c0_91 = arith.constant 0 : index
    %c0_92 = arith.constant 0 : index
    %205 = vector.load %arg10[%c0_91, %c0_92] : memref<8x1xf32, #tpu.memory_space<vmem>>, vector<8x1xf32>
    %206 = vector.broadcast %205 : vector<8x1xf32> to vector<8x256xf32>
    %207 = arith.addf %204, %206 : vector<8x256xf32>
    %208 = arith.extf %0 : vector<8x256xbf16> to vector<8x256xf32>
    %c17_i32_93 = arith.constant 17 : i32
    %209 = tpu.dynamic_rotate %208 by %c17_i32_93 dim 1 : vector<8x256xf32>, i32 -> vector<8x256xf32>
    %c0_94 = arith.constant 0 : index
    %c0_95 = arith.constant 0 : index
    %210 = vector.load %arg4[%c0_94, %c0_95] : memref<16x256xf32, #tpu.memory_space<vmem>>, vector<1x256xf32>
    %211 = vector.broadcast %210 : vector<1x256xf32> to vector<8x256xf32>
    %212 = arith.addf %209, %211 : vector<8x256xf32>
    %213 = arith.maximumf %208, %212 : vector<8x256xf32>
    %c16_i32_96 = arith.constant 16 : i32
    %214 = tpu.dynamic_rotate %208 by %c16_i32_96 dim 1 : vector<8x256xf32>, i32 -> vector<8x256xf32>
    %c1_97 = arith.constant 1 : index
    %c0_98 = arith.constant 0 : index
    %215 = vector.load %arg4[%c1_97, %c0_98] : memref<16x256xf32, #tpu.memory_space<vmem>>, vector<1x256xf32>
    %216 = vector.broadcast %215 : vector<1x256xf32> to vector<8x256xf32>
    %217 = arith.addf %214, %216 : vector<8x256xf32>
    %218 = arith.maximumf %213, %217 : vector<8x256xf32>
    %c15_i32_99 = arith.constant 15 : i32
    %219 = tpu.dynamic_rotate %208 by %c15_i32_99 dim 1 : vector<8x256xf32>, i32 -> vector<8x256xf32>
    %c2_100 = arith.constant 2 : index
    %c0_101 = arith.constant 0 : index
    %220 = vector.load %arg4[%c2_100, %c0_101] : memref<16x256xf32, #tpu.memory_space<vmem>>, vector<1x256xf32>
    %221 = vector.broadcast %220 : vector<1x256xf32> to vector<8x256xf32>
    %222 = arith.addf %219, %221 : vector<8x256xf32>
    %223 = arith.maximumf %218, %222 : vector<8x256xf32>
    %c1_i32_102 = arith.constant 1 : i32
    %224 = tpu.dynamic_rotate %208 by %c1_i32_102 dim 1 : vector<8x256xf32>, i32 -> vector<8x256xf32>
    %c3_103 = arith.constant 3 : index
    %c0_104 = arith.constant 0 : index
    %225 = vector.load %arg4[%c3_103, %c0_104] : memref<16x256xf32, #tpu.memory_space<vmem>>, vector<1x256xf32>
    %226 = vector.broadcast %225 : vector<1x256xf32> to vector<8x256xf32>
    %227 = arith.addf %224, %226 : vector<8x256xf32>
    %228 = arith.maximumf %223, %227 : vector<8x256xf32>
    %c255_i32_105 = arith.constant 255 : i32
    %229 = tpu.dynamic_rotate %208 by %c255_i32_105 dim 1 : vector<8x256xf32>, i32 -> vector<8x256xf32>
    %c5_106 = arith.constant 5 : index
    %c0_107 = arith.constant 0 : index
    %230 = vector.load %arg4[%c5_106, %c0_107] : memref<16x256xf32, #tpu.memory_space<vmem>>, vector<1x256xf32>
    %231 = vector.broadcast %230 : vector<1x256xf32> to vector<8x256xf32>
    %232 = arith.addf %229, %231 : vector<8x256xf32>
    %233 = arith.maximumf %228, %232 : vector<8x256xf32>
    %c241_i32_108 = arith.constant 241 : i32
    %234 = tpu.dynamic_rotate %208 by %c241_i32_108 dim 1 : vector<8x256xf32>, i32 -> vector<8x256xf32>
    %c6_109 = arith.constant 6 : index
    %c0_110 = arith.constant 0 : index
    %235 = vector.load %arg4[%c6_109, %c0_110] : memref<16x256xf32, #tpu.memory_space<vmem>>, vector<1x256xf32>
    %236 = vector.broadcast %235 : vector<1x256xf32> to vector<8x256xf32>
    %237 = arith.addf %234, %236 : vector<8x256xf32>
    %238 = arith.maximumf %233, %237 : vector<8x256xf32>
    %c240_i32_111 = arith.constant 240 : i32
    %239 = tpu.dynamic_rotate %208 by %c240_i32_111 dim 1 : vector<8x256xf32>, i32 -> vector<8x256xf32>
    %c7_112 = arith.constant 7 : index
    %c0_113 = arith.constant 0 : index
    %240 = vector.load %arg4[%c7_112, %c0_113] : memref<16x256xf32, #tpu.memory_space<vmem>>, vector<1x256xf32>
    %241 = vector.broadcast %240 : vector<1x256xf32> to vector<8x256xf32>
    %242 = arith.addf %239, %241 : vector<8x256xf32>
    %243 = arith.maximumf %238, %242 : vector<8x256xf32>
    %c239_i32_114 = arith.constant 239 : i32
    %244 = tpu.dynamic_rotate %208 by %c239_i32_114 dim 1 : vector<8x256xf32>, i32 -> vector<8x256xf32>
    %c8_115 = arith.constant 8 : index
    %c0_116 = arith.constant 0 : index
    %245 = vector.load %arg4[%c8_115, %c0_116] : memref<16x256xf32, #tpu.memory_space<vmem>>, vector<1x256xf32>
    %246 = vector.broadcast %245 : vector<1x256xf32> to vector<8x256xf32>
    %247 = arith.addf %244, %246 : vector<8x256xf32>
    %248 = arith.maximumf %243, %247 : vector<8x256xf32>
    %c0_117 = arith.constant 0 : index
    %c0_118 = arith.constant 0 : index
    %249 = vector.load %arg11[%c0_117, %c0_118] : memref<8x8xbf16, #tpu.memory_space<vmem>>, vector<8x8xbf16>
    %250 = arith.truncf %248 : vector<8x256xf32> to vector<8x256xbf16>
    %cst_119 = arith.constant dense<0.000000e+00> : vector<8x256xf32>
    %251 = tpu.matmul %249, %250, %cst_119 {dimension_numbers = #tpu.dot_dimension_numbers<[1], [0], [0], [1], [0, 0, 1, 1], [], []>} : vector<8x8xbf16>, vector<8x256xbf16>, vector<8x256xf32> -> vector<8x256xf32>
    %c0_120 = arith.constant 0 : index
    %c0_121 = arith.constant 0 : index
    %252 = vector.load %arg12[%c0_120, %c0_121] : memref<8x1xf32, #tpu.memory_space<vmem>>, vector<8x1xf32>
    %253 = vector.broadcast %252 : vector<8x1xf32> to vector<8x256xf32>
    %254 = arith.addf %251, %253 : vector<8x256xf32>
    %c0_122 = arith.constant 0 : index
    %c0_123 = arith.constant 0 : index
    %c0_124 = arith.constant 0 : index
    %255 = vector.load %arg13[%c0_122, %c0_123, %c0_124] : memref<1x32x256xf32, #tpu.memory_space<vmem>>, vector<1x8x256xf32>
    %256 = vector.shape_cast %255 : vector<1x8x256xf32> to vector<8x256xf32>
    %257 = vector.shape_cast %6 : vector<8x256xf32> to vector<1x8x256xf32>
    tpu.vector_store %arg13[%c0_122, %c0_123, %c0_124], %257 {strides = array<i32>} : memref<1x32x256xf32, #tpu.memory_space<vmem>>, vector<1x8x256xf32>,
    %c0_125 = arith.constant 0 : index
    %c8_126 = arith.constant 8 : index
    %c0_127 = arith.constant 0 : index
    %258 = vector.load %arg13[%c0_125, %c8_126, %c0_127] : memref<1x32x256xf32, #tpu.memory_space<vmem>>, vector<1x8x256xf32>
    %259 = vector.shape_cast %258 : vector<1x8x256xf32> to vector<8x256xf32>
    %260 = vector.shape_cast %55 : vector<8x256xf32> to vector<1x8x256xf32>
    tpu.vector_store %arg13[%c0_125, %c8_126, %c0_127], %260 {strides = array<i32>} : memref<1x32x256xf32, #tpu.memory_space<vmem>>, vector<1x8x256xf32>,
    %c0_128 = arith.constant 0 : index
    %c16_129 = arith.constant 16 : index
    %c0_130 = arith.constant 0 : index
    %261 = vector.load %arg13[%c0_128, %c16_129, %c0_130] : memref<1x32x256xf32, #tpu.memory_space<vmem>>, vector<1x8x256xf32>
    %262 = vector.shape_cast %261 : vector<1x8x256xf32> to vector<8x256xf32>
    %263 = vector.shape_cast %207 : vector<8x256xf32> to vector<1x8x256xf32>
    tpu.vector_store %arg13[%c0_128, %c16_129, %c0_130], %263 {strides = array<i32>} : memref<1x32x256xf32, #tpu.memory_space<vmem>>, vector<1x8x256xf32>,
    %c0_131 = arith.constant 0 : index
    %c24_132 = arith.constant 24 : index
    %c0_133 = arith.constant 0 : index
    %264 = vector.load %arg13[%c0_131, %c24_132, %c0_133] : memref<1x32x256xf32, #tpu.memory_space<vmem>>, vector<1x8x256xf32>
    %265 = vector.shape_cast %264 : vector<1x8x256xf32> to vector<8x256xf32>
    %266 = vector.shape_cast %254 : vector<8x256xf32> to vector<1x8x256xf32>
    tpu.vector_store %arg13[%c0_131, %c24_132, %c0_133], %266 {strides = array<i32>} : memref<1x32x256xf32, #tpu.memory_space<vmem>>, vector<1x8x256xf32>,
    return
  }
  func.func @transform_0(%arg0: i32) -> (i32, i32) {
    %c0_i32 = arith.constant 0 : i32
    %c0_i32_0 = arith.constant 0 : i32
    return %c0_i32, %arg0 : i32, i32
  }
  func.func @transform_1(%arg0: i32) -> (i32, i32) {
    %c0_i32 = arith.constant 0 : i32
    %c0_i32_0 = arith.constant 0 : i32
    %c0_i32_1 = arith.constant 0 : i32
    return %c0_i32, %c0_i32_0 : i32, i32
  }
  func.func @transform_2(%arg0: i32) -> (i32, i32) {
    %c0_i32 = arith.constant 0 : i32
    %c0_i32_0 = arith.constant 0 : i32
    %c0_i32_1 = arith.constant 0 : i32
    return %c0_i32, %c0_i32_0 : i32, i32
  }
  func.func @transform_3(%arg0: i32) -> (i32, i32) {
    %c0_i32 = arith.constant 0 : i32
    %c0_i32_0 = arith.constant 0 : i32
    %c0_i32_1 = arith.constant 0 : i32
    return %c0_i32, %c0_i32_0 : i32, i32
  }
  func.func @transform_4(%arg0: i32) -> (i32, i32) {
    %c0_i32 = arith.constant 0 : i32
    %c0_i32_0 = arith.constant 0 : i32
    %c0_i32_1 = arith.constant 0 : i32
    return %c0_i32, %c0_i32_0 : i32, i32
  }
  func.func @transform_5(%arg0: i32) -> (i32, i32) {
    %c0_i32 = arith.constant 0 : i32
    %c0_i32_0 = arith.constant 0 : i32
    %c0_i32_1 = arith.constant 0 : i32
    return %c0_i32, %c0_i32_0 : i32, i32
  }
  func.func @transform_6(%arg0: i32) -> (i32, i32) {
    %c0_i32 = arith.constant 0 : i32
    %c0_i32_0 = arith.constant 0 : i32
    %c0_i32_1 = arith.constant 0 : i32
    return %c0_i32, %c0_i32_0 : i32, i32
  }
  func.func @transform_7(%arg0: i32) -> (i32, i32) {
    %c0_i32 = arith.constant 0 : i32
    %c0_i32_0 = arith.constant 0 : i32
    %c0_i32_1 = arith.constant 0 : i32
    return %c0_i32, %c0_i32_0 : i32, i32
  }
  func.func @transform_8(%arg0: i32) -> (i32, i32) {
    %c0_i32 = arith.constant 0 : i32
    %c0_i32_0 = arith.constant 0 : i32
    %c0_i32_1 = arith.constant 0 : i32
    return %c0_i32, %c0_i32_0 : i32, i32
  }
  func.func @transform_9(%arg0: i32) -> (i32, i32) {
    %c0_i32 = arith.constant 0 : i32
    %c0_i32_0 = arith.constant 0 : i32
    %c0_i32_1 = arith.constant 0 : i32
    return %c0_i32, %c0_i32_0 : i32, i32
  }
  func.func @transform_10(%arg0: i32) -> (i32, i32) {
    %c0_i32 = arith.constant 0 : i32
    %c0_i32_0 = arith.constant 0 : i32
    %c0_i32_1 = arith.constant 0 : i32
    return %c0_i32, %c0_i32_0 : i32, i32
  }
  func.func @transform_11(%arg0: i32) -> (i32, i32) {
    %c0_i32 = arith.constant 0 : i32
    %c0_i32_0 = arith.constant 0 : i32
    %c0_i32_1 = arith.constant 0 : i32
    return %c0_i32, %c0_i32_0 : i32, i32
  }
  func.func @transform_12(%arg0: i32) -> (i32, i32, i32) {
    %c0_i32 = arith.constant 0 : i32
    %c0_i32_0 = arith.constant 0 : i32
    %c0_i32_1 = arith.constant 0 : i32
    return %arg0, %c0_i32, %c0_i32_0 : i32, i32, i32
  }
}

</mosaic_0001>

<bundles_post_ra>
// kernel: tpu_custom_call.1
= control target key start
LH: loop header
LB: loop body
LE: loop exit
PB: predicated region body
PF: predicated region fallthrough
CT: control target
= control target key end

     0   :  { %s4748_s0 = inlined_call_operand.hbm [shape: bf16[8,512], index: 0, kind: input, shape index: {}]   ;;  %s4749_s1 = inlined_call_operand.hbm [shape: f32[16,256], index: 1, kind: input, shape index: {}]   ;;  %s4750_s2 = inlined_call_operand.hbm [shape: f32[32,256], index: 2, kind: input, shape index: {}]   ;;  %s4751_s3 = inlined_call_operand.hbm [shape: f32[16,256], index: 3, kind: input, shape index: {}]   ;;  %s4752_s4 = inlined_call_operand.hbm [shape: bf16[40,8], index: 4, kind: input, shape index: {}]   ;;  %s4753_s5 = inlined_call_operand.hbm [shape: f32[40,1], index: 5, kind: input, shape index: {}]   ;;  %s4754_s6 = inlined_call_operand.hbm [shape: bf16[8,144], index: 6, kind: input, shape index: {}]   ;;  %s4755_s7 = inlined_call_operand.hbm [shape: f32[8,1], index: 7, kind: input, shape index: {}]   ;;  %s4756_s8 = inlined_call_operand.hbm [shape: bf16[8,400], index: 8, kind: input, shape index: {}]   ;;  %s4757_s9 = inlined_call_operand.hbm [shape: f32[8,1], index: 9, kind: input, shape index: {}]   ;;  %s4758_s10 = inlined_call_operand.hbm [shape: bf16[8,8], index: 10, kind: input, shape index: {}]   ;;  %s4759_s11 = inlined_call_operand.hbm [shape: f32[8,1], index: 11, kind: input, shape index: {}]   ;;  %s4760_s12 = inlined_call_operand.hbm [shape: f32[2,32,256], index: 12, kind: output, shape index: {}]  }
   0x1   :  { %4817 = sst [smem:[#allocation48_spill]] %s4748_s0 }
   0x2   :  { %4818 = sst [smem:[#allocation49_spill]] %s4749_s1 }
   0x3   :  { %4819 = sst [smem:[#allocation50_spill]] %s4751_s3 }
   0x4   :  { %4820 = sst [smem:[#allocation51_spill]] %s4760_s12 }
   0x5   :  { %17 = vsyncpa [#allocation4], 0 }
   0x6   :  { %19 = vsyncpa [#allocation4 + $0x1], 0 }
   0x7   :  { %20 = vsyncpa [#allocation7], 0 }
   0x8   :  { %21 = vsyncpa [#allocation10], 0 }
   0x9   :  { %22 = vsyncpa [#allocation13], 0 }
   0xa   :  { %23 = vsyncpa [#allocation16], 0 }
   0xb   :  { %24 = vsyncpa [#allocation19], 0 }
   0xc   :  { %25 = vsyncpa [#allocation22], 0 }
   0xd   :  { %26 = vsyncpa [#allocation5], 0 }
   0xe   :  { %28 = vsyncpa [#allocation5 + $0x1], 0  ;;  %s3284_s21 = smov 0   ;;  %s3286_s22 = smov 0  }
   0xf   :  { %s3288_s23 = smov 0   ;;  %s3290_s24 = smov 0  }
  0x10 LB: > { %s3174_s25 = smov [#allocation6]   ;;  %s3305_s27 = sadd.s32 4294967295, %s3172_s24   ;;  %s3172_s24 = sphi %s3290_s24, %s4905_s24   ;;  %s3168_s23 = sphi %s3288_s23, %s4904_s23   ;;  %s3164_s22 = sphi %s3286_s22, %s4903_s22   ;;  %s3160_s21 = sphi %s3284_s21, %s4902_s21  }
  0x11   : > { %s334_s26 = sshll.u32 %s3174_s25, 4  ;;  %4821 = sst [smem:[#allocation32_spill]] %s3305_s27  ;;  %s3310_s26 = int_to_ptr.vmem [resolvable:$true] %s334_s26 }
  0x12   : > { %p2441_p0 = scmp.ge.s32.totalorder %s3172_s24, 1  ;;  %p4769_p1 = scmp.eq.s32.totalorder %s3305_s27, 0 }
  0x13   : > { %p322_p2 = scmp.lt.s32.totalorder %s3172_s24, 3  ;;  %s3175_s29 = smov [#allocation9]  }
  0x14   : > { %s360_s30 = sshll.u32 %s3175_s29, 4  ;;  %s3176_s14 = smov [#allocation12]   ;;  %s3325_s30 = int_to_ptr.vmem [resolvable:$true] %s360_s30 }
  0x15   : > { %p3312_p3 = pnand %p2441_p0, %p322_p2  ;;  %s386_s15 = sshll.u32 %s3176_s14, 4  ;;  %s3327_s15 = int_to_ptr.vmem [resolvable:$true] %s386_s15 }
  0x16   : > { %s4825_s1 = sld [smem:[#allocation49_spill]] }
  0x17   : > { %s4822_s28 = scalar_select %p3312_p3, 1, 0 }
  0x18   : > { %p2549_p5 = pneg %p3312_p3 }
  0x19   : > { %4823 = sst [smem:[#allocation33_spill]] %s4822_s28 }
  0x1a   : > { %p3321_p6 = pnand %p2549_p5, %p4769_p1 }
  0x1c   : > { %s2744_s18 = scalar_lea.hbm %s4825_s1, 512  ;;  %p3337_p8 = pneg %p3321_p6 }
  0x1d   : > { %p2745_p7 = scmp.ne.s32.totalorder %s4825_s1, %s2744_s18  ;;  %p2751_p11 = scmp.lt.u32.totalorder %s2744_s18, %s4825_s1 }
  0x1f   : > { %p2747_p9 = pnand %p3337_p8, %p2745_p7 }
  0x21   : > { %p2748_p10 = pneg %p2747_p9 }
  0x23   : > { %p2753_p12 = pnand %p2751_p11, %p2748_p10 }
  0x25   : > { %2756 = shalt.err (!%p2753_p12)
}
  0x26   : > { %s2757_s16 = scalar_lea.vmem %s3310_s26, 512  ;;  %p2765_p5 = scmp.lt.s32.totalorder %s3310_s26, %s3310_s26 }
  0x27   : > { %p2758_p13 = scmp.ne.s32.totalorder %s3310_s26, %s2757_s16  ;;  %p2766_p4 = scmp.lt.s32.totalorder %s2757_s16, %s2757_s16 }
  0x29   : > { %p2760_p0 = pnand %p2758_p13, %p3337_p8  ;;  %p2767_p7 = por %p2766_p4, %p2765_p5 }
  0x2b   : > { %p2761_p2 = pneg %p2760_p0 }
  0x2d   : > { %p2768_p9 = pnand %p2767_p7, %p2761_p2 }
  0x2f   : > { %2771 = shalt.err (!%p2768_p9)
}
  0x30   : > { %s4767_s17 = smov 256   ;;  %s4768_s18 = smov 16  }
  0x31   : > { %2552 = dma.hbm_to_vmem [thread:$0]  (!%p3321_p6), %s4825_s1, 512, %s3310_s26, [#allocation7], %s4767_s17, %s4767_s17, %s4768_s18  }
  0x32   : > { %s4827_s3 = sld [smem:[#allocation50_spill]] }
  0x38   : > { %s2772_s16 = scalar_lea.hbm %s4827_s3, 512 }
  0x39   : > { %p2773_p4 = scmp.ne.s32.totalorder %s4827_s3, %s2772_s16  ;;  %p2779_p12 = scmp.lt.u32.totalorder %s2772_s16, %s4827_s3 }
  0x3b   : > { %p2775_p10 = pnand %p2773_p4, %p3337_p8 }
  0x3d   : > { %p2776_p11 = pneg %p2775_p10 }
  0x3f   : > { %p2781_p13 = pnand %p2779_p12, %p2776_p11 }
  0x41   : > { %2784 = shalt.err (!%p2781_p13)
}
  0x42   : > { %s2785_s26 = scalar_lea.vmem %s3325_s30, 512  ;;  %p2793_p7 = scmp.lt.s32.totalorder %s3325_s30, %s3325_s30 }
  0x43   : > { %p2786_p0 = scmp.ne.s32.totalorder %s3325_s30, %s2785_s26  ;;  %p2794_p9 = scmp.lt.s32.totalorder %s2785_s26, %s2785_s26 }
  0x45   : > { %p2788_p2 = pnand %p2786_p0, %p3337_p8  ;;  %p2795_p4 = por %p2794_p9, %p2793_p7 }
  0x47   : > { %p2789_p5 = pneg %p2788_p2 }
  0x49   : > { %p2796_p10 = pnand %p2795_p4, %p2789_p5 }
  0x4b   : > { %2799 = shalt.err (!%p2796_p10)
}
  0x4c   : > { %2558 = dma.hbm_to_vmem [thread:$0]  (!%p3321_p6), %s4827_s3, 512, %s3325_s30, [#allocation10], %s4767_s17, %s4767_s17, %s4768_s18  }
  0x4d   : > { %s2800_s19 = scalar_lea.hbm %s4753_s5, 640 }
  0x4e   : > { %p2801_p11 = scmp.ne.s32.totalorder %s4753_s5, %s2800_s19  ;;  %p2807_p0 = scmp.lt.u32.totalorder %s2800_s19, %s4753_s5 }
  0x50   : > { %p2803_p12 = pnand %p2801_p11, %p3337_p8 }
  0x52   : > { %p2804_p13 = pneg %p2803_p12 }
  0x54   : > { %p2809_p2 = pnand %p2807_p0, %p2804_p13 }
  0x56   : > { %2812 = shalt.err (!%p2809_p2)
}
  0x57   : > { %s2813_s30 = scalar_lea.vmem %s3327_s15, 640  ;;  %p2821_p4 = scmp.lt.s32.totalorder %s3327_s15, %s3327_s15 }
  0x58   : > { %p2814_p5 = scmp.ne.s32.totalorder %s3327_s15, %s2813_s30  ;;  %p2822_p10 = scmp.lt.s32.totalorder %s2813_s30, %s2813_s30 }
  0x5a   : > { %p2816_p7 = pnand %p2814_p5, %p3337_p8  ;;  %p2823_p11 = por %p2822_p10, %p2821_p4 }
  0x5c   : > { %p2817_p9 = pneg %p2816_p7 }
  0x5e   : > { %p2824_p12 = pnand %p2823_p11, %p2817_p9 }
  0x60   : > { %2827 = shalt.err (!%p2824_p12)
}
  0x61   : > { %s3179_s26 = smov 128   ;;  %s3180_s0 = smov 8  }
  0x62   : > { %2564 = dma.hbm_to_vmem [thread:$0]  (!%p3321_p6), %s4753_s5, 640, %s3327_s15, [#allocation13], %s3179_s26, %s3179_s26, %s3180_s0  }
  0x63   : > { %s3181_s28 = smov [#allocation15]   ;;  %s3182_s20 = smov [#allocation18]  }
  0x64   : > { %s411_s19 = sshll.u32 %s3181_s28, 4  ;;  %s433_s29 = sshll.u32 %s3182_s20, 4  ;;  %s412_s19 = int_to_ptr.vmem [resolvable:$true] %s411_s19  ;;  %s434_s29 = int_to_ptr.vmem [resolvable:$true] %s433_s29 }
  0x65   : > { %s2828_s30 = scalar_lea.hbm %s4755_s7, 128 }
  0x66   : > { %p2829_p13 = scmp.ne.s32.totalorder %s4755_s7, %s2828_s30  ;;  %p2835_p5 = scmp.lt.u32.totalorder %s2828_s30, %s4755_s7 }
  0x68   : > { %p2831_p0 = pnand %p2829_p13, %p3337_p8 }
  0x6a   : > { %p2832_p2 = pneg %p2831_p0 }
  0x6c   : > { %p2837_p7 = pnand %p2835_p5, %p2832_p2 }
  0x6e   : > { %2840 = shalt.err (!%p2837_p7)
}
  0x6f   : > { %s2841_s15 = scalar_lea.vmem %s412_s19, 128  ;;  %p2849_p11 = scmp.lt.s32.totalorder %s412_s19, %s412_s19 }
  0x70   : > { %p2842_p9 = scmp.ne.s32.totalorder %s412_s19, %s2841_s15  ;;  %p2850_p12 = scmp.lt.s32.totalorder %s2841_s15, %s2841_s15 }
  0x72   : > { %p2844_p4 = pnand %p2842_p9, %p3337_p8  ;;  %p2851_p1 = por %p2850_p12, %p2849_p11 }
  0x74   : > { %p2845_p10 = pneg %p2844_p4 }
  0x76   : > { %p2852_p3 = pnand %p2851_p1, %p2845_p10 }
  0x78   : > { %2855 = shalt.err (!%p2852_p3)
}
  0x79   : > { %2570 = dma.hbm_to_vmem [thread:$0]  (!%p3321_p6), %s4755_s7, 128, %s412_s19, [#allocation16]  }
  0x7a   : > { %s2856_s26 = scalar_lea.hbm %s4757_s9, 128 }
  0x7b   : > { %p2857_p13 = scmp.ne.s32.totalorder %s4757_s9, %s2856_s26  ;;  %p2863_p3 = scmp.lt.u32.totalorder %s2856_s26, %s4757_s9 }
  0x7d   : > { %p2859_p0 = pnand %p2857_p13, %p3337_p8 }
  0x7f   : > { %p2860_p1 = pneg %p2859_p0 }
  0x81   : > { %p2865_p2 = pnand %p2863_p3, %p2860_p1 }
  0x83   : > { %2868 = shalt.err (!%p2865_p2)
}
  0x84   : > { %s2869_s20 = scalar_lea.vmem %s434_s29, 128  ;;  %p2877_p4 = scmp.lt.s32.totalorder %s434_s29, %s434_s29 }
  0x85   : > { %p2870_p5 = scmp.ne.s32.totalorder %s434_s29, %s2869_s20  ;;  %p2878_p10 = scmp.lt.s32.totalorder %s2869_s20, %s2869_s20 }
  0x87   : > { %p2872_p7 = pnand %p2870_p5, %p3337_p8  ;;  %p2879_p11 = por %p2878_p10, %p2877_p4 }
  0x89   : > { %p2873_p9 = pneg %p2872_p7 }
  0x8b   : > { %p2880_p12 = pnand %p2879_p11, %p2873_p9 }
  0x8d   : > { %2883 = shalt.err (!%p2880_p12)
}
  0x8e   : > { %2576 = dma.hbm_to_vmem [thread:$0]  (!%p3321_p6), %s4757_s9, 128, %s434_s29, [#allocation19]  }
  0x8f   : > { %s3183_s16 = smov [#allocation8]   ;;  %s3184_s15 = smov [#allocation11]  }
  0x90   : > { %s347_s30 = sshll.u32 %s3183_s16, 4  ;;  %s373_s17 = sshll.u32 %s3184_s15, 4  ;;  %s348_s30 = int_to_ptr.vmem [resolvable:$true] %s347_s30  ;;  %s374_s17 = int_to_ptr.vmem [resolvable:$true] %s373_s17 }
  0x91   : > { %s2884_s3 = scalar_lea.hbm %s4750_s2, 1024 }
  0x92   : > { %p2885_p13 = scmp.ne.s32.totalorder %s4750_s2, %s2884_s3  ;;  %p2891_p3 = scmp.lt.u32.totalorder %s2884_s3, %s4750_s2 }
  0x94   : > { %p2887_p0 = pnand %p2885_p13, %p3337_p8 }
  0x96   : > { %p2888_p1 = pneg %p2887_p0 }
  0x98   : > { %p2893_p2 = pnand %p2891_p3, %p2888_p1 }
  0x9a   : > { %2896 = shalt.err (!%p2893_p2)
}
  0x9b   : > { %s2897_s29 = scalar_lea.vmem %s348_s30, 1024  ;;  %p2905_p4 = scmp.lt.s32.totalorder %s348_s30, %s348_s30 }
  0x9c   : > { %p2898_p5 = scmp.ne.s32.totalorder %s348_s30, %s2897_s29  ;;  %p2906_p10 = scmp.lt.s32.totalorder %s2897_s29, %s2897_s29 }
  0x9e   : > { %p2900_p7 = pnand %p2898_p5, %p3337_p8  ;;  %p2907_p11 = por %p2906_p10, %p2905_p4 }
  0xa0   : > { %p2901_p9 = pneg %p2900_p7 }
  0xa2   : > { %p2908_p12 = pnand %p2907_p11, %p2901_p9 }
  0xa4   : > { %2911 = shalt.err (!%p2908_p12)
}
  0xa5   : > { %s4828_s28 = smov 16   ;;  %s4829_s20 = smov 256  }
  0xa6   : > { %2555 = dma.hbm_to_vmem [thread:$0]  (!%p3321_p6), %s4750_s2, 1024, %s348_s30, [#allocation7], %s4829_s20, %s4829_s20, %s4828_s28  }
  0xa7   : > { %s2912_s18 = scalar_lea.hbm %s4752_s4, 320 }
  0xa8   : > { %p2913_p13 = scmp.ne.s32.totalorder %s4752_s4, %s2912_s18  ;;  %p2919_p3 = scmp.lt.u32.totalorder %s2912_s18, %s4752_s4 }
  0xaa   : > { %p2915_p0 = pnand %p2913_p13, %p3337_p8 }
  0xac   : > { %p2916_p1 = pneg %p2915_p0 }
  0xae   : > { %p2921_p2 = pnand %p2919_p3, %p2916_p1 }
  0xb0   : > { %2924 = shalt.err (!%p2921_p2)
}
  0xb1   : > { %s2925_s12 = scalar_lea.vmem %s374_s17, 320  ;;  %p2933_p4 = scmp.lt.s32.totalorder %s374_s17, %s374_s17 }
  0xb2   : > { %p2926_p5 = scmp.ne.s32.totalorder %s374_s17, %s2925_s12  ;;  %p2934_p10 = scmp.lt.s32.totalorder %s2925_s12, %s2925_s12 }
  0xb4   : > { %p2928_p7 = pnand %p2926_p5, %p3337_p8  ;;  %p2935_p11 = por %p2934_p10, %p2933_p4 }
  0xb6   : > { %p2929_p9 = pneg %p2928_p7 }
  0xb8   : > { %p2936_p12 = pnand %p2935_p11, %p2929_p9 }
  0xba   : > { %2939 = shalt.err (!%p2936_p12)
}
  0xbb   : > { %s3185_s30 = smov 64   ;;  %s3186_s27 = smov 4  }
  0xbc   : > { %2561 = dma.hbm_to_vmem [thread:$0]  (!%p3321_p6), %s4752_s4, 320, %s374_s17, [#allocation10], %s3185_s30, %s3185_s30, %s3186_s27  }
  0xbd   : > { %s3187_s20 = smov [#allocation14]   ;;  %s3188_s14 = smov [#allocation17]  }
  0xbe   : > { %s400_s19 = sshll.u32 %s3187_s20, 4  ;;  %s422_s16 = sshll.u32 %s3188_s14, 4  ;;  %s401_s19 = int_to_ptr.vmem [resolvable:$true] %s400_s19  ;;  %s423_s16 = int_to_ptr.vmem [resolvable:$true] %s422_s16 }
  0xbf   : > { %s2940_s1 = scalar_lea.hbm %s4754_s6, 128 }
  0xc0   : > { %p2941_p13 = scmp.ne.s32.totalorder %s4754_s6, %s2940_s1  ;;  %p2947_p3 = scmp.lt.u32.totalorder %s2940_s1, %s4754_s6 }
  0xc2   : > { %p2943_p0 = pnand %p2941_p13, %p3337_p8 }
  0xc4   : > { %p2944_p1 = pneg %p2943_p0 }
  0xc6   : > { %p2949_p2 = pnand %p2947_p3, %p2944_p1 }
  0xc8   : > { %2952 = shalt.err (!%p2949_p2)
}
  0xc9   : > { %s2953_s17 = scalar_lea.vmem %s401_s19, 128  ;;  %p2961_p4 = scmp.lt.s32.totalorder %s401_s19, %s401_s19 }
  0xca   : > { %p2954_p5 = scmp.ne.s32.totalorder %s401_s19, %s2953_s17  ;;  %p2962_p10 = scmp.lt.s32.totalorder %s2953_s17, %s2953_s17 }
  0xcc   : > { %p2956_p7 = pnand %p2954_p5, %p3337_p8  ;;  %p2963_p11 = por %p2962_p10, %p2961_p4 }
  0xce   : > { %p2957_p9 = pneg %p2956_p7 }
  0xd0   : > { %p2964_p12 = pnand %p2963_p11, %p2957_p9 }
  0xd2   : > { %2967 = shalt.err (!%p2964_p12)
}
  0xd3   : > { %2567 = dma.hbm_to_vmem [thread:$0]  (!%p3321_p6), %s4754_s6, 128, %s401_s19, [#allocation13]  }
  0xd4   : > { %s2968_s20 = scalar_lea.hbm %s4756_s8, 256 }
  0xd5   : > { %p2969_p13 = scmp.ne.s32.totalorder %s4756_s8, %s2968_s20  ;;  %p2975_p3 = scmp.lt.u32.totalorder %s2968_s20, %s4756_s8 }
  0xd7   : > { %p2971_p0 = pnand %p2969_p13, %p3337_p8 }
  0xd9   : > { %p2972_p1 = pneg %p2971_p0 }
  0xdb   : > { %p2977_p2 = pnand %p2975_p3, %p2972_p1 }
  0xdd   : > { %2980 = shalt.err (!%p2977_p2)
}
  0xde   : > { %s2981_s3 = scalar_lea.vmem %s423_s16, 256  ;;  %p2989_p4 = scmp.lt.s32.totalorder %s423_s16, %s423_s16 }
  0xdf   : > { %p2982_p5 = scmp.ne.s32.totalorder %s423_s16, %s2981_s3  ;;  %p2990_p10 = scmp.lt.s32.totalorder %s2981_s3, %s2981_s3 }
  0xe1   : > { %p2984_p7 = pnand %p2982_p5, %p3337_p8  ;;  %p2991_p11 = por %p2990_p10, %p2989_p4 }
  0xe3   : > { %p2985_p9 = pneg %p2984_p7 }
  0xe5   : > { %p2992_p12 = pnand %p2991_p11, %p2985_p9 }
  0xe7   : > { %2995 = shalt.err (!%p2992_p12)
}
  0xe8   : > { %2573 = dma.hbm_to_vmem [thread:$0]  (!%p3321_p6), %s4756_s8, 256, %s423_s16, [#allocation16]  }
  0xe9   : > { %s3189_s0 = smov [#allocation20]   ;;  %s3190_s17 = smov [#allocation21]  }
  0xea   : > { %s444_s12 = sshll.u32 %s3189_s0, 4  ;;  %s455_s30 = sshll.u32 %s3190_s17, 4  ;;  %s445_s12 = int_to_ptr.vmem [resolvable:$true] %s444_s12  ;;  %s456_s30 = int_to_ptr.vmem [resolvable:$true] %s455_s30 }
  0xeb   : > { %s2996_s28 = scalar_lea.hbm %s4758_s10, 64 }
  0xec   : > { %p2997_p13 = scmp.ne.s32.totalorder %s4758_s10, %s2996_s28  ;;  %p3003_p3 = scmp.lt.u32.totalorder %s2996_s28, %s4758_s10 }
  0xee   : > { %p2999_p0 = pnand %p2997_p13, %p3337_p8 }
  0xf0   : > { %p3000_p1 = pneg %p2999_p0 }
  0xf2   : > { %p3005_p2 = pnand %p3003_p3, %p3000_p1 }
  0xf4   : > { %3008 = shalt.err (!%p3005_p2)
}
  0xf5   : > { %s3009_s16 = scalar_lea.vmem %s445_s12, 64  ;;  %p3017_p4 = scmp.lt.s32.totalorder %s445_s12, %s445_s12 }
  0xf6   : > { %p3010_p5 = scmp.ne.s32.totalorder %s445_s12, %s3009_s16  ;;  %p3018_p10 = scmp.lt.s32.totalorder %s3009_s16, %s3009_s16 }
  0xf8   : > { %p3012_p7 = pnand %p3010_p5, %p3337_p8  ;;  %p3019_p11 = por %p3018_p10, %p3017_p4 }
  0xfa   : > { %p3013_p9 = pneg %p3012_p7 }
  0xfc   : > { %p3020_p12 = pnand %p3019_p11, %p3013_p9 }
  0xfe   : > { %3023 = shalt.err (!%p3020_p12)
}
  0xff   : > { %2579 = dma.hbm_to_vmem [thread:$0]  (!%p3321_p6), %s4758_s10, 64, %s445_s12, [#allocation19]  }
 0x100   : > { %s3024_s0 = scalar_lea.hbm %s4759_s11, 128 }
 0x101   : > { %p3025_p13 = scmp.ne.s32.totalorder %s4759_s11, %s3024_s0  ;;  %p3031_p3 = scmp.lt.u32.totalorder %s3024_s0, %s4759_s11 }
 0x103   : > { %p3027_p0 = pnand %p3025_p13, %p3337_p8 }
 0x105   : > { %p3028_p1 = pneg %p3027_p0 }
 0x107   : > { %p3033_p2 = pnand %p3031_p3, %p3028_p1 }
 0x109   : > { %3036 = shalt.err (!%p3033_p2)
}
 0x10a   : > { %s3037_s20 = scalar_lea.vmem %s456_s30, 128  ;;  %p3045_p4 = scmp.lt.s32.totalorder %s456_s30, %s456_s30 }
 0x10b   : > { %p3038_p5 = scmp.ne.s32.totalorder %s456_s30, %s3037_s20  ;;  %p3046_p10 = scmp.lt.s32.totalorder %s3037_s20, %s3037_s20 }
 0x10d   : > { %p3040_p7 = pnand %p3038_p5, %p3337_p8  ;;  %p3047_p11 = por %p3046_p10, %p3045_p4 }
 0x10f   : > { %p3041_p9 = pneg %p3040_p7 }
 0x111   : > { %p3048_p12 = pnand %p3047_p11, %p3041_p9 }
 0x113   : > { %3051 = shalt.err (!%p3048_p12)
}
 0x114   : > { %s4830_s25 = sld [smem:[#allocation32_spill]]  ;;  %s2440_s15 = sadd.s32 4294967294, %s3172_s24  }
 0x115   : > { %2582 = dma.hbm_to_vmem [thread:$0]  (!%p3321_p6), %s4759_s11, 128, %s456_s30, [#allocation22]  }
 0x116   : > { %s3559_s13 = sadd.s32 1, %s3172_s24   ;;  %s41_s18 = sadd.s32 1, %s3168_s23 }
 0x117   : > { %s38_s16 = ssub.s32 %s3172_s24, %s3559_s13  ;;  %p48_p8 = scmp.ne.s32.totalorder %s3168_s23, %s3164_s22 }
 0x118   : > { %p39_p13 = scmp.eq.s32.totalorder %s38_s16, 0  ;;  %p49_p0 = scmp.eq.s32.totalorder %s3172_s24, 0 }
 0x119   : > { %p54_p1 = scmp.ne.s32.totalorder %s3164_s22, %s3160_s21  ;;  %p315_p9 = scmp.eq.s32.totalorder %s2440_s15, 1 }
 0x11a   : > { %p309_p3 = scmp.eq.s32.totalorder %s4830_s25, 1  ;;  %p50_p2 = por %p49_p0, %p48_p8 }
 0x11b   : > { %s3571_s1 = scalar_select %p39_p13, %s3168_s23, %s41_s18  }
 0x11c   : > { %p4831_p5 = scmp.eq.s32.totalorder %s4830_s25, 0  ;;  %p3579_p6 = por %p309_p3, %p48_p8 }
 0x11d   : > { %p2602_p4 = scmp.lt.s32.totalorder %s3172_s24, 2  ;;  %s466_s19 = sand.u32 1, %s3168_s23  }
 0x11e   : > { %p3575_p7 = por %p4831_p5, %p54_p1  ;;  %p3585_p10 = por %p315_p9, %p54_p1 }
 0x11f   : > { %s4833_s30 = scalar_select %p3579_p6, 1, 0 }
 0x120   : > { %s4834_s26 = scalar_select %p3585_p10, 1, 0 }
 0x121   : > { %s2454_s0 = sshll.u32 %s466_s19, 3  ;;  %s2495_s17 = sshll.u32 %s3172_s24, 7 }
 0x122   : > { %s4835_s28 = sld [smem:[#allocation48_spill]]  ;;  %s470_s12 = scalar_lea.vmem [#allocation3], %s2454_s0 }
 0x123   : > { %s478_s14 = sshll.u32 %s470_s12, 4  ;;  %p3595_p11 = pnand %p2602_p4, %p50_p2  ;;  %s3599_s14 = int_to_ptr.vmem [resolvable:$true] %s478_s14 }
 0x124   : > { %s467_s15 = scalar_lea.sflag [#allocation4], %s466_s19 }
 0x125   : > { %p3054_p8 = pneg %p3595_p11 }
 0x128   : > { %s3593_s20 = scalar_lea.hbm %s4835_s28, %s2495_s17  ;;  %s3057_s17 = scalar_lea.hbm %s4835_s28, 256 }
 0x129   : > { %s3052_s18 = scalar_lea.hbm %s3593_s20, 128  ;;  %p3058_p1 = scmp.lt.u32.totalorder %s3593_s20, %s4835_s28 }
 0x12a   : > { %p3053_p12 = scmp.ne.s32.totalorder %s3593_s20, %s3052_s18  ;;  %p3059_p3 = scmp.lt.u32.totalorder %s3057_s17, %s3052_s18 }
 0x12b   : > { %p3061_p5 = scmp.lt.u32.totalorder %s3052_s18, %s3593_s20 }
 0x12c   : > { %p3055_p13 = pnand %p3054_p8, %p3053_p12  ;;  %p3060_p2 = por %p3059_p3, %p3058_p1 }
 0x12e   : > { %p3056_p0 = pneg %p3055_p13  ;;  %p3062_p9 = por %p3061_p5, %p3060_p2 }
 0x130   : > { %p3063_p4 = pnand %p3062_p9, %p3056_p0 }
 0x132   : > { %3066 = shalt.err (!%p3063_p4)
}
 0x133   : > { %s3067_s19 = scalar_lea.vmem %s3599_s14, 128  ;;  %s3191_s12 = smov [#allocation3]  }
 0x134   : > { %p3068_p12 = scmp.ne.s32.totalorder %s3599_s14, %s3067_s19  ;;  %s3072_s16 = sshll.u32 %s3191_s12, 4  ;;  %s3073_s16 = int_to_ptr.vmem [resolvable:$false] %s3072_s16 }
 0x135   : > { %s3074_s0 = scalar_lea.vmem %s3073_s16, 256  ;;  %p3075_p6 = scmp.lt.s32.totalorder %s3599_s14, %s3073_s16 }
 0x136   : > { %p3070_p13 = pnand %p3068_p12, %p3054_p8  ;;  %p3076_p1 = scmp.lt.s32.totalorder %s3074_s0, %s3067_s19 }
 0x138   : > { %p3071_p10 = pneg %p3070_p13  ;;  %p3077_p3 = por %p3076_p1, %p3075_p6 }
 0x13a   : > { %p3078_p2 = pnand %p3077_p3, %p3071_p10 }
 0x13c   : > { %3081 = shalt.err (!%p3078_p2)
}
 0x13d   : > { %2586 = dma.hbm_to_vmem [thread:$0]  (!%p3595_p11), %s3593_s20, 128, %s3599_s14, %s467_s15  }
 0x13e   : > { %s4837_s18 = sld [smem:[#allocation33_spill]] }
 0x144   : > { %p4838_p0 = scmp.ne.s32.totalorder %s4837_s18, 0 }
 0x146   : > { %487 = sbr.rel (%p4838_p0) target bundleno = 1205 (0x4b5), region = 68 }
 0x14d   : > { %s3629_s17 = sand.u32 1, %s3164_s22  }
 0x14e   : > { %s2458_s27 = sshll.u32 %s3629_s17, 3  ;;  %s490_s29 = scalar_lea.sflag [#allocation4], %s3629_s17 }
 0x14f   : > { %s493_s19 = scalar_lea.vmem [#allocation3], %s2458_s27 }
 0x150   : > { %3127 = dma.done.wait (%p3575_p7), %s490_s29, 128  }
 0x151   : > { %3129 = vsyncadd (%p3575_p7), %s490_s29, 4294967168  ;;  %s4839_s25 = sld [smem:[#allocation32_spill]] }
 0x157   : > { %p4840_p6 = scmp.eq.s32.totalorder %s4839_s25, 0 }
 0x159   : > { %3131 = dma.done.wait (%p4840_p6), [#allocation7], 1536   ;;  %p4841_p10 = pmov %p4840_p6 }
 0x15a   : > { %p4842_p11 = pmov %p4840_p6 }
 0x15b   : > { %3133 = vsyncadd (%p4841_p10), [#allocation7], 4294965760 }
 0x15c   : > { %3135 = dma.done.wait (%p4842_p11), [#allocation10], 832   ;;  %p4843_p8 = pmov %p4840_p6 }
 0x15d   : > { %p4844_p5 = pmov %p4840_p6 }
 0x15e   : > { %3137 = vsyncadd (%p4843_p8), [#allocation10], 4294966464 }
 0x15f   : > { %3139 = dma.done.wait (%p4844_p5), [#allocation13], 768   ;;  %p4845_p9 = pmov %p4844_p5 }
 0x160   : > { %p4846_p7 = pmov %p4844_p5 }
 0x161   : > { %3141 = vsyncadd (%p4845_p9), [#allocation13], 4294966528 }
 0x162   : > { %3143 = dma.done.wait (%p4846_p7), [#allocation16], 384   ;;  %p4847_p4 = pmov %p4844_p5 }
 0x164   : > { %3145 = vsyncadd (%p4847_p4), [#allocation16], 4294966912  ;;  %p4848_p12 = pmov %p4847_p4 }
 0x165   : > { %p4849_p13 = pmov %p4847_p4 }
 0x166   : > { %3147 = dma.done.wait (%p4848_p12), [#allocation19], 192  }
 0x167   : > { %3149 = vsyncadd (%p4849_p13), [#allocation19], 4294967104  ;;  %p4850_p1 = pmov %p4847_p4 }
 0x169   : > { %3151 = dma.done.wait (%p4850_p1), [#allocation22], 128   ;;  %p4851_p3 = pmov %p4850_p1 }
 0x16a   : > { %v4800_v0 = vmov 0   ;;  %v3664_v1 = vld [vmem:[%s493_s19] sm:$0xff]  ;;  %vm644_vm0 = vcmask 1043456   ;;  %v2734_v5 = vld [vmem:[#allocation11] sm:$0xff]   ;;  %vm634_vm1 = vcmask 64512   ;;  %v2735_v13 = vld [vmem:[#allocation11 + $0x8] sm:$0xff]   ;;  %v720_v57 = vlaneseq }
 0x16b   : > { %3153 = vsyncadd (%p4851_p3), [#allocation22], 4294967168  ;;  %683 = vmatprep.mubr.bf16.mxu0 %v4800_v0  ;;  %2690 = vset.pattern.permute.xlu0 %v4800_v0  ;;  %4852 = vst [vmem:[#allocation34_spill] sm:$0xff] %v3664_v1  ;;  %v2475_v2 = vcombine.high %v3664_v1, %v3664_v1  ;;  %v2474_v3 = vcombine.low %v3664_v1, %v3664_v1  ;;  %v587_v6 = vld [vmem:[#allocation12 + $0x8] sm:$0xff]  ;;  %v589_v7 = vld [vmem:[#allocation12 + $0x18] sm:$0xff]  ;;  %v4802_v8 = vunpack.c.l.bf16 %v3664_v1  ;;  %v4801_v9 = vunpack.c.h.bf16 %v3664_v1  ;;  %s4780_s3 = smov 17  }
 0x16c   : > { %2691 = vset.pattern.permute.xlu1 %v4800_v0  ;;  %598 = vperm.xlu0 %2690, %v587_v6   ;;  %v588_v10 = vld [vmem:[#allocation12 + $0x10] sm:$0xff]  ;;  %v590_v11 = vld [vmem:[#allocation12 + $0x20] sm:$0xff]  ;;  %v2736_v14 = vld [vmem:[#allocation11 + $0x10] ss:$0 sps:$4 sm:$0xff]   ;;  %s3194_s20 = smov 15   ;;  %s4816_s14 = smov 16  }
 0x16d   : > { %2476 = vmatprep.subr.msk.bf16.mxu0 %vm644_vm0, %v2475_v2  ;;  %v646_v4 = vsel %vm644_vm0, %v2474_v3, 0  ;;  %608 = vperm.xlu1 %2691, %v589_v7   ;;  %v3680_v12 = vpack.i.bf16 %v4801_v9, %v4802_v8  ;;  %s4788_s15 = smov 1   ;;  %s4772_s12 = smov 127   ;;  %v3780_v37 = vld [vmem:[#allocation14] sm:$0xff]  ;;  %vm984_vm2 = vcmask 130048   ;;  %v730_v61 = vshrl.u32 %v720_v57, 7 }
 0x16e   : > { %652 = vmatpush1.bf16.msra.mxu0 %v646_v4  ;;  %s4790_s16 = smov 113   ;;  %s4786_s0 = smov 112   ;;  %v2481_v38 = vcombine.high %v3780_v37, %v3780_v37  ;;  %v3910_v63 = vand.u32 127, %v720_v57  ;;  %v727_v3 = vld [vmem:[#allocation6] ss:$8 sm:$0x3] }
 0x16f   : > { %s4774_s18 = smov 111   ;;  %s4776_s27 = smov 34   ;;  %v3914_v4 = vsub.s32 1, %v730_v61  ;;  %v759_v7 = vld [vmem:[#allocation6 + $0x1] ss:$8 sm:$0x3] }
 0x170   : > { %603 = vperm.xlu0 %2690, %v588_v10   ;;  %2482 = vmatprep.mubr.msk.bf16.mxu1 %vm984_vm2, %v2481_v38  ;;  %s3202_s29 = smov 33   ;;  %s3203_s19 = smov 32   ;;  %vm722_vm3 = vcmp.lt.s32.totalorder %v3910_v63, 17  ;;  %vm753_vm4 = vcmp.lt.s32.totalorder %v3910_v63, 16  ;;  %vm785_vm5 = vcmp.lt.s32.totalorder %v3910_v63, 15  ;;  %vm817_vm6 = vcmp.lt.s32.totalorder %v3910_v63, 1 }
 0x171   : > { %2477 = vmatmul.mubr.msk.bf16.vlgmr.msra.gmra.mrb[0].mxu0 %vm634_vm1, %v2734_v5  ;;  %613 = vperm.xlu1 %2691, %v590_v11   ;;  %v3916_v5 = vsub.s32 0, %v730_v61  ;;  %v736_v10 = vrot.slane %v727_v3, %v3914_v4  ;;  %vm851_vm7 = vcmp.lt.s32.totalorder %v3910_v63, 127  ;;  %vm883_vm8 = vcmp.lt.s32.totalorder %v3910_v63, 113  ;;  %v1076_v8 = vld [vmem:[#allocation8 + $0x1] ss:$8 sm:$0x3] }
 0x172   : > { %693 = vmatprep.mubr.bf16.mxu0 %v4800_v0  ;;  %vm915_vm9 = vcmp.lt.s32.totalorder %v3910_v63, 112  ;;  %vm947_vm10 = vcmp.lt.s32.totalorder %v3910_v63, 111  ;;  %vm1037_vm11 = vcmp.lt.s32.totalorder %v3910_v63, 34  ;;  %vm1070_vm12 = vcmp.lt.s32.totalorder %v3910_v63, 33  ;;  %p4898_p0 = scmp.ne.s32.totalorder %s4833_s30, 0 }
 0x173   : > { %vm1104_vm13 = vcmp.lt.s32.totalorder %v3910_v63, 32  ;;  %vm1138_vm14 = vcmp.lt.s32.totalorder %v3910_v63, 31  ;;  %vm1172_vm15 = vcmp.lt.s32.totalorder %v3910_v63, 30 }
 0x174   : > { %2693 = vrot.lane.b32.xlu0 %v3680_v12, %s4780_s3 }
 0x175   : > { %2698 = vrot.lane.b32.xlu1 %v3680_v12, %s4816_s14 }
 0x178   : > { %2703 = vrot.lane.b32.xlu0 %v3680_v12, %s3194_s20 }
 0x179   : > { %2478 = vmatmul.mubr.msk.bf16.gmra.mrb[4].mxu0 %vm634_vm1, %v2735_v13  ;;  %2708 = vrot.lane.b32.xlu1 %v3680_v12, %s4788_s15 }
 0x17a   : > { %703 = vmatprep.mubr.bf16.mxu0 %v4800_v0 }
 0x181   : > { %2479 = vmatmul.mubr.msk.bf16.gmra.mrb[8].mxu0 %vm634_vm1, %v2736_v14  ;;  %v732_v14 = vrot.slane %v727_v3, %v3916_v5 }
 0x1eb   : > { %v599_v17 = vpop.permute.xlu0 %598 }
 0x1ec   : > { %v3771_v35 = vpop.permute.xlu1 %608 }
 0x1ef   : > { %v604_v21 = vpop.permute.xlu0 %603 }
 0x1f0   : > { %v3786_v39 = vpop.permute.xlu1 %613 }
 0x1f3   : > { %v3830_v41 = vpop.permute.xlu0 %2693 }
 0x1f4   : > { %v3840_v43 = vpop.permute.xlu1 %2698 }
 0x1f5   : > { %4856 = vst [vmem:[#allocation38_spill] sm:$0xff] %v3840_v43 }
 0x1f7   : > { %v3838_v42 = vpop.permute.xlu0 %2703 }
 0x1f8   : > { %4855 = vst [vmem:[#allocation37_spill] sm:$0xff] %v3838_v42  ;;  %v3848_v45 = vpop.permute.xlu1 %2708 }
 0x1f9   : > { %4857 = vst [vmem:[#allocation39_spill] sm:$0xff] %v3848_v45  ;;  %v1081_v45 = vrot.slane %v1076_v8, %v3916_v5 }
 0x244   : > { %v3693_v15 = vpop.f32.mrb[0].mxu0 }
 0x245   : > { %4853 = vst [vmem:[#allocation35_spill] sm:$0xff] %v3693_v15  ;;  %v3695_v16 = vpop.f32.mrb[1].mxu0 }
 0x246   : > { %4854 = vst [vmem:[#allocation36_spill] sm:$0xff] %v3695_v16  ;;  %v689_v18 = vpop.f32.mrb[2].mxu0  ;;  %v972_v16 = vld [vmem:[#allocation15] sm:$0xff] }
 0x247   : > { %v3697_v19 = vadd.f32 %v689_v18, %v599_v17  ;;  %v691_v20 = vpop.f32.mrb[3].mxu0 }
 0x248   : > { %v3705_v25 = vadd.f32 %v691_v20, %v599_v17  ;;  %v764_v20 = vrot.slane %v759_v7, %v3916_v5 }
 0x249   : > { %712 = vrot.lane.b32.xlu0 %v3697_v19, %s4780_s3 }
 0x24c   : > { %v695_v22 = vpop.f32.mrb[4].mxu0 }
 0x24d   : > { %v3701_v23 = vadd.f32 %v695_v22, %v604_v21  ;;  %v697_v24 = vpop.f32.mrb[5].mxu0  ;;  %745 = vrot.lane.b32.xlu0 %v3697_v19, %s4816_s14 }
 0x24e   : > { %v3707_v26 = vadd.f32 %v697_v24, %v604_v21  ;;  %v699_v27 = vpop.f32.mrb[6].mxu0  ;;  %v768_v21 = vrot.slane %v759_v7, %v3914_v4  ;;  %v791_v24 = vld [vmem:[#allocation6 + $0x2] ss:$8 sm:$0x3] }
 0x24f   : > { %v3709_v28 = vpop.f32.mrb[7].mxu0  ;;  %714 = vrot.lane.b32.xlu1 %v3701_v23, %s4780_s3  ;;  %v841_v29 = vpack.c.bf16 %v3701_v23, %v3697_v19  ;;  %v3776_v36 = vadd.f32 %v699_v27, %v3771_v35  ;;  %v800_v61 = vrot.slane %v791_v24, %v3914_v4 }
 0x250   : > { %v842_v30 = vpack.c.bf16 %v3707_v26, %v3705_v25  ;;  %v3900_v59 = vadd.f32 %v3709_v28, %v3771_v35 }
 0x251   : > { %777 = vrot.lane.b32.xlu0 %v3697_v19, %s3194_s20 }
 0x253   : > { %747 = vrot.lane.b32.xlu1 %v3701_v23, %s4816_s14 }
 0x254   : > { %v705_v31 = vpop.f32.mrb[8].mxu0 }
 0x255   : > { %v3721_v32 = vpop.f32.mrb[9].mxu0  ;;  %809 = vrot.lane.b32.xlu0 %v3697_v19, %s4788_s15  ;;  %v3792_v40 = vadd.f32 %v705_v31, %v3786_v39 }
 0x256   : > { %v709_v33 = vpop.f32.mrb[10].mxu0  ;;  %v3933_v18 = vadd.f32 %v3721_v32, %v3786_v39 }
 0x257   : > { %779 = vrot.lane.b32.xlu1 %v3701_v23, %s3194_s20  ;;  %v710_v34 = vpop.f32.mrb[11].mxu0 }
 0x259   : > { %843 = vrot.lane.b32.xlu0 %v3697_v19, %s4772_s12 }
 0x25b   : > { %811 = vrot.lane.b32.xlu1 %v3701_v23, %s4788_s15 }
 0x25d   : > { %875 = vrot.lane.b32.xlu0 %v3697_v19, %s4790_s16 }
 0x25f   : > { %845 = vrot.lane.b32.xlu1 %v3701_v23, %s4772_s12 }
 0x261   : > { %907 = vrot.lane.b32.xlu0 %v3697_v19, %s4786_s0 }
 0x263   : > { %877 = vrot.lane.b32.xlu1 %v3701_v23, %s4790_s16 }
 0x265   : > { %939 = vrot.lane.b32.xlu0 %v3697_v19, %s4774_s18 }
 0x267   : > { %909 = vrot.lane.b32.xlu1 %v3701_v23, %s4786_s0 }
 0x269   : > { %716 = vrot.lane.b32.xlu0 %v3705_v25, %s4780_s3 }
 0x26b   : > { %941 = vrot.lane.b32.xlu1 %v3701_v23, %s4774_s18 }
 0x26d   : > { %749 = vrot.lane.b32.xlu0 %v3705_v25, %s4816_s14 }
 0x26f   : > { %718 = vrot.lane.b32.xlu1 %v3707_v26, %s4780_s3 }
 0x271   : > { %781 = vrot.lane.b32.xlu0 %v3705_v25, %s3194_s20 }
 0x273   : > { %751 = vrot.lane.b32.xlu1 %v3707_v26, %s4816_s14 }
 0x275   : > { %813 = vrot.lane.b32.xlu0 %v3705_v25, %s4788_s15 }
 0x277   : > { %783 = vrot.lane.b32.xlu1 %v3707_v26, %s3194_s20 }
 0x279   : > { %847 = vrot.lane.b32.xlu0 %v3705_v25, %s4772_s12 }
 0x27b   : > { %815 = vrot.lane.b32.xlu1 %v3707_v26, %s4788_s15 }
 0x27d   : > { %879 = vrot.lane.b32.xlu0 %v3705_v25, %s4790_s16 }
 0x27f   : > { %849 = vrot.lane.b32.xlu1 %v3707_v26, %s4772_s12  ;;  %s4778_s12 = smov 31  }
 0x281   : > { %911 = vrot.lane.b32.xlu0 %v3705_v25, %s4786_s0 }
 0x283   : > { %881 = vrot.lane.b32.xlu1 %v3707_v26, %s4790_s16 }
 0x285   : > { %943 = vrot.lane.b32.xlu0 %v3705_v25, %s4774_s18 }
 0x287   : > { %913 = vrot.lane.b32.xlu1 %v3707_v26, %s4786_s0 }
 0x289   : > { %1029 = vrot.lane.b32.xlu0 %v3776_v36, %s4776_s27 }
 0x28b   : > { %945 = vrot.lane.b32.xlu1 %v3707_v26, %s4774_s18  ;;  %s3205_s18 = smov 30  }
 0x28d   : > { %1062 = vrot.lane.b32.xlu0 %v3776_v36, %s3202_s29 }
 0x28f   : > { %1031 = vrot.lane.b32.xlu1 %v3792_v40, %s4776_s27  ;;  %s3206_s27 = smov 18  }
 0x291   : > { %1096 = vrot.lane.b32.xlu0 %v3776_v36, %s3203_s19 }
 0x293   : > { %1064 = vrot.lane.b32.xlu1 %v3792_v40, %s3202_s29 }
 0x295   : > { %1130 = vrot.lane.b32.xlu0 %v3776_v36, %s4778_s12 }
 0x297   : > { %1098 = vrot.lane.b32.xlu1 %v3792_v40, %s3203_s19 }
 0x299   : > { %1164 = vrot.lane.b32.xlu0 %v3776_v36, %s3205_s18 }
 0x29b   : > { %1132 = vrot.lane.b32.xlu1 %v3792_v40, %s4778_s12  ;;  %s4782_s12 = smov 14  }
 0x29d   : > { %1198 = vrot.lane.b32.xlu0 %v3776_v36, %s3206_s27 }
 0x29f   : > { %1166 = vrot.lane.b32.xlu1 %v3792_v40, %s3205_s18 }
 0x2a1   : > { %1232 = vrot.lane.b32.xlu0 %v3776_v36, %s4780_s3 }
 0x2a3   : > { %1200 = vrot.lane.b32.xlu1 %v3792_v40, %s3206_s27 }
 0x2a5   : > { %1265 = vrot.lane.b32.xlu0 %v3776_v36, %s4816_s14 }
 0x2a7   : > { %1234 = vrot.lane.b32.xlu1 %v3792_v40, %s4780_s3  ;;  %s4784_s3 = smov 2  }
 0x2a9   : > { %1298 = vrot.lane.b32.xlu0 %v3776_v36, %s3194_s20 }
 0x2ab   : > { %1267 = vrot.lane.b32.xlu1 %v3792_v40, %s4816_s14 }
 0x2ad   : > { %1331 = vrot.lane.b32.xlu0 %v3776_v36, %s4782_s12 }
 0x2af   : > { %1300 = vrot.lane.b32.xlu1 %v3792_v40, %s3194_s20 }
 0x2b1   : > { %1537 = vrot.lane.b32.xlu0 %v3776_v36, %s4790_s16 }
 0x2b3   : > { %1333 = vrot.lane.b32.xlu1 %v3792_v40, %s4782_s12  ;;  %s4858_s12 = smov 111  }
 0x2b5   : > { %1365 = vrot.lane.b32.xlu0 %v3776_v36, %s4784_s3 }
 0x2b7   : > { %1539 = vrot.lane.b32.xlu1 %v3792_v40, %s4790_s16  ;;  %s4796_s16 = smov 126  }
 0x2b9   : > { %1570 = vrot.lane.b32.xlu0 %v3776_v36, %s4786_s0 }
 0x2bb   : > { %1367 = vrot.lane.b32.xlu1 %v3792_v40, %s4784_s3  ;;  %v713_v44 = vpop.permute.xlu0 %712  ;;  %s4792_s3 = smov 110  }
 0x2bd   : > { %1399 = vrot.lane.b32.xlu0 %v3776_v36, %s4788_s15 }
 0x2bf   : > { %1572 = vrot.lane.b32.xlu1 %v3792_v40, %s4786_s0  ;;  %v3854_v46 = vpop.permute.xlu0 %745  ;;  %s4859_s0 = smov 127  }
 0x2c1   : > { %v715_v47 = vpop.permute.xlu1 %714  ;;  %1603 = vrot.lane.b32.xlu0 %v3776_v36, %s4858_s12 }
 0x2c3   : > { %1401 = vrot.lane.b32.xlu1 %v3792_v40, %s4788_s15  ;;  %v3860_v48 = vpop.permute.xlu0 %777  ;;  %s4794_s15 = smov 98  }
 0x2c5   : > { %v3862_v49 = vpop.permute.xlu1 %747  ;;  %1636 = vrot.lane.b32.xlu0 %v3776_v36, %s4792_s3 }
 0x2c7   : > { %1605 = vrot.lane.b32.xlu1 %v3792_v40, %s4858_s12  ;;  %v3868_v50 = vpop.permute.xlu0 %809 }
 0x2c9   : > { %v3870_v51 = vpop.permute.xlu1 %779  ;;  %1436 = vrot.lane.b32.xlu0 %v3776_v36, %s4859_s0 }
 0x2cb   : > { %1638 = vrot.lane.b32.xlu1 %v3792_v40, %s4792_s3  ;;  %v3876_v52 = vpop.permute.xlu0 %843  ;;  %s3212_s3 = smov 97  }
 0x2cd   : > { %v3878_v53 = vpop.permute.xlu1 %811  ;;  %1670 = vrot.lane.b32.xlu0 %v3776_v36, %s4794_s15 }
 0x2cf   : > { %1438 = vrot.lane.b32.xlu1 %v3792_v40, %s4859_s0  ;;  %v3884_v54 = vpop.permute.xlu0 %875 }
 0x2d1   : > { %v3886_v55 = vpop.permute.xlu1 %845  ;;  %1469 = vrot.lane.b32.xlu0 %v3776_v36, %s4796_s16 }
 0x2d3   : > { %1672 = vrot.lane.b32.xlu1 %v3792_v40, %s4794_s15  ;;  %v3892_v56 = vpop.permute.xlu0 %907  ;;  %s4860_s15 = smov 34  }
 0x2d5   : > { %v3894_v58 = vpop.permute.xlu1 %877  ;;  %1704 = vrot.lane.b32.xlu0 %v3776_v36, %s3212_s3 }
 0x2d7   : > { %1471 = vrot.lane.b32.xlu1 %v3792_v40, %s4796_s16  ;;  %v3904_v60 = vpop.permute.xlu0 %939  ;;  %s4798_s16 = smov 114  }
 0x2d9   : > { %v3906_v62 = vpop.permute.xlu1 %909  ;;  %1033 = vrot.lane.b32.xlu0 %v3900_v59, %s4860_s15 }
 0x2db   : > { %1706 = vrot.lane.b32.xlu1 %v3792_v40, %s3212_s3  ;;  %v717_v2 = vpop.permute.xlu0 %716 }
 0x2dc   : > { %v723_v13 = vsel %vm722_vm3, %v713_v44, %v717_v2  ;;  %v725_v17 = vsel %vm722_vm3, %v717_v2, %v713_v44  ;;  %v796_v44 = vrot.slane %v791_v24, %v3916_v5 }
 0x2dd   : > { %v3918_v6 = vpop.permute.xlu1 %941  ;;  %1066 = vrot.lane.b32.xlu0 %v3900_v59, %s3202_s29  ;;  %v740_v32 = vmul.f32 %v736_v10, %v723_v13  ;;  %v739_v38 = vmul.f32 %v732_v14, %v725_v17  ;;  %v823_v13 = vld [vmem:[#allocation6 + $0x3] ss:$8 sm:$0x3] }
 0x2df   : > { %1505 = vrot.lane.b32.xlu1 %v3792_v40, %s4798_s16  ;;  %v750_v11 = vpop.permute.xlu0 %749  ;;  %s4861_s16 = smov 31  }
 0x2e0   : > { %v756_v27 = vsel %vm753_vm4, %v750_v11, %v3854_v46  ;;  %v754_v33 = vsel %vm753_vm4, %v3854_v46, %v750_v11 }
 0x2e1   : > { %v719_v22 = vpop.permute.xlu1 %718  ;;  %1100 = vrot.lane.b32.xlu0 %v3900_v59, %s3203_s19  ;;  %v771_v57 = vmul.f32 %v764_v20, %v756_v27  ;;  %v772_v3 = vmul.f32 %v768_v21, %v754_v33  ;;  %v828_v27 = vrot.slane %v823_v13, %v3916_v5 }
 0x2e2   : > { %v726_v28 = vsel %vm722_vm3, %v719_v22, %v715_v47  ;;  %v724_v31 = vsel %vm722_vm3, %v715_v47, %v719_v22 }
 0x2e3   : > { %1035 = vrot.lane.b32.xlu1 %v3933_v18, %s4860_s15  ;;  %v782_v34 = vpop.permute.xlu0 %781  ;;  %v742_v35 = vmul.f32 %v736_v10, %v724_v31  ;;  %v741_v39 = vmul.f32 %v732_v14, %v726_v28  ;;  %v832_v28 = vrot.slane %v823_v13, %v3914_v4  ;;  %s4862_s15 = smov 17  }
 0x2e4   : > { %v786_v7 = vsel %vm785_vm5, %v3860_v48, %v782_v34  ;;  %v788_v14 = vsel %vm785_vm5, %v782_v34, %v3860_v48 }
 0x2e5   : > { %v752_v47 = vpop.permute.xlu1 %751  ;;  %1134 = vrot.lane.b32.xlu0 %v3900_v59, %s4861_s16  ;;  %v744_v2 = vpack.c.bf16 %v742_v35, %v740_v32  ;;  %v743_v46 = vpack.c.bf16 %v741_v39, %v739_v38 }
 0x2e6   : > { %v755_v10 = vsel %vm753_vm4, %v3862_v49, %v752_v47  ;;  %v757_v11 = vsel %vm753_vm4, %v752_v47, %v3862_v49 }
 0x2e7   : > { %v773_v17 = vmul.f32 %v764_v20, %v757_v11  ;;  %v774_v22 = vmul.f32 %v768_v21, %v755_v10  ;;  %1068 = vrot.lane.b32.xlu1 %v3933_v18, %s3202_s29  ;;  %988 = vmatprep.subr.bf16.mxu1 %v744_v2  ;;  %v814_v24 = vpop.permute.xlu0 %813  ;;  %v803_v20 = vmul.f32 %v796_v44, %v788_v14  ;;  %s4867_s29 = smov 1  }
 0x2e8   : > { %989 = vmatpush1.bf16.msra.mxu1 %v743_v46  ;;  %v804_v21 = vmul.f32 %v800_v61, %v786_v7  ;;  %v820_v34 = vsel %vm817_vm6, %v814_v24, %v3868_v50 }
 0x2e9   : > { %v784_v49 = vpop.permute.xlu1 %783  ;;  %1168 = vrot.lane.b32.xlu0 %v3900_v59, %s3205_s18  ;;  %v776_v31 = vpack.c.bf16 %v774_v22, %v772_v3  ;;  %v775_v48 = vpack.c.bf16 %v773_v17, %v771_v57  ;;  %v818_v57 = vsel %vm817_vm6, %v3868_v50, %v814_v24  ;;  %v835_v46 = vmul.f32 %v828_v27, %v820_v34  ;;  %v857_v3 = vld [vmem:[#allocation6 + $0x5] ss:$8 sm:$0x3]  ;;  %v889_v24 = vld [vmem:[#allocation6 + $0x6] ss:$8 sm:$0x3] }
 0x2ea   : > { %v787_v32 = vsel %vm785_vm5, %v3870_v51, %v784_v49  ;;  %v789_v33 = vsel %vm785_vm5, %v784_v49, %v3870_v51  ;;  %v836_v7 = vmul.f32 %v832_v28, %v818_v57  ;;  %v866_v13 = vrot.slane %v857_v3, %v3914_v4 }
 0x2eb   : > { %v805_v35 = vmul.f32 %v796_v44, %v789_v33  ;;  %v806_v38 = vmul.f32 %v800_v61, %v787_v32  ;;  %1102 = vrot.lane.b32.xlu1 %v3933_v18, %s3203_s19  ;;  %990 = vmatprep.subr.bf16.mxu1 %v776_v31  ;;  %v848_v39 = vpop.permute.xlu0 %847  ;;  %v898_v32 = vrot.slane %v889_v24, %v3914_v4  ;;  %s4868_s19 = smov 110  }
 0x2ec   : > { %991 = vmatpush1.bf16.msra.mxu1 %v775_v48  ;;  %v862_v48 = vrot.slane %v857_v3, %v3916_v5  ;;  %v894_v57 = vrot.slane %v889_v24, %v3916_v5 }
 0x2ed   : > { %v816_v47 = vpop.permute.xlu1 %815  ;;  %1202 = vrot.lane.b32.xlu0 %v3900_v59, %s3206_s27  ;;  %v808_v51 = vpack.c.bf16 %v806_v38, %v804_v21  ;;  %v807_v2 = vpack.c.bf16 %v805_v35, %v803_v20  ;;  %v852_v20 = vsel %vm851_vm7, %v3876_v52, %v848_v39  ;;  %v921_v35 = vld [vmem:[#allocation6 + $0x7] ss:$8 sm:$0x3] }
 0x2ee   : > { %v819_v44 = vsel %vm817_vm6, %v3878_v53, %v816_v47  ;;  %v821_v61 = vsel %vm817_vm6, %v816_v47, %v3878_v53  ;;  %v854_v53 = vsel %vm851_vm7, %v848_v39, %v3876_v52 }
 0x2ef   : > { %v837_v50 = vmul.f32 %v828_v27, %v821_v61  ;;  %v838_v10 = vmul.f32 %v832_v28, %v819_v44  ;;  %1136 = vrot.lane.b32.xlu1 %v3933_v18, %s4861_s16  ;;  %992 = vmatprep.subr.bf16.mxu1 %v808_v51  ;;  %v880_v11 = vpop.permute.xlu0 %879  ;;  %v870_v21 = vmul.f32 %v866_v13, %v854_v53  ;;  %v953_v44 = vld [vmem:[#allocation6 + $0x10] ss:$8 sm:$0x3]  ;;  %s4863_s16 = smov 14  }
 0x2f0   : > { %993 = vmatpush1.bf16.msra.mxu1 %v807_v2  ;;  %v884_v47 = vsel %vm883_vm8, %v3884_v54, %v880_v11 }
 0x2f1   : > { %v850_v14 = vpop.permute.xlu1 %849  ;;  %1236 = vrot.lane.b32.xlu0 %v3900_v59, %s4862_s15  ;;  %v840_v17 = vpack.c.bf16 %v838_v10, %v836_v7  ;;  %v839_v22 = vpack.c.bf16 %v837_v50, %v835_v46  ;;  %v901_v50 = vmul.f32 %v894_v57, %v884_v47  ;;  %v926_v10 = vrot.slane %v921_v35, %v3916_v5 }
 0x2f2   : > { %v855_v27 = vsel %vm851_vm7, %v850_v14, %v3886_v55  ;;  %v853_v28 = vsel %vm851_vm7, %v3886_v55, %v850_v14  ;;  %v886_v55 = vsel %vm883_vm8, %v880_v11, %v3884_v54  ;;  %v962_v14 = vrot.slane %v953_v44, %v3914_v4 }
 0x2f3   : > { %v872_v49 = vmul.f32 %v866_v13, %v855_v27  ;;  %1170 = vrot.lane.b32.xlu1 %v3933_v18, %s3205_s18  ;;  %994 = vmatprep.subr.bf16.mxu1 %v840_v17  ;;  %v912_v31 = vpop.permute.xlu0 %911  ;;  %v871_v34 = vmul.f32 %v862_v48, %v853_v28  ;;  %v902_v51 = vmul.f32 %v898_v32, %v886_v55  ;;  %s4864_s18 = smov 113  }
 0x2f4   : > { %995 = vmatpush1.bf16.msra.mxu1 %v839_v22  ;;  %v918_v46 = vsel %vm915_vm9, %v912_v31, %v3892_v56  ;;  %v916_v11 = vsel %vm915_vm9, %v3892_v56, %v912_v31 }
 0x2f5   : > { %v882_v33 = vpop.permute.xlu1 %881  ;;  %1269 = vrot.lane.b32.xlu0 %v3900_v59, %s4816_s14  ;;  %996 = vmatprep.subr.bf16.mxu1 %v842_v30  ;;  %v874_v26 = vpack.c.bf16 %v872_v49, %v870_v21  ;;  %v869_v30 = vmul.f32 %v862_v48, %v852_v20  ;;  %v933_v31 = vmul.f32 %v926_v10, %v916_v11 }
 0x2f6   : > { %v887_v52 = vsel %vm883_vm8, %v882_v33, %v3894_v58  ;;  %v885_v38 = vsel %vm883_vm8, %v3894_v58, %v882_v33  ;;  %v930_v58 = vrot.slane %v921_v35, %v3914_v4  ;;  %v958_v48 = vrot.slane %v953_v44, %v3916_v5 }
 0x2f7   : > { %v904_v39 = vmul.f32 %v898_v32, %v887_v52  ;;  %1204 = vrot.lane.b32.xlu1 %v3933_v18, %s3206_s27  ;;  %v944_v25 = vpop.permute.xlu0 %943  ;;  %v903_v3 = vmul.f32 %v894_v57, %v885_v38  ;;  %v873_v23 = vpack.c.bf16 %v871_v34, %v869_v30  ;;  %s4865_s27 = smov 2  }
 0x2f8   : > { %997 = vmatpush1.bf16.msra.mxu1 %v841_v29  ;;  %v934_v13 = vmul.f32 %v930_v58, %v918_v46  ;;  %v948_v20 = vsel %vm947_vm10, %v3904_v60, %v944_v25 }
 0x2f9   : > { %v914_v2 = vpop.permute.xlu1 %913  ;;  %1302 = vrot.lane.b32.xlu0 %v3900_v59, %s3194_s20  ;;  %998 = vmatprep.subr.bf16.mxu1 %v874_v26  ;;  %v906_v7 = vpack.c.bf16 %v904_v39, %v902_v51  ;;  %v905_v24 = vpack.c.bf16 %v903_v3, %v901_v50  ;;  %v965_v35 = vmul.f32 %v958_v48, %v948_v20 }
 0x2fa   : > { %v919_v19 = vsel %vm915_vm9, %v914_v2, %v3906_v62  ;;  %v917_v29 = vsel %vm915_vm9, %v3906_v62, %v914_v2  ;;  %v950_v62 = vsel %vm947_vm10, %v944_v25, %v3904_v60  ;;  %v2480_v39 = vcombine.low %v3780_v37, %v3780_v37 }
 0x2fb   : > { %v936_v54 = vmul.f32 %v930_v58, %v919_v19  ;;  %1238 = vrot.lane.b32.xlu1 %v3933_v18, %s4862_s15  ;;  %v4060_v61 = vpop.permute.xlu0 %1029  ;;  %v935_v22 = vmul.f32 %v926_v10, %v917_v29  ;;  %v966_v21 = vmul.f32 %v962_v14, %v950_v62  ;;  %s4869_s15 = smov 98   ;;  %v4176_v10 = vld [vmem:[#allocation17] sm:$0xff] }
 0x2fc   : > { %999 = vmatpush1.bf16.msra.mxu1 %v873_v23  ;;  %4872 = vst [vmem:[#allocation40_spill] sm:$0xff] %v4176_v10 }
 0x2fd   : > { %v946_v17 = vpop.permute.xlu1 %945  ;;  %1335 = vrot.lane.b32.xlu0 %v3900_v59, %s4863_s16  ;;  %1000 = vmatprep.subr.bf16.mxu1 %v906_v7  ;;  %v938_v49 = vpack.c.bf16 %v936_v54, %v934_v13  ;;  %v937_v33 = vpack.c.bf16 %v935_v22, %v933_v31  ;;  %v2484_v13 = vcombine.high %v4176_v10, %v4176_v10 }
 0x2fe   : > { %v951_v53 = vsel %vm947_vm10, %v946_v17, %v3918_v6  ;;  %v949_v56 = vsel %vm947_vm10, %v3918_v6, %v946_v17 }
 0x2ff   : > { %v968_v27 = vmul.f32 %v962_v14, %v951_v53  ;;  %1271 = vrot.lane.b32.xlu1 %v3933_v18, %s4816_s14  ;;  %v4080_v28 = vpop.permute.xlu0 %1062  ;;  %v967_v6 = vmul.f32 %v958_v48, %v949_v56  ;;  %1946 = vmatprep.mubr.bf16.mxu0 %v2484_v13  ;;  %v1042_v13 = vld [vmem:[#allocation8] ss:$8 sm:$0x3] }
 0x300   : > { %1001 = vmatpush1.bf16.msra.mxu1 %v905_v24  ;;  %v1051_v15 = vrot.slane %v1042_v13, %v3914_v4 }
 0x301   : > { %v4086_v32 = vpop.permute.xlu1 %1031  ;;  %1541 = vrot.lane.b32.xlu0 %v3900_v59, %s4864_s18  ;;  %1002 = vmatprep.subr.bf16.mxu1 %v938_v49  ;;  %v970_v34 = vpack.c.bf16 %v968_v27, %v966_v21  ;;  %v969_v60 = vpack.c.bf16 %v967_v6, %v965_v35 }
 0x303   : > { %1304 = vrot.lane.b32.xlu1 %v3933_v18, %s3194_s20  ;;  %v4092_v55 = vpop.permute.xlu0 %1096  ;;  %s4866_s20 = smov 112  }
 0x304   : > { %1003 = vmatpush1.bf16.msra.mxu1 %v937_v33 }
 0x305   : > { %v4094_v52 = vpop.permute.xlu1 %1064  ;;  %1369 = vrot.lane.b32.xlu0 %v3900_v59, %s4865_s27  ;;  %1004 = vmatprep.subr.bf16.mxu1 %v970_v34  ;;  %v1841_v34 = vld [vmem:[#allocation17 + $0x8] sm:$0xff] }
 0x307   : > { %1337 = vrot.lane.b32.xlu1 %v3933_v18, %s4863_s16  ;;  %v4100_v38 = vpop.permute.xlu0 %1130  ;;  %s4870_s16 = smov 126  }
 0x308   : > { %1005 = vmatpush1.bf16.msra.mxu1 %v969_v60  ;;  %v2486_v60 = vcombine.high %v1841_v34, %v1841_v34 }
 0x309   : > { %v4104_v25 = vpop.permute.xlu1 %1098  ;;  %1574 = vrot.lane.b32.xlu0 %v3900_v59, %s4866_s20 }
 0x30b   : > { %1543 = vrot.lane.b32.xlu1 %v3933_v18, %s4864_s18  ;;  %v4110_v26 = vpop.permute.xlu0 %1164  ;;  %1021 = vmatmul.mubr.bf16.vlgmr.msra.gmra.mrb[0].mxu1 %v2480_v39  ;;  %v1892_v39 = vld [vmem:[#allocation18] sm:$0xff] }
 0x30c   : > { %2487 = vmatprep.mubr.msk.bf16.mxu1 %vm984_vm2, %v2486_v60  ;;  %vm1206_vm2 = vcmp.lt.s32.totalorder %v3910_v63, 18 }
 0x30d   : > { %v4112_v30 = vpop.permute.xlu1 %1132  ;;  %1403 = vrot.lane.b32.xlu0 %v3900_v59, %s4867_s29 }
 0x30f   : > { %1371 = vrot.lane.b32.xlu1 %v3933_v18, %s4865_s27  ;;  %v4118_v37 = vpop.permute.xlu0 %1198  ;;  %s4871_s27 = smov 114  }
 0x311   : > { %v4120_v57 = vpop.permute.xlu1 %1166  ;;  %1607 = vrot.lane.b32.xlu0 %v3900_v59, %s4858_s12 }
 0x313   : > { %1576 = vrot.lane.b32.xlu1 %v3933_v18, %s4866_s20  ;;  %v4126_v47 = vpop.permute.xlu0 %1232 }
 0x315   : > { %v4128_v51 = vpop.permute.xlu1 %1200  ;;  %1640 = vrot.lane.b32.xlu0 %v3900_v59, %s4868_s19 }
 0x317   : > { %1405 = vrot.lane.b32.xlu1 %v3933_v18, %s4867_s29  ;;  %v4134_v58 = vpop.permute.xlu0 %1265  ;;  %s3214_s29 = smov 96  }
 0x319   : > { %v4136_v2 = vpop.permute.xlu1 %1234  ;;  %1440 = vrot.lane.b32.xlu0 %v3900_v59, %s4859_s0 }
 0x31b   : > { %1609 = vrot.lane.b32.xlu1 %v3933_v18, %s4858_s12  ;;  %v4142_v46 = vpop.permute.xlu0 %1298 }
 0x31d   : > { %v4144_v3 = vpop.permute.xlu1 %1267  ;;  %1674 = vrot.lane.b32.xlu0 %v3900_v59, %s4869_s15 }
 0x31f   : > { %1642 = vrot.lane.b32.xlu1 %v3933_v18, %s4868_s19  ;;  %v4150_v44 = vpop.permute.xlu0 %1331  ;;  %s2496_s19 = sshll.u32 %s4839_s25, 10  ;;  %s2249_s25 = scalar_lea.sflag [#allocation5], %s3629_s17 }
 0x321   : > { %v4152_v19 = vpop.permute.xlu1 %1300  ;;  %1473 = vrot.lane.b32.xlu0 %v3900_v59, %s4870_s16 }
 0x323   : > { %1442 = vrot.lane.b32.xlu1 %v3933_v18, %s4859_s0  ;;  %v4158_v23 = vpop.permute.xlu0 %1537 }
 0x325   : > { %v4160_v29 = vpop.permute.xlu1 %1333  ;;  %1708 = vrot.lane.b32.xlu0 %v3900_v59, %s3212_s3 }
 0x327   : > { %1676 = vrot.lane.b32.xlu1 %v3933_v18, %s4869_s15  ;;  %v4166_v54 = vpop.permute.xlu0 %1365 }
 0x329   : > { %v4168_v7 = vpop.permute.xlu1 %1539  ;;  %1503 = vrot.lane.b32.xlu0 %v3776_v36, %s4871_s27 }
 0x32b   : > { %1475 = vrot.lane.b32.xlu1 %v3933_v18, %s4870_s16  ;;  %v4174_v50 = vpop.permute.xlu0 %1570 }
 0x32d   : > { %v4178_v11 = vpop.permute.xlu1 %1367  ;;  %1507 = vrot.lane.b32.xlu0 %v3900_v59, %s4871_s27 }
 0x32f   : > { %1710 = vrot.lane.b32.xlu1 %v3933_v18, %s3212_s3  ;;  %v4186_v14 = vpop.permute.xlu0 %1399  ;;  %s3215_s3 = smov 95  }
 0x331   : > { %v4188_v17 = vpop.permute.xlu1 %1572  ;;  %1738 = vrot.lane.b32.xlu0 %v3776_v36, %s3214_s29 }
 0x333   : > { %1509 = vrot.lane.b32.xlu1 %v3933_v18, %s4871_s27  ;;  %v4193_v62 = vpop.permute.xlu0 %1603  ;;  %s4897_s27 = sld [smem:[#allocation51_spill]] }
 0x335   : > { %v4195_v22 = vpop.permute.xlu1 %1401  ;;  %1742 = vrot.lane.b32.xlu0 %v3900_v59, %s3214_s29 }
 0x337   : > { %1740 = vrot.lane.b32.xlu1 %v3792_v40, %s3214_s29  ;;  %v4199_v53 = vpop.permute.xlu0 %1636 }
 0x339   : > { %v4201_v24 = vpop.permute.xlu1 %1605  ;;  %2713 = vrot.lane.b32.xlu0 %v3680_v12, %s4859_s0  ;;  %s3216_s0 = smov 94  }
 0x33b   : > { %1744 = vrot.lane.b32.xlu1 %v3933_v18, %s3214_s29  ;;  %v4206_v56 = vpop.permute.xlu0 %1436  ;;  %s4701_s29 = scalar_lea.hbm %s4897_s27, %s2496_s19 }
 0x33d   : > { %v4208_v27 = vpop.permute.xlu1 %1638  ;;  %1772 = vrot.lane.b32.xlu0 %v3776_v36, %s3215_s3 }
 0x33f   : > { %2718 = vrot.lane.b32.xlu1 %v3680_v12, %s4864_s18  ;;  %v4213_v49 = vpop.permute.xlu0 %1670 }
 0x340   : > { %4873 = vst [vmem:[#allocation41_spill] sm:$0xff] %v4213_v49 }
 0x341   : > { %v4215_v31 = vpop.permute.xlu1 %1438  ;;  %1776 = vrot.lane.b32.xlu0 %v3900_v59, %s3215_s3 }
 0x343   : > { %1774 = vrot.lane.b32.xlu1 %v3792_v40, %s3215_s3  ;;  %v4219_v48 = vpop.permute.xlu0 %1469 }
 0x344   : > { %4874 = vst [vmem:[#allocation42_spill] sm:$0xff] %v4219_v48 }
 0x345   : > { %v4221_v20 = vpop.permute.xlu1 %1672  ;;  %2723 = vrot.lane.b32.xlu0 %v3680_v12, %s4866_s20 }
 0x346   : > { %4875 = vst [vmem:[#allocation43_spill] sm:$0xff] %v4221_v20 }
 0x347   : > { %1778 = vrot.lane.b32.xlu1 %v3933_v18, %s3215_s3  ;;  %v4226_v21 = vpop.permute.xlu0 %1704 }
 0x348   : > { %4876 = vst [vmem:[#allocation44_spill] sm:$0xff] %v4226_v21 }
 0x349   : > { %v4228_v6 = vpop.permute.xlu1 %1471  ;;  %1806 = vrot.lane.b32.xlu0 %v3776_v36, %s3216_s0 }
 0x34a   : > { %4877 = vst [vmem:[#allocation45_spill] sm:$0xff] %v4228_v6 }
 0x34b   : > { %2728 = vrot.lane.b32.xlu1 %v3680_v12, %s4858_s12  ;;  %v1034_v33 = vpop.permute.xlu0 %1033  ;;  %v1047_v12 = vrot.slane %v1042_v13, %v3916_v5  ;;  %v1085_v13 = vrot.slane %v1076_v8, %v3914_v4  ;;  %s2470_s12 = sshll.u32 %s3629_s17, 6 }
 0x34c   : > { %v1040_v34 = vsel %vm1037_vm11, %v1034_v33, %v4060_v61  ;;  %v1038_v60 = vsel %vm1037_vm11, %v4060_v61, %v1034_v33  ;;  %s4686_s18 = scalar_lea.vmem [#allocation23], %s2470_s12 }
 0x34d   : > { %v4233_v35 = vpop.permute.xlu1 %1706  ;;  %1810 = vrot.lane.b32.xlu0 %v3900_v59, %s3216_s0  ;;  %v1055_v61 = vmul.f32 %v1051_v15, %v1038_v60  ;;  %s2262_s20 = sshll.u32 %s4686_s18, 4  ;;  %s4696_s20 = int_to_ptr.vmem [resolvable:$true] %s2262_s20 }
 0x34e   : > { %4878 = vst [vmem:[#allocation46_spill] sm:$0xff] %v4233_v35  ;;  %v1110_v35 = vld [vmem:[#allocation8 + $0x2] ss:$8 sm:$0x3]  ;;  %s3082_s3 = scalar_lea.vmem %s4696_s20, 1024 }
 0x34f   : > { %1808 = vrot.lane.b32.xlu1 %v3792_v40, %s3216_s0  ;;  %v1067_v0 = vpop.permute.xlu0 %1066  ;;  %v1115_v42 = vrot.slane %v1110_v35, %v3916_v5  ;;  %v1119_v49 = vrot.slane %v1110_v35, %v3914_v4  ;;  %p3083_p2 = scmp.ne.s32.totalorder %s4696_s20, %s3082_s3 }
 0x350   : > { %v1073_v33 = vsel %vm1070_vm12, %v1067_v0, %v4080_v28  ;;  %v1071_v8 = vsel %vm1070_vm12, %v4080_v28, %v1067_v0  ;;  %v1144_v28 = vld [vmem:[#allocation8 + $0x3] ss:$8 sm:$0x3] }
 0x351   : > { %v4239_v9 = vpop.permute.xlu1 %1505  ;;  %1895 = vperm.xlu0 %2690, %v1892_v39   ;;  %v586_v39 = vld [vmem:[#allocation12] sm:$0xff]  ;;  %v1088_v60 = vmul.f32 %v1081_v45, %v1073_v33  ;;  %v1089_v0 = vmul.f32 %v1085_v13, %v1071_v8  ;;  %p3084_p6 = pnand %p3083_p2, %p4898_p0 }
 0x352   : > { %4879 = vst [vmem:[#allocation47_spill] sm:$0xff] %v4239_v9  ;;  %v1054_v9 = vmul.f32 %v1047_v12, %v1040_v34  ;;  %v2184_v34 = vld [vmem:[#allocation21] sm:$0xff] }
 0x353   : > { %1812 = vrot.lane.b32.xlu1 %v3933_v18, %s3216_s0  ;;  %v1101_v10 = vpop.permute.xlu0 %1100  ;;  %p3085_p10 = pneg %p3084_p6  ;;  %s3217_s0 = smov [#allocation23]  }
 0x354   : > { %s3086_s12 = sshll.u32 %s3217_s0, 4  ;;  %s3087_s12 = int_to_ptr.vmem [resolvable:$false] %s3086_s12 }
 0x355   : > { %v1036_v1 = vpop.permute.xlu1 %1035  ;;  %975 = vperm.xlu0 %2690, %v972_v16   ;;  %s3088_s14 = scalar_lea.vmem %s3087_s12, 2048  ;;  %p3089_p11 = scmp.lt.s32.totalorder %s4696_s20, %s3087_s12 }
 0x356   : > { %v1039_v21 = vsel %vm1037_vm11, %v4086_v32, %v1036_v1  ;;  %v1041_v43 = vsel %vm1037_vm11, %v1036_v1, %v4086_v32  ;;  %vm1339_vm11 = vcmp.lt.s32.totalorder %v3910_v63, 14  ;;  %p3090_p8 = scmp.lt.s32.totalorder %s3088_s14, %s3082_s3 }
 0x357   : > { %v1056_v6 = vmul.f32 %v1047_v12, %v1041_v43  ;;  %v1057_v48 = vmul.f32 %v1051_v15, %v1039_v21  ;;  %593 = vperm.xlu1 %2691, %v586_v39   ;;  %v1135_v16 = vpop.permute.xlu0 %1134 }
 0x358   : > { %p3091_p5 = por %p3090_p8, %p3089_p11 }
 0x359   : > { %v1058_v20 = vpack.c.bf16 %v1056_v6, %v1054_v9  ;;  %v1069_v1 = vpop.permute.xlu1 %1068  ;;  %v1059_v32 = vpack.c.bf16 %v1057_v48, %v1055_v61  ;;  %v1105_v48 = vsel %vm1104_vm13, %v4092_v55, %v1101_v10  ;;  %v1107_v6 = vsel %vm1104_vm13, %v1101_v10, %v4092_v55  ;;  %v1178_v10 = vld [vmem:[#allocation8 + $0x4] ss:$8 sm:$0x3] }
 0x35a   : > { %v1072_v15 = vsel %vm1070_vm12, %v4094_v52, %v1069_v1  ;;  %v1074_v43 = vsel %vm1070_vm12, %v1069_v1, %v4094_v52  ;;  %v1122_v8 = vmul.f32 %v1115_v42, %v1107_v6  ;;  %v1123_v55 = vmul.f32 %v1119_v49, %v1105_v48  ;;  %p3092_p9 = pnand %p3091_p5, %p3085_p10 }
 0x35b   : > { %v1090_v21 = vmul.f32 %v1081_v45, %v1074_v43  ;;  %v1091_v12 = vmul.f32 %v1085_v13, %v1072_v15  ;;  %2187 = vperm.xlu1 %2691, %v2184_v34   ;;  %1914 = vmatprep.subr.bf16.mxu0 %v1059_v32  ;;  %v1169_v9 = vpop.permute.xlu0 %1168  ;;  %v1149_v45 = vrot.slane %v1144_v28, %v3916_v5  ;;  %vm1373_vm12 = vcmp.lt.s32.totalorder %v3910_v63, 2 }
 0x35c   : > { %1915 = vmatpush1.bf16.msra.mxu0 %v1058_v20  ;;  %v1153_v13 = vrot.slane %v1144_v28, %v3914_v4  ;;  %v1139_v32 = vsel %vm1138_vm14, %v4100_v38, %v1135_v16 }
 0x35d   : > { %v1092_v35 = vpack.c.bf16 %v1090_v21, %v1088_v60  ;;  %v1103_v52 = vpop.permute.xlu1 %1102  ;;  %v1093_v39 = vpack.c.bf16 %v1091_v12, %v1089_v0  ;;  %v1141_v60 = vsel %vm1138_vm14, %v1135_v16, %v4100_v38  ;;  %v1183_v0 = vrot.slane %v1178_v10, %v3916_v5  ;;  %v1212_v16 = vld [vmem:[#allocation8 + $0x5] ss:$8 sm:$0x3] }
 0x35e   : > { %v1106_v61 = vsel %vm1104_vm13, %v4104_v25, %v1103_v52  ;;  %v1108_v33 = vsel %vm1104_vm13, %v1103_v52, %v4104_v25  ;;  %v1156_v21 = vmul.f32 %v1149_v45, %v1141_v60  ;;  %v1157_v38 = vmul.f32 %v1153_v13, %v1139_v32 }
 0x35f   : > { %v1124_v20 = vmul.f32 %v1115_v42, %v1108_v33  ;;  %v1125_v34 = vmul.f32 %v1119_v49, %v1106_v61  ;;  %1916 = vmatprep.subr.bf16.mxu0 %v1093_v39  ;;  %v1203_v1 = vpop.permute.xlu0 %1202  ;;  %v1187_v42 = vrot.slane %v1178_v10, %v3914_v4  ;;  %v1175_v52 = vsel %vm1172_vm15, %v1169_v9, %v4110_v26 }
 0x360   : > { %1917 = vmatpush1.bf16.msra.mxu0 %v1092_v35  ;;  %v1173_v35 = vsel %vm1172_vm15, %v4110_v26, %v1169_v9  ;;  %v1217_v33 = vrot.slane %v1212_v16, %v3916_v5  ;;  %v1245_v9 = vld [vmem:[#allocation8 + $0x6] ss:$8 sm:$0x3]  ;;  %v1207_v32 = vsel %vm1206_vm2, %v4118_v37, %v1203_v1  ;;  %v1209_v60 = vsel %vm1206_vm2, %v1203_v1, %v4118_v37 }
 0x361   : > { %v1126_v15 = vpack.c.bf16 %v1124_v20, %v1122_v8  ;;  %v1137_v25 = vpop.permute.xlu1 %1136  ;;  %v1127_v43 = vpack.c.bf16 %v1125_v34, %v1123_v55  ;;  %v1190_v55 = vmul.f32 %v1183_v0, %v1175_v52  ;;  %v1191_v26 = vmul.f32 %v1187_v42, %v1173_v35 }
 0x362   : > { %v1140_v49 = vsel %vm1138_vm14, %v4112_v30, %v1137_v25  ;;  %v1142_v28 = vsel %vm1138_vm14, %v1137_v25, %v4112_v30  ;;  %vm1644_vm13 = vcmp.lt.s32.totalorder %v3910_v63, 110  ;;  %vm1678_vm14 = vcmp.lt.s32.totalorder %v3910_v63, 98 }
 0x363   : > { %v1158_v12 = vmul.f32 %v1149_v45, %v1142_v28  ;;  %v1159_v48 = vmul.f32 %v1153_v13, %v1140_v49  ;;  %1918 = vmatprep.subr.bf16.mxu0 %v1127_v43  ;;  %v1237_v6 = vpop.permute.xlu0 %1236  ;;  %v1221_v45 = vrot.slane %v1212_v16, %v3914_v4  ;;  %v1254_v49 = vrot.slane %v1245_v9, %v3914_v4 }
 0x364   : > { %1919 = vmatpush1.bf16.msra.mxu0 %v1126_v15  ;;  %v1224_v28 = vmul.f32 %v1217_v33, %v1209_v60 }
 0x365   : > { %v1160_v39 = vpack.c.bf16 %v1158_v12, %v1156_v21  ;;  %v1171_v30 = vpop.permute.xlu1 %1170  ;;  %v1161_v61 = vpack.c.bf16 %v1159_v48, %v1157_v38  ;;  %v1225_v21 = vmul.f32 %v1221_v45, %v1207_v32  ;;  %v1278_v38 = vld [vmem:[#allocation8 + $0x7] ss:$8 sm:$0x3]  ;;  %v1240_v12 = vsel %vm722_vm3, %v4126_v47, %v1237_v6 }
 0x366   : > { %v1174_v13 = vsel %vm1172_vm15, %v4120_v57, %v1171_v30  ;;  %v1176_v8 = vsel %vm1172_vm15, %v1171_v30, %v4120_v57  ;;  %v1250_v57 = vrot.slane %v1245_v9, %v3916_v5  ;;  %v1242_v48 = vsel %vm722_vm3, %v1237_v6, %v4126_v47 }
 0x367   : > { %v1192_v10 = vmul.f32 %v1183_v0, %v1176_v8  ;;  %v1193_v20 = vmul.f32 %v1187_v42, %v1174_v13  ;;  %1920 = vmatprep.subr.bf16.mxu0 %v1161_v61  ;;  %v1270_v34 = vpop.permute.xlu0 %1269  ;;  %v1287_v30 = vrot.slane %v1278_v38, %v3914_v4  ;;  %v1258_v13 = vmul.f32 %v1254_v49, %v1240_v12  ;;  %v1311_v8 = vld [vmem:[#allocation8 + $0x10] ss:$8 sm:$0x3] }
 0x368   : > { %1921 = vmatpush1.bf16.msra.mxu0 %v1160_v39  ;;  %v1275_v9 = vsel %vm753_vm4, %v1270_v34, %v4134_v58  ;;  %v1320_v60 = vrot.slane %v1311_v8, %v3914_v4  ;;  %vm1712_vm15 = vcmp.lt.s32.totalorder %v3910_v63, 97 }
 0x369   : > { %v1194_v15 = vpack.c.bf16 %v1192_v10, %v1190_v55  ;;  %v1205_v25 = vpop.permute.xlu1 %1204  ;;  %v1195_v43 = vpack.c.bf16 %v1193_v20, %v1191_v26  ;;  %v1273_v26 = vsel %vm753_vm4, %v4134_v58, %v1270_v34 }
 0x36a   : > { %v1208_v0 = vsel %vm1206_vm2, %v4128_v51, %v1205_v25  ;;  %v1210_v42 = vsel %vm1206_vm2, %v1205_v25, %v4128_v51  ;;  %v1283_v51 = vrot.slane %v1278_v38, %v3916_v5  ;;  %vm1511_vm2 = vcmp.lt.s32.totalorder %v3910_v63, 114 }
 0x36b   : > { %v1226_v37 = vmul.f32 %v1217_v33, %v1210_v42  ;;  %v1227_v1 = vmul.f32 %v1221_v45, %v1208_v0  ;;  %1922 = vmatprep.subr.bf16.mxu0 %v1195_v43  ;;  %v1303_v16 = vpop.permute.xlu0 %1302  ;;  %v1257_v45 = vmul.f32 %v1250_v57, %v1242_v48 }
 0x36c   : > { %1923 = vmatpush1.bf16.msra.mxu0 %v1194_v15  ;;  %v1290_v43 = vmul.f32 %v1283_v51, %v1275_v9  ;;  %v1306_v42 = vsel %vm785_vm5, %v4142_v46, %v1303_v16 }
 0x36d   : > { %v1228_v35 = vpack.c.bf16 %v1226_v37, %v1224_v28  ;;  %v1239_v52 = vpop.permute.xlu1 %1238  ;;  %v1229_v39 = vpack.c.bf16 %v1227_v1, %v1225_v21  ;;  %v1308_v28 = vsel %vm785_vm5, %v1303_v16, %v4142_v46  ;;  %v1324_v46 = vmul.f32 %v1320_v60, %v1306_v42  ;;  %v1550_v16 = vld [vmem:[#allocation8 + $0x20] ss:$8 sm:$0x3] }
 0x36e   : > { %v1241_v61 = vsel %vm722_vm3, %v4136_v2, %v1239_v52  ;;  %v1243_v33 = vsel %vm722_vm3, %v1239_v52, %v4136_v2  ;;  %v1316_v2 = vrot.slane %v1311_v8, %v3916_v5  ;;  %v1559_v8 = vrot.slane %v1550_v16, %v3914_v4 }
 0x36f   : > { %v1259_v47 = vmul.f32 %v1250_v57, %v1243_v33  ;;  %v1260_v6 = vmul.f32 %v1254_v49, %v1241_v61  ;;  %1924 = vmatprep.subr.bf16.mxu0 %v1229_v39  ;;  %v1336_v55 = vpop.permute.xlu0 %1335  ;;  %v1291_v57 = vmul.f32 %v1287_v30, %v1273_v26  ;;  %v1345_v49 = vld [vmem:[#allocation8 + $0x11] ss:$8 sm:$0x3] }
 0x370   : > { %1925 = vmatpush1.bf16.msra.mxu0 %v1228_v35  ;;  %v1350_v37 = vrot.slane %v1345_v49, %v3916_v5  ;;  %v1354_v1 = vrot.slane %v1345_v49, %v3914_v4  ;;  %v1323_v35 = vmul.f32 %v1316_v2, %v1308_v28  ;;  %v1342_v61 = vsel %vm1339_vm11, %v1336_v55, %v4150_v44 }
 0x371   : > { %v1261_v10 = vpack.c.bf16 %v1259_v47, %v1257_v45  ;;  %v1272_v20 = vpop.permute.xlu1 %1271  ;;  %v1262_v32 = vpack.c.bf16 %v1260_v6, %v1258_v13 }
 0x372   : > { %v1274_v15 = vsel %vm753_vm4, %v4144_v3, %v1272_v20  ;;  %v1276_v25 = vsel %vm753_vm4, %v1272_v20, %v4144_v3  ;;  %v1357_v26 = vmul.f32 %v1350_v37, %v1342_v61 }
 0x373   : > { %v1292_v58 = vmul.f32 %v1283_v51, %v1276_v25  ;;  %v1293_v34 = vmul.f32 %v1287_v30, %v1274_v15  ;;  %1926 = vmatprep.subr.bf16.mxu0 %v1262_v32  ;;  %v1542_v0 = vpop.permute.xlu0 %1541  ;;  %v1340_v30 = vsel %vm1339_vm11, %v4150_v44, %v1336_v55 }
 0x374   : > { %1927 = vmatpush1.bf16.msra.mxu0 %v1261_v10  ;;  %v1358_v9 = vmul.f32 %v1354_v1, %v1340_v30  ;;  %v1379_v10 = vld [vmem:[#allocation8 + $0x12] ss:$8 sm:$0x3]  ;;  %v1545_v32 = vsel %vm883_vm8, %v4158_v23, %v1542_v0 }
 0x375   : > { %v1294_v21 = vpack.c.bf16 %v1292_v58, %v1290_v43  ;;  %v1305_v3 = vpop.permute.xlu1 %1304  ;;  %v1295_v38 = vpack.c.bf16 %v1293_v34, %v1291_v57  ;;  %v1384_v25 = vrot.slane %v1379_v10, %v3916_v5  ;;  %v1388_v43 = vrot.slane %v1379_v10, %v3914_v4  ;;  %v1583_v34 = vld [vmem:[#allocation8 + $0x21] ss:$8 sm:$0x3] }
 0x376   : > { %v1307_v12 = vsel %vm785_vm5, %v4152_v19, %v1305_v3  ;;  %v1309_v48 = vsel %vm785_vm5, %v1305_v3, %v4152_v19  ;;  %v1555_v19 = vrot.slane %v1550_v16, %v3916_v5 }
 0x377   : > { %v1325_v52 = vmul.f32 %v1316_v2, %v1309_v48  ;;  %v1326_v39 = vmul.f32 %v1320_v60, %v1307_v12  ;;  %1928 = vmatprep.subr.bf16.mxu0 %v1295_v38  ;;  %v1370_v51 = vpop.permute.xlu0 %1369  ;;  %v1547_v2 = vsel %vm883_vm8, %v1542_v0, %v4158_v23  ;;  %v1592_v12 = vrot.slane %v1583_v34, %v3914_v4 }
 0x378   : > { %1929 = vmatpush1.bf16.msra.mxu0 %v1294_v21  ;;  %v1562_v58 = vmul.f32 %v1555_v19, %v1545_v32  ;;  %v1563_v23 = vmul.f32 %v1559_v8, %v1547_v2  ;;  %v1374_v21 = vsel %vm1373_vm12, %v4166_v54, %v1370_v51  ;;  %v1376_v3 = vsel %vm1373_vm12, %v1370_v51, %v4166_v54 }
 0x379   : > { %v1327_v33 = vpack.c.bf16 %v1325_v52, %v1323_v35  ;;  %v1338_v45 = vpop.permute.xlu1 %1337  ;;  %v1328_v13 = vpack.c.bf16 %v1326_v39, %v1324_v46  ;;  %v1391_v46 = vmul.f32 %v1384_v25, %v1376_v3  ;;  %v1392_v16 = vmul.f32 %v1388_v43, %v1374_v21  ;;  %v1412_v52 = vld [vmem:[#allocation8 + $0x13] ss:$8 sm:$0x3] }
 0x37a   : > { %v1341_v47 = vsel %vm1339_vm11, %v4160_v29, %v1338_v45  ;;  %v1343_v6 = vsel %vm1339_vm11, %v1338_v45, %v4160_v29  ;;  %v1433_v21 = vpack.c.bf16 %v3933_v18, %v3900_v59  ;;  %v2696_v59 = vunpack.i.h.bf16 %v3830_v41 }
 0x37b   : > { %v1359_v44 = vmul.f32 %v1350_v37, %v1343_v6  ;;  %v1360_v55 = vmul.f32 %v1354_v1, %v1341_v47  ;;  %1930 = vmatprep.subr.bf16.mxu0 %v1328_v13  ;;  %v1575_v20 = vpop.permute.xlu0 %1574  ;;  %v2695_v18 = vunpack.i.l.bf16 %v3830_v41 }
 0x37c   : > { %1931 = vmatpush1.bf16.msra.mxu0 %v1327_v33  ;;  %v1578_v30 = vsel %vm915_vm9, %v4174_v50, %v1575_v20  ;;  %v1580_v61 = vsel %vm915_vm9, %v1575_v20, %v4174_v50 }
 0x37d   : > { %v1361_v60 = vpack.c.bf16 %v1359_v44, %v1357_v26  ;;  %v1544_v29 = vpop.permute.xlu1 %1543  ;;  %v1362_v15 = vpack.c.bf16 %v1360_v55, %v1358_v9  ;;  %v1596_v26 = vmul.f32 %v1592_v12, %v1580_v61  ;;  %v1616_v9 = vld [vmem:[#allocation8 + $0x22] ss:$8 sm:$0x3] }
 0x37e   : > { %v1546_v57 = vsel %vm883_vm8, %v4168_v7, %v1544_v29  ;;  %v1548_v49 = vsel %vm883_vm8, %v1544_v29, %v4168_v7  ;;  %v1588_v7 = vrot.slane %v1583_v34, %v3916_v5  ;;  %v1625_v29 = vrot.slane %v1616_v9, %v3914_v4 }
 0x37f   : > { %v1564_v0 = vmul.f32 %v1555_v19, %v1546_v57  ;;  %v1565_v42 = vmul.f32 %v1559_v8, %v1548_v49  ;;  %1932 = vmatprep.subr.bf16.mxu0 %v1362_v15  ;;  %v1404_v28 = vpop.permute.xlu0 %1403  ;;  %v1421_v19 = vrot.slane %v1412_v52, %v3914_v4  ;;  %v1650_v49 = vld [vmem:[#allocation8 + $0x23] ss:$8 sm:$0x3] }
 0x380   : > { %1933 = vmatpush1.bf16.msra.mxu0 %v1361_v60  ;;  %v1595_v6 = vmul.f32 %v1588_v7, %v1578_v30  ;;  %v1407_v55 = vsel %vm817_vm6, %v4186_v14, %v1404_v28  ;;  %v1409_v20 = vsel %vm817_vm6, %v1404_v28, %v4186_v14  ;;  %v1655_v3 = vrot.slane %v1650_v49, %v3916_v5 }
 0x381   : > { %v1566_v38 = vpack.c.bf16 %v1564_v0, %v1562_v58  ;;  %v1372_v37 = vpop.permute.xlu1 %1371  ;;  %v1567_v1 = vpack.c.bf16 %v1565_v42, %v1563_v23  ;;  %v1425_v57 = vmul.f32 %v1421_v19, %v1407_v55 }
 0x382   : > { %v1375_v48 = vsel %vm1373_vm12, %v4178_v11, %v1372_v37  ;;  %v1377_v35 = vsel %vm1373_vm12, %v1372_v37, %v4178_v11  ;;  %v1417_v11 = vrot.slane %v1412_v52, %v3916_v5 }
 0x383   : > { %v1393_v54 = vmul.f32 %v1384_v25, %v1377_v35  ;;  %v1394_v39 = vmul.f32 %v1388_v43, %v1375_v48  ;;  %v1608_v51 = vpop.permute.xlu0 %1607  ;;  %1955 = vmatprep.subr.bf16.mxu1 %v1567_v1 }
 0x384   : > { %1956 = vmatpush1.bf16.msra.mxu1 %v1566_v38  ;;  %v1424_v43 = vmul.f32 %v1417_v11, %v1409_v20  ;;  %v1611_v34 = vsel %vm947_vm10, %v4193_v62, %v1608_v51  ;;  %v1613_v0 = vsel %vm947_vm10, %v1608_v51, %v4193_v62  ;;  %v1659_v38 = vrot.slane %v1650_v49, %v3914_v4 }
 0x385   : > { %v1395_v33 = vpack.c.bf16 %v1393_v54, %v1391_v46  ;;  %v1577_v45 = vpop.permute.xlu1 %1576  ;;  %v1396_v13 = vpack.c.bf16 %v1394_v39, %v1392_v16  ;;  %v1432_v51 = vpack.c.bf16 %v3792_v40, %v3776_v36  ;;  %v4484_v36 = vsel %vm722_vm3, %v2695_v18, %v2696_v59 }
 0x386   : > { %v1579_v8 = vsel %vm915_vm9, %v4188_v17, %v1577_v45  ;;  %v1581_v47 = vsel %vm915_vm9, %v1577_v45, %v4188_v17  ;;  %v1621_v17 = vrot.slane %v1616_v9, %v3916_v5 }
 0x387   : > { %v1597_v50 = vmul.f32 %v1588_v7, %v1579_v8  ;;  %v1598_v10 = vmul.f32 %v1592_v12, %v1581_v47  ;;  %1934 = vmatprep.subr.bf16.mxu0 %v1396_v13  ;;  %v1641_v44 = vpop.permute.xlu0 %1640  ;;  %v1629_v7 = vmul.f32 %v1625_v29, %v1613_v0  ;;  %v1449_v12 = vld [vmem:[#allocation8 + $0x15] ss:$8 sm:$0x3]  ;;  %v1684_v13 = vld [vmem:[#allocation8 + $0x24] ss:$8 sm:$0x3] }
 0x388   : > { %1935 = vmatpush1.bf16.msra.mxu0 %v1395_v33  ;;  %v1628_v1 = vmul.f32 %v1621_v17, %v1611_v34  ;;  %v1645_v16 = vsel %vm1644_vm13, %v4199_v53, %v1641_v44  ;;  %v1647_v52 = vsel %vm1644_vm13, %v1641_v44, %v4199_v53  ;;  %v1454_v30 = vrot.slane %v1449_v12, %v3916_v5 }
 0x389   : > { %v1599_v32 = vpack.c.bf16 %v1597_v50, %v1595_v6  ;;  %v1406_v2 = vpop.permute.xlu1 %1405  ;;  %v1600_v60 = vpack.c.bf16 %v1598_v10, %v1596_v26  ;;  %v1458_v41 = vrot.slane %v1449_v12, %v3914_v4  ;;  %v1662_v33 = vmul.f32 %v1655_v3, %v1645_v16  ;;  %v4499_v10 = vld [vmem:[#allocation9 + $0x2] ss:$8 sm:$0x3] }
 0x38a   : > { %v1408_v15 = vsel %vm817_vm6, %v4195_v22, %v1406_v2  ;;  %v1410_v25 = vsel %vm817_vm6, %v1406_v2, %v4195_v22  ;;  %v1663_v45 = vmul.f32 %v1659_v38, %v1647_v52  ;;  %v4496_v6 = vsel %vm722_vm3, %v2696_v59, %v2695_v18  ;;  %v4540_v52 = vld [vmem:[#allocation9 + $0x1] ss:$8 sm:$0x3] }
 0x38b   : > { %v1426_v14 = vmul.f32 %v1417_v11, %v1410_v25  ;;  %v1427_v58 = vmul.f32 %v1421_v19, %v1408_v15  ;;  %v1441_v23 = vpop.permute.xlu0 %1440  ;;  %1957 = vmatprep.subr.bf16.mxu1 %v1600_v60  ;;  %v1689_v44 = vrot.slane %v1684_v13, %v3916_v5  ;;  %v1693_v55 = vrot.slane %v1684_v13, %v3914_v4  ;;  %v1483_v60 = vld [vmem:[#allocation8 + $0x16] ss:$8 sm:$0x3] }
 0x38c   : > { %1958 = vmatpush1.bf16.msra.mxu1 %v1599_v32  ;;  %v1444_v40 = vsel %vm851_vm7, %v4206_v56, %v1441_v23  ;;  %v1446_v47 = vsel %vm851_vm7, %v1441_v23, %v4206_v56  ;;  %vm1477_vm3 = vcmp.lt.s32.totalorder %v3910_v63, 126  ;;  %v1488_v0 = vrot.slane %v1483_v60, %v3916_v5 }
 0x38d   : > { %v1428_v42 = vpack.c.bf16 %v1426_v14, %v1424_v43  ;;  %v1610_v22 = vpop.permute.xlu1 %1609  ;;  %v1429_v28 = vpack.c.bf16 %v1427_v58, %v1425_v57  ;;  %v1461_v32 = vmul.f32 %v1454_v30, %v1444_v40  ;;  %v1462_v2 = vmul.f32 %v1458_v41, %v1446_v47  ;;  %v4880_v57 = vld [vmem:[#allocation41_spill] sm:$0xff]  ;;  %v4885_v47 = vld [vmem:[#allocation38_spill] sm:$0xff] }
 0x38e   : > { %v1612_v37 = vsel %vm947_vm10, %v4201_v24, %v1610_v22  ;;  %v1614_v62 = vsel %vm947_vm10, %v1610_v22, %v4201_v24  ;;  %v2055_v14 = vrot.slane %v4499_v10, %v3916_v5  ;;  %v4881_v22 = vld [vmem:[#allocation43_spill] sm:$0xff]  ;;  %v2059_v12 = vrot.slane %v4499_v10, %v3914_v4 }
 0x38f   : > { %v1630_v48 = vmul.f32 %v1621_v17, %v1612_v37  ;;  %v1631_v35 = vmul.f32 %v1625_v29, %v1614_v62  ;;  %1936 = vmatprep.subr.bf16.mxu0 %v1429_v28  ;;  %v1675_v46 = vpop.permute.xlu0 %1674  ;;  %v1718_v37 = vld [vmem:[#allocation8 + $0x25] ss:$8 sm:$0x3]  ;;  %v2032_v40 = vrot.slane %v4540_v52, %v3916_v5 }
 0x390   : > { %1937 = vmatpush1.bf16.msra.mxu0 %v1428_v42  ;;  %v1679_v49 = vsel %vm1678_vm14, %v4880_v57, %v1675_v46  ;;  %v1492_v42 = vrot.slane %v1483_v60, %v3914_v4 }
 0x391   : > { %v1632_v24 = vpack.c.bf16 %v1630_v48, %v1628_v1  ;;  %v1643_v54 = vpop.permute.xlu1 %1642  ;;  %1938 = vmatprep.subr.bf16.mxu0 %v1433_v21  ;;  %v1633_v39 = vpack.c.bf16 %v1631_v35, %v1629_v7  ;;  %v4882_v48 = vld [vmem:[#allocation37_spill] sm:$0xff] }
 0x392   : > { %v1646_v61 = vsel %vm1644_vm13, %v4208_v27, %v1643_v54  ;;  %v1648_v53 = vsel %vm1644_vm13, %v1643_v54, %v4208_v27  ;;  %v4492_v27 = vld [vmem:[#allocation9] ss:$8 sm:$0x3]  ;;  %v2706_v35 = vunpack.i.h.bf16 %v4882_v48  ;;  %v2705_v16 = vunpack.i.l.bf16 %v4882_v48 }
 0x393   : > { %v1664_v11 = vmul.f32 %v1655_v3, %v1646_v61  ;;  %v1665_v19 = vmul.f32 %v1659_v38, %v1648_v53  ;;  %v1474_v8 = vpop.permute.xlu0 %1473  ;;  %1959 = vmatprep.subr.bf16.mxu1 %v1633_v39  ;;  %v2009_v25 = vrot.slane %v4492_v27, %v3916_v5  ;;  %v2013_v43 = vrot.slane %v4492_v27, %v3914_v4 }
 0x394   : > { %1939 = vmatpush1.bf16.msra.mxu0 %v1432_v51  ;;  %1960 = vmatpush1.bf16.msra.mxu1 %v1632_v24  ;;  %v1696_v3 = vmul.f32 %v1689_v44, %v1679_v49  ;;  %v1723_v51 = vrot.slane %v1718_v37, %v3916_v5 }
 0x395   : > { %v1666_v26 = vpack.c.bf16 %v1664_v11, %v1662_v33  ;;  %v1443_v9 = vpop.permute.xlu1 %1442  ;;  %v1667_v50 = vpack.c.bf16 %v1665_v19, %v1663_v45  ;;  %v1517_v19 = vld [vmem:[#allocation8 + $0x17] ss:$8 sm:$0x3] }
 0x396   : > { %v1445_v56 = vsel %vm851_vm7, %v4215_v31, %v1443_v9  ;;  %v1447_v20 = vsel %vm851_vm7, %v1443_v9, %v4215_v31  ;;  %v1681_v31 = vsel %vm1678_vm14, %v1675_v46, %v4880_v57  ;;  %v4883_v46 = vld [vmem:[#allocation42_spill] sm:$0xff]  ;;  %v4886_v9 = vld [vmem:[#allocation44_spill] sm:$0xff]  ;;  %v1526_v60 = vrot.slane %v1517_v19, %v3914_v4 }
 0x397   : > { %v1463_v17 = vmul.f32 %v1454_v30, %v1445_v56  ;;  %v1464_v29 = vmul.f32 %v1458_v41, %v1447_v20  ;;  %v1709_v15 = vpop.permute.xlu0 %1708  ;;  %1961 = vmatprep.subr.bf16.mxu1 %v1667_v50  ;;  %v1697_v38 = vmul.f32 %v1693_v55, %v1681_v31  ;;  %v1478_v59 = vsel %vm1477_vm3, %v4883_v46, %v1474_v8  ;;  %v4884_v41 = vld [vmem:[#allocation45_spill] sm:$0xff] }
 0x398   : > { %1962 = vmatpush1.bf16.msra.mxu1 %v1666_v26  ;;  %v1480_v18 = vsel %vm1477_vm3, %v1474_v8, %v4883_v46  ;;  %v1727_v30 = vrot.slane %v1718_v37, %v3914_v4  ;;  %v1495_v33 = vmul.f32 %v1488_v0, %v1478_v59  ;;  %v2701_v26 = vunpack.i.h.bf16 %v4885_v47 }
 0x399   : > { %v1465_v58 = vpack.c.bf16 %v1463_v17, %v1461_v32  ;;  %v1677_v23 = vpop.permute.xlu1 %1676  ;;  %v1466_v34 = vpack.c.bf16 %v1464_v29, %v1462_v2  ;;  %v1496_v45 = vmul.f32 %v1492_v42, %v1480_v18  ;;  %v1713_v50 = vsel %vm1712_vm15, %v4886_v9, %v1709_v15  ;;  %v4887_v17 = vld [vmem:[#allocation46_spill] sm:$0xff] }
 0x39a   : > { %v1680_v28 = vsel %vm1678_vm14, %v4881_v22, %v1677_v23  ;;  %v1682_v21 = vsel %vm1678_vm14, %v1677_v23, %v4881_v22  ;;  %v1522_v2 = vrot.slane %v1517_v19, %v3916_v5  ;;  %v1730_v57 = vmul.f32 %v1723_v51, %v1713_v50  ;;  %v4889_v18 = vld [vmem:[#allocation34_spill] sm:$0xff] }
 0x39b   : > { %v1698_v62 = vmul.f32 %v1689_v44, %v1680_v28  ;;  %v1699_v1 = vmul.f32 %v1693_v55, %v1682_v21  ;;  %1940 = vmatprep.subr.bf16.mxu0 %v1466_v34  ;;  %v1504_v7 = vpop.permute.xlu0 %1503  ;;  %v1715_v44 = vsel %vm1712_vm15, %v1709_v15, %v4886_v9  ;;  %v2700_v55 = vunpack.i.l.bf16 %v4885_v47 }
 0x39c   : > { %1941 = vmatpush1.bf16.msra.mxu0 %v1465_v58  ;;  %v1731_v49 = vmul.f32 %v1727_v30, %v1715_v44  ;;  %v2016_v34 = vadd.f32 %v2009_v25, %v4496_v6  ;;  %v2036_v28 = vrot.slane %v4540_v52, %v3914_v4  ;;  %v4890_v52 = vunpack.c.l.bf16 %v4889_v18 }
 0x39d   : > { %v1700_v24 = vpack.c.bf16 %v1698_v62, %v1696_v3  ;;  %v1476_v54 = vpop.permute.xlu1 %1475  ;;  %v1701_v39 = vpack.c.bf16 %v1699_v1, %v1697_v38  ;;  %v2025_v21 = vsel %vm753_vm4, %v2701_v26, %v2700_v55  ;;  %v2024_v27 = vsel %vm753_vm4, %v2700_v55, %v2701_v26 }
 0x39e   : > { %v1479_v61 = vsel %vm1477_vm3, %v4884_v41, %v1476_v54  ;;  %v1481_v53 = vsel %vm1477_vm3, %v1476_v54, %v4884_v41  ;;  %v4891_v54 = vunpack.c.h.bf16 %v4889_v18  ;;  %v1752_v41 = vld [vmem:[#allocation8 + $0x26] ss:$8 sm:$0x3]  ;;  %vm1746_vm4 = vcmp.lt.s32.totalorder %v3910_v63, 96 }
 0x39f   : > { %v1497_v13 = vmul.f32 %v1488_v0, %v1479_v61  ;;  %v1498_v11 = vmul.f32 %v1492_v42, %v1481_v53  ;;  %v1508_v8 = vpop.permute.xlu0 %1507  ;;  %1963 = vmatprep.subr.bf16.mxu1 %v1701_v39  ;;  %v2017_v0 = vadd.f32 %v2013_v43, %v4484_v36  ;;  %v2047_v36 = vsel %vm785_vm5, %v2705_v16, %v2706_v35  ;;  %v4888_v43 = vld [vmem:[#allocation47_spill] sm:$0xff] }
 0x3a0   : > { %1964 = vmatpush1.bf16.msra.mxu1 %v1700_v24  ;;  %v1512_v42 = vsel %vm1511_vm2, %v1504_v7, %v1508_v8  ;;  %v1514_v22 = vsel %vm1511_vm2, %v1508_v8, %v1504_v7  ;;  %v2018_v24 = vmax.f32 %v4890_v52, %v2016_v34  ;;  %v2040_v61 = vadd.f32 %v2036_v28, %v2024_v27 }
 0x3a1   : > { %v1499_v56 = vpack.c.bf16 %v1497_v13, %v1495_v33  ;;  %v1711_v20 = vpop.permute.xlu1 %1710  ;;  %v1500_v32 = vpack.c.bf16 %v1498_v11, %v1496_v45  ;;  %v1529_v62 = vmul.f32 %v1522_v2, %v1512_v42  ;;  %v1530_v1 = vmul.f32 %v1526_v60, %v1514_v22  ;;  %v2073_v13 = vld [vmem:[#allocation9 + $0x3] ss:$8 sm:$0x3]  ;;  %v4892_v11 = vld [vmem:[#allocation39_spill] sm:$0xff] }
 0x3a2   : > { %v1714_v29 = vsel %vm1712_vm15, %v4887_v17, %v1711_v20  ;;  %v1716_v15 = vsel %vm1712_vm15, %v1711_v20, %v4887_v17  ;;  %v2019_v39 = vmax.f32 %v4891_v54, %v2017_v0  ;;  %v2711_v19 = vunpack.i.h.bf16 %v4892_v11 }
 0x3a3   : > { %v1732_v31 = vmul.f32 %v1723_v51, %v1714_v29  ;;  %v1733_v58 = vmul.f32 %v1727_v30, %v1716_v15  ;;  %1942 = vmatprep.subr.bf16.mxu0 %v1500_v32  ;;  %v1739_v23 = vpop.permute.xlu0 %1738  ;;  %v2048_v51 = vsel %vm785_vm5, %v2706_v35, %v2705_v16  ;;  %v2039_v30 = vadd.f32 %v2032_v40, %v2025_v21  ;;  %v4893_v16 = vld [vmem:[#allocation40_spill] sm:$0xff] }
 0x3a4   : > { %1943 = vmatpush1.bf16.msra.mxu0 %v1499_v56  ;;  %v2710_v8 = vunpack.i.l.bf16 %v4892_v11  ;;  %v1757_v47 = vrot.slane %v1752_v41, %v3916_v5  ;;  %v1761_v48 = vrot.slane %v1752_v41, %v3914_v4  ;;  %v2483_v40 = vcombine.low %v4893_v16, %v4893_v16 }
 0x3a5   : > { %v1734_v3 = vpack.c.bf16 %v1732_v31, %v1730_v57  ;;  %v1510_v6 = vpop.permute.xlu1 %1509  ;;  %v1735_v25 = vpack.c.bf16 %v1733_v58, %v1731_v49  ;;  %v2062_v26 = vadd.f32 %v2055_v14, %v2048_v51  ;;  %v2063_v9 = vadd.f32 %v2059_v12, %v2047_v36  ;;  %v2096_v31 = vld [vmem:[#allocation9 + $0x5] ss:$8 sm:$0x3]  ;;  %v2142_v51 = vld [vmem:[#allocation9 + $0x7] ss:$8 sm:$0x3] }
 0x3a6   : > { %v1513_v38 = vsel %vm1511_vm2, %v4888_v43, %v1510_v6  ;;  %v1515_v37 = vsel %vm1511_vm2, %v1510_v6, %v4888_v43  ;;  %v2041_v55 = vmax.f32 %v2018_v24, %v2039_v30  ;;  %v2042_v56 = vmax.f32 %v2019_v39, %v2040_v61 }
 0x3a7   : > { %v1531_v7 = vmul.f32 %v1522_v2, %v1513_v38  ;;  %v1532_v46 = vmul.f32 %v1526_v60, %v1515_v37  ;;  %v1743_v59 = vpop.permute.xlu0 %1742  ;;  %1965 = vmatprep.subr.bf16.mxu1 %v1735_v25  ;;  %v2078_v20 = vrot.slane %v2073_v13, %v3916_v5  ;;  %v2082_v32 = vrot.slane %v2073_v13, %v3914_v4  ;;  %v2119_v25 = vld [vmem:[#allocation9 + $0x6] ss:$8 sm:$0x3] }
 0x3a8   : > { %1966 = vmatpush1.bf16.msra.mxu1 %v1734_v3  ;;  %v1747_v50 = vsel %vm1746_vm4, %v1739_v23, %v1743_v59  ;;  %v1749_v44 = vsel %vm1746_vm4, %v1743_v59, %v1739_v23  ;;  %v2070_v14 = vsel %vm817_vm6, %v2710_v8, %v2711_v19  ;;  %v2071_v10 = vsel %vm817_vm6, %v2711_v19, %v2710_v8 }
 0x3a9   : > { %v1533_v53 = vpack.c.bf16 %v1531_v7, %v1529_v62  ;;  %v1741_v33 = vpop.permute.xlu1 %1740  ;;  %v1534_v45 = vpack.c.bf16 %v1532_v46, %v1530_v1  ;;  %v1764_v17 = vmul.f32 %v1757_v47, %v1747_v50  ;;  %v1765_v29 = vmul.f32 %v1761_v48, %v1749_v44  ;;  %v1786_v7 = vld [vmem:[#allocation8 + $0x27] ss:$8 sm:$0x3] }
 0x3aa   : > { %v4894_v34 = vmov 0   ;;  %v2064_v0 = vmax.f32 %v2041_v55, %v2062_v26  ;;  %v2065_v42 = vmax.f32 %v2042_v56, %v2063_v9  ;;  %v2085_v3 = vadd.f32 %v2078_v20, %v2071_v10 }
 0x3ab   : > { %1944 = vmatprep.subr.bf16.mxu0 %v1534_v45  ;;  %v2714_v35 = vpop.permute.xlu0 %2713  ;;  %v2086_v6 = vadd.f32 %v2082_v32, %v2070_v14  ;;  %v2101_v43 = vrot.slane %v2096_v31, %v3916_v5  ;;  %v2105_v38 = vrot.slane %v2096_v31, %v3914_v4  ;;  %v2124_v46 = vrot.slane %v2119_v25, %v3916_v5 }
 0x3ac   : > { %1945 = vmatpush1.bf16.msra.mxu0 %v1533_v53  ;;  %v2716_v58 = vunpack.i.h.bf16 %v2714_v35  ;;  %v2715_v23 = vunpack.i.l.bf16 %v2714_v35  ;;  %v2128_v59 = vrot.slane %v2119_v25, %v3914_v4  ;;  %vm1780_vm5 = vcmp.lt.s32.totalorder %v3910_v63, 95 }
 0x3ad   : > { %v1745_v2 = vpop.permute.xlu1 %1744  ;;  %v2087_v52 = vmax.f32 %v2064_v0, %v2085_v3  ;;  %v2088_v24 = vmax.f32 %v2065_v42, %v2086_v6  ;;  %v1791_v61 = vrot.slane %v1786_v7, %v3916_v5  ;;  %v1795_v53 = vrot.slane %v1786_v7, %v3914_v4  ;;  %v1820_v0 = vld [vmem:[#allocation8 + $0x30] ss:$8 sm:$0x3] }
 0x3ae   : > { %v1748_v12 = vsel %vm1746_vm4, %v1741_v33, %v1745_v2  ;;  %v1750_v60 = vsel %vm1746_vm4, %v1745_v2, %v1741_v33  ;;  %v2093_v62 = vsel %vm851_vm7, %v2715_v23, %v2716_v58  ;;  %v2094_v1 = vsel %vm851_vm7, %v2716_v58, %v2715_v23 }
 0x3af   : > { %v1766_v15 = vmul.f32 %v1757_v47, %v1748_v12  ;;  %v1767_v57 = vmul.f32 %v1761_v48, %v1750_v60  ;;  %1947 = vmatmul.mubr.bf16.vlgmr.msra.gmra.mrb[12].mxu0 %v2483_v40  ;;  %v1773_v49 = vpop.permute.xlu0 %1772  ;;  %v2108_v30 = vadd.f32 %v2101_v43, %v2093_v62  ;;  %v2109_v41 = vadd.f32 %v2105_v38, %v2094_v1  ;;  %v2165_v40 = vld [vmem:[#allocation9 + $0x10] ss:$8 sm:$0x3] }
 0x3b0   : > { %2231 = vmatprep.mubr.bf16.mxu0 %v4894_v34  ;;  %v2147_v48 = vrot.slane %v2142_v51, %v3916_v5  ;;  %v2151_v35 = vrot.slane %v2142_v51, %v3914_v4  ;;  %v2170_v12 = vrot.slane %v2165_v40, %v3916_v5  ;;  %v2174_v60 = vrot.slane %v2165_v40, %v3914_v4  ;;  %v2181_v51 = vld [vmem:[#allocation20] sm:$0xf] }
 0x3b1   : > { %v1768_v22 = vpack.c.bf16 %v1766_v15, %v1764_v17  ;;  %v2719_v28 = vpop.permute.xlu1 %2718  ;;  %v1769_v21 = vpack.c.bf16 %v1767_v57, %v1765_v29  ;;  %v2110_v14 = vmax.f32 %v2087_v52, %v2108_v30  ;;  %v2111_v10 = vmax.f32 %v2088_v24, %v2109_v41 }
 0x3b2   : > { %v2721_v36 = vunpack.i.h.bf16 %v2719_v28  ;;  %v2720_v27 = vunpack.i.l.bf16 %v2719_v28  ;;  %vm1814_vm6 = vcmp.lt.s32.totalorder %v3910_v63, 94  ;;  %v1829_v43 = vrot.slane %v1820_v0, %v3914_v4 }
 0x3b3   : > { %v1777_v37 = vpop.permute.xlu0 %1776  ;;  %1967 = vmatprep.subr.bf16.mxu1 %v1769_v21 }
 0x3b4   : > { %1968 = vmatpush1.bf16.msra.mxu1 %v1768_v22  ;;  %v2116_v54 = vsel %vm883_vm8, %v2720_v27, %v2721_v36  ;;  %v2117_v39 = vsel %vm883_vm8, %v2721_v36, %v2720_v27  ;;  %v1781_v45 = vsel %vm1780_vm5, %v1773_v49, %v1777_v37  ;;  %v1783_v13 = vsel %vm1780_vm5, %v1777_v37, %v1773_v49 }
 0x3b5   : > { %v1775_v18 = vpop.permute.xlu1 %1774  ;;  %v2131_v8 = vadd.f32 %v2124_v46, %v2116_v54  ;;  %v2132_v47 = vadd.f32 %v2128_v59, %v2117_v39  ;;  %v1798_v55 = vmul.f32 %v1791_v61, %v1781_v45  ;;  %v1799_v56 = vmul.f32 %v1795_v53, %v1783_v13  ;;  %v4896_v13 = vld [vmem:[#allocation36_spill] sm:$0xff] }
 0x3b6   : > { %v1825_v27 = vrot.slane %v1820_v0, %v3916_v5 }
 0x3b7   : > { %v2724_v33 = vpop.permute.xlu0 %2723  ;;  %v2133_v23 = vmax.f32 %v2110_v14, %v2131_v8  ;;  %v2134_v34 = vmax.f32 %v2111_v10, %v2132_v47 }
 0x3b8   : > { %v2726_v11 = vunpack.i.h.bf16 %v2724_v33  ;;  %v2725_v19 = vunpack.i.l.bf16 %v2724_v33  ;;  %v4895_v33 = vld [vmem:[#allocation35_spill] sm:$0xff] }
 0x3b9   : > { %v1779_v16 = vpop.permute.xlu1 %1778 }
 0x3ba   : > { %v2139_v26 = vsel %vm915_vm9, %v2725_v19, %v2726_v11  ;;  %v2140_v9 = vsel %vm915_vm9, %v2726_v11, %v2725_v19  ;;  %v1782_v50 = vsel %vm1780_vm5, %v1775_v18, %v1779_v16  ;;  %v1784_v44 = vsel %vm1780_vm5, %v1779_v16, %v1775_v18 }
 0x3bb   : > { %v1800_v20 = vmul.f32 %v1791_v61, %v1782_v50  ;;  %v1801_v32 = vmul.f32 %v1795_v53, %v1784_v44  ;;  %v1807_v2 = vpop.permute.xlu0 %1806  ;;  %v2154_v17 = vadd.f32 %v2147_v48, %v2139_v26  ;;  %v2155_v29 = vadd.f32 %v2151_v35, %v2140_v9  ;;  %v2743_v61 = vld [vmem:[#allocation17 + $0x8] sm:$0xff] }
 0x3bc   : > { %v2485_v53 = vcombine.low %v2743_v61, %v2743_v61 }
 0x3bd   : > { %v1802_v15 = vpack.c.bf16 %v1800_v20, %v1798_v55  ;;  %v2729_v57 = vpop.permute.xlu1 %2728  ;;  %v1803_v49 = vpack.c.bf16 %v1801_v32, %v1799_v56  ;;  %v2157_v21 = vmax.f32 %v2134_v34, %v2155_v29  ;;  %v2156_v36 = vmax.f32 %v2133_v23, %v2154_v17 }
 0x3be   : > { %v2731_v31 = vunpack.i.h.bf16 %v2729_v57  ;;  %v2730_v58 = vunpack.i.l.bf16 %v2729_v57 }
 0x3bf   : > { %1969 = vmatprep.subr.bf16.mxu1 %v1803_v49  ;;  %v1811_v28 = vpop.permute.xlu0 %1810 }
 0x3c0   : > { %v2162_v42 = vsel %vm947_vm10, %v2730_v58, %v2731_v31  ;;  %v2163_v22 = vsel %vm947_vm10, %v2731_v31, %v2730_v58  ;;  %1970 = vmatpush1.bf16.msra.mxu1 %v1802_v15  ;;  %v1815_v38 = vsel %vm1814_vm6, %v1807_v2, %v1811_v28  ;;  %v1817_v1 = vsel %vm1814_vm6, %v1811_v28, %v1807_v2 }
 0x3c1   : > { %v2177_v3 = vadd.f32 %v2170_v12, %v2162_v42  ;;  %v2178_v6 = vadd.f32 %v2174_v60, %v2163_v22  ;;  %v1809_v25 = vpop.permute.xlu1 %1808  ;;  %v1832_v18 = vmul.f32 %v1825_v27, %v1815_v38  ;;  %v1833_v4 = vmul.f32 %v1829_v43, %v1817_v1 }
 0x3c3   : > { %v2180_v37 = vmax.f32 %v2157_v21, %v2178_v6  ;;  %v2179_v62 = vmax.f32 %v2156_v36, %v2177_v3 }
 0x3c5   : > { %v1813_v7 = vpop.permute.xlu1 %1812  ;;  %v2183_v46 = vpack.c.bf16 %v2180_v37, %v2180_v37  ;;  %v2182_v59 = vpack.c.bf16 %v2179_v62, %v2179_v62 }
 0x3c6   : > { %v1816_v52 = vsel %vm1814_vm6, %v1809_v25, %v1813_v7  ;;  %v1818_v5 = vsel %vm1814_vm6, %v1813_v7, %v1809_v25 }
 0x3c7   : > { %v1834_v24 = vmul.f32 %v1825_v27, %v1816_v52  ;;  %v1835_v54 = vmul.f32 %v1829_v43, %v1818_v5  ;;  %2488 = vmatprep.subr.msk.bf16.mxu0 %vm644_vm0, %v2183_v46  ;;  %v2194_v39 = vsel %vm644_vm0, %v2182_v59, 0 }
 0x3c8   : > { %2200 = vmatpush1.bf16.msra.mxu0 %v2194_v39 }
 0x3c9   : > { %v1836_v30 = vpack.c.bf16 %v1834_v24, %v1832_v18  ;;  %v1837_v41 = vpack.c.bf16 %v1835_v54, %v1833_v4 }
 0x3cb   : > { %1971 = vmatprep.subr.bf16.mxu1 %v1837_v41  ;;  %2489 = vmatmul.mubr.msk.bf16.vlgmr.msra.gmra.mrb[16].mxu0 %vm634_vm1, %v2181_v51 }
 0x3cc   : > { %1972 = vmatpush1.bf16.msra.mxu1 %v1836_v30 }
 0x3cf   : > { %1988 = vmatmul.mubr.bf16.vlgmr.msra.gmra.mrb[4].mxu1 %v2485_v53 }
 0x3d0   : > { %v1896_v19 = vpop.permute.xlu0 %1895 }
 0x3d4   : > { %v976_v8 = vpop.permute.xlu0 %975 }
 0x3d6   : > { %v594_v63 = vpop.permute.xlu1 %593 }
 0x3d7   : > { %v686_v45 = vadd.f32 %v4895_v33, %v594_v63  ;;  %v688_v11 = vadd.f32 %v4896_v13, %v594_v63 }
 0x3d9   : > { %2240 = vst [vmem:[%s4686_s18] sm:$0xff] %v686_v45  ;;  %2241 = vst [vmem:[%s4686_s18 + $0x8] sm:$0xff] %v688_v11 }
 0x3da   : > { %v2188_v56 = vpop.permute.xlu1 %2187 }
 0x3de   : > { %v1022_v47 = vpop.f32.mrb[0].mxu1 }
 0x3df   : > { %v1023_v48 = vadd.f32 %v1022_v47, %v976_v8  ;;  %v1024_v35 = vpop.f32.mrb[1].mxu1 }
 0x3e0   : > { %v1025_v16 = vadd.f32 %v1024_v35, %v976_v8  ;;  %v1026_v40 = vpop.f32.mrb[2].mxu1 }
 0x3e1   : > { %2242 = vst [vmem:[%s4686_s18 + $0x10] sm:$0xff] %v1023_v48  ;;  %v1027_v26 = vpop.f32.mrb[3].mxu1 }
 0x3e2   : > { %2243 = vst [vmem:[%s4686_s18 + $0x18] sm:$0xff] %v1025_v16 }
 0x482   : > { %v1948_v9 = vpop.f32.mrb[12].mxu0 }
 0x483   : > { %v1950_v50 = vpop.f32.mrb[13].mxu0  ;;  %v1949_v12 = vadd.f32 %v1948_v9, %v1896_v19 }
 0x484   : > { %v1952_v44 = vpop.f32.mrb[14].mxu0  ;;  %v1951_v17 = vadd.f32 %v1950_v50, %v1896_v19 }
 0x485   : > { %v1953_v55 = vpop.f32.mrb[15].mxu0 }
 0x49e   : > { %v2233_v20 = vpop.f32.mrb[16].mxu0 }
 0x49f   : > { %v2234_v32 = vadd.f32 %v2233_v20, %v2188_v56  ;;  %v2235_v2 = vpop.f32.mrb[17].mxu0 }
 0x4a0   : > { %v2236_v14 = vadd.f32 %v2235_v2, %v2188_v56  ;;  %v2237_v10 = vpop.f32.mrb[18].mxu0 }
 0x4a1   : > { %2246 = vst [vmem:[%s4686_s18 + $0x30] sm:$0xff] %v2234_v32  ;;  %v2238_v60 = vpop.f32.mrb[19].mxu0 }
 0x4a2   : > { %2247 = vst [vmem:[%s4686_s18 + $0x38] sm:$0xff] %v2236_v14  ;;  %v1989_v29 = vpop.f32.mrb[4].mxu1 }
 0x4a3   : > { %v1990_v15 = vadd.f32 %v1989_v29, %v1949_v12  ;;  %v1991_v57 = vpop.f32.mrb[5].mxu1 }
 0x4a4   : > { %v1992_v49 = vadd.f32 %v1991_v57, %v1951_v17  ;;  %v1993_v31 = vpop.f32.mrb[6].mxu1 }
 0x4a5   : > { %2244 = vst [vmem:[%s4686_s18 + $0x20] sm:$0xff] %v1990_v15  ;;  %v1994_v58 = vpop.f32.mrb[7].mxu1 }
 0x4a6   : > { %2245 = vst [vmem:[%s4686_s18 + $0x28] sm:$0xff] %v1992_v49 }
 0x4a7   : > { %3095 = shalt.err (!%p3092_p9)
}
 0x4a8   : > { %s3096_s18 = scalar_lea.hbm %s4701_s29, 1024  ;;  %s3100_s16 = scalar_lea.hbm %s4897_s27, 2048 }
 0x4a9   : > { %p3097_p7 = scmp.ne.s32.totalorder %s4701_s29, %s3096_s18  ;;  %p3101_p13 = scmp.lt.u32.totalorder %s4701_s29, %s4897_s27 }
 0x4aa   : > { %p3102_p1 = scmp.lt.u32.totalorder %s3100_s16, %s3096_s18  ;;  %p3104_p2 = scmp.lt.u32.totalorder %s3096_s18, %s4701_s29 }
 0x4ab   : > { %p3098_p4 = pnand %p3097_p7, %p4898_p0 }
 0x4ac   : > { %p3103_p3 = por %p3102_p1, %p3101_p13 }
 0x4ad   : > { %p3099_p12 = pneg %p3098_p4 }
 0x4ae   : > { %p3105_p6 = por %p3104_p2, %p3103_p3 }
 0x4b0   : > { %p3106_p10 = pnand %p3105_p6, %p3099_p12 }
 0x4b2   : > { %3109 = shalt.err (!%p3106_p10)
}
 0x4b3   : > { %s3218_s14 = smov 256   ;;  %s4899_s3 = smov 16  }
 0x4b4   : > { %2547 = dma.vmem_to_hbm [thread:$0]  (%p4898_p0), %s4696_s20, 1024, %s4701_s29, %s2249_s25, %s3218_s14, %s3218_s14, %s4899_s3  }
 0x4b5 PF: > { %s2277_s19 = sand.u32 1, %s3160_s21   ;;  %p4900_p11 = scmp.ne.s32.totalorder %s4834_s26, 0 }
 0x4b6   : > { %p4901_p8 = scmp.ge.s32.totalorder %s3172_s24, 2  ;;  %s2278_s18 = scalar_lea.sflag [#allocation5], %s2277_s19 }
 0x4b8   : > { %p2588_p5 = pnand %p4901_p8, %p4900_p11 }
 0x4ba   : > { %3155 = dma.done.wait (!%p2588_p5), %s2278_s18, 1024  }
 0x4bb   : > { %3157 = vsyncadd (!%p2588_p5), %s2278_s18, 4294966272  ;;  %p31_p9 = scmp.ge.s32.totalorder %s3559_s13, 4   ;;  %s4902_s21 = smov %s3164_s22 }
 0x4bc   : > { %s4903_s22 = smov %s3168_s23  ;;  %s4904_s23 = smov %s3571_s1 }
 0x4bd   : > { %s4905_s24 = smov %s3559_s13  ;;  %33 = sbr.rel (!%p31_p9) target bundleno = 16 (0x10), region = 194 }
 0x4c4   :  { %2283 = vsyncpa [#allocation4], 1 }
 0x4c5   :  { %2285 = vsyncpa [#allocation4 + $0x1], 1 }
 0x4c6   :  { %2286 = vsyncpa [#allocation7], 1 }
 0x4c7   :  { %2287 = vsyncpa [#allocation10], 1 }
 0x4c8   :  { %2288 = vsyncpa [#allocation13], 1 }
 0x4c9   :  { %2289 = vsyncpa [#allocation16], 1 }
 0x4ca   :  { %2290 = vsyncpa [#allocation19], 1 }
 0x4cb   :  { %2291 = vsyncpa [#allocation22], 1 }
 0x4cc   :  { %2292 = vsyncpa [#allocation5], 1 }
 0x4cd   :  { %2294 = vsyncpa [#allocation5 + $0x1], 1 }

// kernel: tpu_custom_call.1
= control target key start
LH: loop header
LB: loop body
LE: loop exit
PB: predicated region body
PF: predicated region fallthrough
CT: control target
= control target key end

     0   :  { %s4748_s0 = inlined_call_operand.hbm [shape: bf16[8,512], index: 0, kind: input, shape index: {}]   ;;  %s4749_s1 = inlined_call_operand.hbm [shape: f32[16,256], index: 1, kind: input, shape index: {}]   ;;  %s4750_s2 = inlined_call_operand.hbm [shape: f32[32,256], index: 2, kind: input, shape index: {}]   ;;  %s4751_s3 = inlined_call_operand.hbm [shape: f32[16,256], index: 3, kind: input, shape index: {}]   ;;  %s4752_s4 = inlined_call_operand.hbm [shape: bf16[40,8], index: 4, kind: input, shape index: {}]   ;;  %s4753_s5 = inlined_call_operand.hbm [shape: f32[40,1], index: 5, kind: input, shape index: {}]   ;;  %s4754_s6 = inlined_call_operand.hbm [shape: bf16[8,144], index: 6, kind: input, shape index: {}]   ;;  %s4755_s7 = inlined_call_operand.hbm [shape: f32[8,1], index: 7, kind: input, shape index: {}]   ;;  %s4756_s8 = inlined_call_operand.hbm [shape: bf16[8,400], index: 8, kind: input, shape index: {}]   ;;  %s4757_s9 = inlined_call_operand.hbm [shape: f32[8,1], index: 9, kind: input, shape index: {}]   ;;  %s4758_s10 = inlined_call_operand.hbm [shape: bf16[8,8], index: 10, kind: input, shape index: {}]   ;;  %s4759_s11 = inlined_call_operand.hbm [shape: f32[8,1], index: 11, kind: input, shape index: {}]   ;;  %s4760_s12 = inlined_call_operand.hbm [shape: f32[2,32,256], index: 12, kind: output, shape index: {}]  }
   0x1   :  { %4817 = sst [smem:[#allocation48_spill]] %s4748_s0 }
   0x2   :  { %4818 = sst [smem:[#allocation49_spill]] %s4749_s1 }
   0x3   :  { %4819 = sst [smem:[#allocation50_spill]] %s4751_s3 }
   0x4   :  { %4820 = sst [smem:[#allocation51_spill]] %s4760_s12 }
   0x5   :  { %17 = vsyncpa [#allocation4], 0 }
   0x6   :  { %19 = vsyncpa [#allocation4 + $0x1], 0 }
   0x7   :  { %20 = vsyncpa [#allocation7], 0 }
   0x8   :  { %21 = vsyncpa [#allocation10], 0 }
   0x9   :  { %22 = vsyncpa [#allocation13], 0 }
   0xa   :  { %23 = vsyncpa [#allocation16], 0 }
   0xb   :  { %24 = vsyncpa [#allocation19], 0 }
   0xc   :  { %25 = vsyncpa [#allocation22], 0 }
   0xd   :  { %26 = vsyncpa [#allocation5], 0 }
   0xe   :  { %28 = vsyncpa [#allocation5 + $0x1], 0  ;;  %s3284_s21 = smov 0   ;;  %s3286_s22 = smov 0  }
   0xf   :  { %s3288_s23 = smov 0   ;;  %s3290_s24 = smov 0  }
  0x10 LB: > { %s3174_s25 = smov [#allocation6]   ;;  %s3305_s27 = sadd.s32 4294967295, %s3172_s24   ;;  %s3172_s24 = sphi %s3290_s24, %s4905_s24   ;;  %s3168_s23 = sphi %s3288_s23, %s4904_s23   ;;  %s3164_s22 = sphi %s3286_s22, %s4903_s22   ;;  %s3160_s21 = sphi %s3284_s21, %s4902_s21  }
  0x11   : > { %s334_s26 = sshll.u32 %s3174_s25, 4  ;;  %4821 = sst [smem:[#allocation32_spill]] %s3305_s27  ;;  %s3310_s26 = int_to_ptr.vmem [resolvable:$true] %s334_s26 }
  0x12   : > { %p2441_p0 = scmp.ge.s32.totalorder %s3172_s24, 1  ;;  %p4769_p1 = scmp.eq.s32.totalorder %s3305_s27, 0 }
  0x13   : > { %p322_p2 = scmp.lt.s32.totalorder %s3172_s24, 3  ;;  %s3175_s29 = smov [#allocation9]  }
  0x14   : > { %s360_s30 = sshll.u32 %s3175_s29, 4  ;;  %s3176_s14 = smov [#allocation12]   ;;  %s3325_s30 = int_to_ptr.vmem [resolvable:$true] %s360_s30 }
  0x15   : > { %p3312_p3 = pnand %p2441_p0, %p322_p2  ;;  %s386_s15 = sshll.u32 %s3176_s14, 4  ;;  %s3327_s15 = int_to_ptr.vmem [resolvable:$true] %s386_s15 }
  0x16   : > { %s4825_s1 = sld [smem:[#allocation49_spill]] }
  0x17   : > { %s4822_s28 = scalar_select %p3312_p3, 1, 0 }
  0x18   : > { %p2549_p5 = pneg %p3312_p3 }
  0x19   : > { %4823 = sst [smem:[#allocation33_spill]] %s4822_s28 }
  0x1a   : > { %p3321_p6 = pnand %p2549_p5, %p4769_p1 }
  0x1c   : > { %s2744_s18 = scalar_lea.hbm %s4825_s1, 512  ;;  %p3337_p8 = pneg %p3321_p6 }
  0x1d   : > { %p2745_p7 = scmp.ne.s32.totalorder %s4825_s1, %s2744_s18  ;;  %p2751_p11 = scmp.lt.u32.totalorder %s2744_s18, %s4825_s1 }
  0x1f   : > { %p2747_p9 = pnand %p3337_p8, %p2745_p7 }
  0x21   : > { %p2748_p10 = pneg %p2747_p9 }
  0x23   : > { %p2753_p12 = pnand %p2751_p11, %p2748_p10 }
  0x25   : > { %2756 = shalt.err (!%p2753_p12)
}
  0x26   : > { %s2757_s16 = scalar_lea.vmem %s3310_s26, 512  ;;  %p2765_p5 = scmp.lt.s32.totalorder %s3310_s26, %s3310_s26 }
  0x27   : > { %p2758_p13 = scmp.ne.s32.totalorder %s3310_s26, %s2757_s16  ;;  %p2766_p4 = scmp.lt.s32.totalorder %s2757_s16, %s2757_s16 }
  0x29   : > { %p2760_p0 = pnand %p2758_p13, %p3337_p8  ;;  %p2767_p7 = por %p2766_p4, %p2765_p5 }
  0x2b   : > { %p2761_p2 = pneg %p2760_p0 }
  0x2d   : > { %p2768_p9 = pnand %p2767_p7, %p2761_p2 }
  0x2f   : > { %2771 = shalt.err (!%p2768_p9)
}
  0x30   : > { %s4767_s17 = smov 256   ;;  %s4768_s18 = smov 16  }
  0x31   : > { %2552 = dma.hbm_to_vmem [thread:$0]  (!%p3321_p6), %s4825_s1, 512, %s3310_s26, [#allocation7], %s4767_s17, %s4767_s17, %s4768_s18  }
  0x32   : > { %s4827_s3 = sld [smem:[#allocation50_spill]] }
  0x38   : > { %s2772_s16 = scalar_lea.hbm %s4827_s3, 512 }
  0x39   : > { %p2773_p4 = scmp.ne.s32.totalorder %s4827_s3, %s2772_s16  ;;  %p2779_p12 = scmp.lt.u32.totalorder %s2772_s16, %s4827_s3 }
  0x3b   : > { %p2775_p10 = pnand %p2773_p4, %p3337_p8 }
  0x3d   : > { %p2776_p11 = pneg %p2775_p10 }
  0x3f   : > { %p2781_p13 = pnand %p2779_p12, %p2776_p11 }
  0x41   : > { %2784 = shalt.err (!%p2781_p13)
}
  0x42   : > { %s2785_s26 = scalar_lea.vmem %s3325_s30, 512  ;;  %p2793_p7 = scmp.lt.s32.totalorder %s3325_s30, %s3325_s30 }
  0x43   : > { %p2786_p0 = scmp.ne.s32.totalorder %s3325_s30, %s2785_s26  ;;  %p2794_p9 = scmp.lt.s32.totalorder %s2785_s26, %s2785_s26 }
  0x45   : > { %p2788_p2 = pnand %p2786_p0, %p3337_p8  ;;  %p2795_p4 = por %p2794_p9, %p2793_p7 }
  0x47   : > { %p2789_p5 = pneg %p2788_p2 }
  0x49   : > { %p2796_p10 = pnand %p2795_p4, %p2789_p5 }
  0x4b   : > { %2799 = shalt.err (!%p2796_p10)
}
  0x4c   : > { %2558 = dma.hbm_to_vmem [thread:$0]  (!%p3321_p6), %s4827_s3, 512, %s3325_s30, [#allocation10], %s4767_s17, %s4767_s17, %s4768_s18  }
  0x4d   : > { %s2800_s19 = scalar_lea.hbm %s4753_s5, 640 }
  0x4e   : > { %p2801_p11 = scmp.ne.s32.totalorder %s4753_s5, %s2800_s19  ;;  %p2807_p0 = scmp.lt.u32.totalorder %s2800_s19, %s4753_s5 }
  0x50   : > { %p2803_p12 = pnand %p2801_p11, %p3337_p8 }
  0x52   : > { %p2804_p13 = pneg %p2803_p12 }
  0x54   : > { %p2809_p2 = pnand %p2807_p0, %p2804_p13 }
  0x56   : > { %2812 = shalt.err (!%p2809_p2)
}
  0x57   : > { %s2813_s30 = scalar_lea.vmem %s3327_s15, 640  ;;  %p2821_p4 = scmp.lt.s32.totalorder %s3327_s15, %s3327_s15 }
  0x58   : > { %p2814_p5 = scmp.ne.s32.totalorder %s3327_s15, %s2813_s30  ;;  %p2822_p10 = scmp.lt.s32.totalorder %s2813_s30, %s2813_s30 }
  0x5a   : > { %p2816_p7 = pnand %p2814_p5, %p3337_p8  ;;  %p2823_p11 = por %p2822_p10, %p2821_p4 }
  0x5c   : > { %p2817_p9 = pneg %p2816_p7 }
  0x5e   : > { %p2824_p12 = pnand %p2823_p11, %p2817_p9 }
  0x60   : > { %2827 = shalt.err (!%p2824_p12)
}
  0x61   : > { %s3179_s26 = smov 128   ;;  %s3180_s0 = smov 8  }
  0x62   : > { %2564 = dma.hbm_to_vmem [thread:$0]  (!%p3321_p6), %s4753_s5, 640, %s3327_s15, [#allocation13], %s3179_s26, %s3179_s26, %s3180_s0  }
  0x63   : > { %s3181_s28 = smov [#allocation15]   ;;  %s3182_s20 = smov [#allocation18]  }
  0x64   : > { %s411_s19 = sshll.u32 %s3181_s28, 4  ;;  %s433_s29 = sshll.u32 %s3182_s20, 4  ;;  %s412_s19 = int_to_ptr.vmem [resolvable:$true] %s411_s19  ;;  %s434_s29 = int_to_ptr.vmem [resolvable:$true] %s433_s29 }
  0x65   : > { %s2828_s30 = scalar_lea.hbm %s4755_s7, 128 }
  0x66   : > { %p2829_p13 = scmp.ne.s32.totalorder %s4755_s7, %s2828_s30  ;;  %p2835_p5 = scmp.lt.u32.totalorder %s2828_s30, %s4755_s7 }
  0x68   : > { %p2831_p0 = pnand %p2829_p13, %p3337_p8 }
  0x6a   : > { %p2832_p2 = pneg %p2831_p0 }
  0x6c   : > { %p2837_p7 = pnand %p2835_p5, %p2832_p2 }
  0x6e   : > { %2840 = shalt.err (!%p2837_p7)
}
  0x6f   : > { %s2841_s15 = scalar_lea.vmem %s412_s19, 128  ;;  %p2849_p11 = scmp.lt.s32.totalorder %s412_s19, %s412_s19 }
  0x70   : > { %p2842_p9 = scmp.ne.s32.totalorder %s412_s19, %s2841_s15  ;;  %p2850_p12 = scmp.lt.s32.totalorder %s2841_s15, %s2841_s15 }
  0x72   : > { %p2844_p4 = pnand %p2842_p9, %p3337_p8  ;;  %p2851_p1 = por %p2850_p12, %p2849_p11 }
  0x74   : > { %p2845_p10 = pneg %p2844_p4 }
  0x76   : > { %p2852_p3 = pnand %p2851_p1, %p2845_p10 }
  0x78   : > { %2855 = shalt.err (!%p2852_p3)
}
  0x79   : > { %2570 = dma.hbm_to_vmem [thread:$0]  (!%p3321_p6), %s4755_s7, 128, %s412_s19, [#allocation16]  }
  0x7a   : > { %s2856_s26 = scalar_lea.hbm %s4757_s9, 128 }
  0x7b   : > { %p2857_p13 = scmp.ne.s32.totalorder %s4757_s9, %s2856_s26  ;;  %p2863_p3 = scmp.lt.u32.totalorder %s2856_s26, %s4757_s9 }
  0x7d   : > { %p2859_p0 = pnand %p2857_p13, %p3337_p8 }
  0x7f   : > { %p2860_p1 = pneg %p2859_p0 }
  0x81   : > { %p2865_p2 = pnand %p2863_p3, %p2860_p1 }
  0x83   : > { %2868 = shalt.err (!%p2865_p2)
}
  0x84   : > { %s2869_s20 = scalar_lea.vmem %s434_s29, 128  ;;  %p2877_p4 = scmp.lt.s32.totalorder %s434_s29, %s434_s29 }
  0x85   : > { %p2870_p5 = scmp.ne.s32.totalorder %s434_s29, %s2869_s20  ;;  %p2878_p10 = scmp.lt.s32.totalorder %s2869_s20, %s2869_s20 }
  0x87   : > { %p2872_p7 = pnand %p2870_p5, %p3337_p8  ;;  %p2879_p11 = por %p2878_p10, %p2877_p4 }
  0x89   : > { %p2873_p9 = pneg %p2872_p7 }
  0x8b   : > { %p2880_p12 = pnand %p2879_p11, %p2873_p9 }
  0x8d   : > { %2883 = shalt.err (!%p2880_p12)
}
  0x8e   : > { %2576 = dma.hbm_to_vmem [thread:$0]  (!%p3321_p6), %s4757_s9, 128, %s434_s29, [#allocation19]  }
  0x8f   : > { %s3183_s16 = smov [#allocation8]   ;;  %s3184_s15 = smov [#allocation11]  }
  0x90   : > { %s347_s30 = sshll.u32 %s3183_s16, 4  ;;  %s373_s17 = sshll.u32 %s3184_s15, 4  ;;  %s348_s30 = int_to_ptr.vmem [resolvable:$true] %s347_s30  ;;  %s374_s17 = int_to_ptr.vmem [resolvable:$true] %s373_s17 }
  0x91   : > { %s2884_s3 = scalar_lea.hbm %s4750_s2, 1024 }
  0x92   : > { %p2885_p13 = scmp.ne.s32.totalorder %s4750_s2, %s2884_s3  ;;  %p2891_p3 = scmp.lt.u32.totalorder %s2884_s3, %s4750_s2 }
  0x94   : > { %p2887_p0 = pnand %p2885_p13, %p3337_p8 }
  0x96   : > { %p2888_p1 = pneg %p2887_p0 }
  0x98   : > { %p2893_p2 = pnand %p2891_p3, %p2888_p1 }
  0x9a   : > { %2896 = shalt.err (!%p2893_p2)
}
  0x9b   : > { %s2897_s29 = scalar_lea.vmem %s348_s30, 1024  ;;  %p2905_p4 = scmp.lt.s32.totalorder %s348_s30, %s348_s30 }
  0x9c   : > { %p2898_p5 = scmp.ne.s32.totalorder %s348_s30, %s2897_s29  ;;  %p2906_p10 = scmp.lt.s32.totalorder %s2897_s29, %s2897_s29 }
  0x9e   : > { %p2900_p7 = pnand %p2898_p5, %p3337_p8  ;;  %p2907_p11 = por %p2906_p10, %p2905_p4 }
  0xa0   : > { %p2901_p9 = pneg %p2900_p7 }
  0xa2   : > { %p2908_p12 = pnand %p2907_p11, %p2901_p9 }
  0xa4   : > { %2911 = shalt.err (!%p2908_p12)
}
  0xa5   : > { %s4828_s28 = smov 16   ;;  %s4829_s20 = smov 256  }
  0xa6   : > { %2555 = dma.hbm_to_vmem [thread:$0]  (!%p3321_p6), %s4750_s2, 1024, %s348_s30, [#allocation7], %s4829_s20, %s4829_s20, %s4828_s28  }
  0xa7   : > { %s2912_s18 = scalar_lea.hbm %s4752_s4, 320 }
  0xa8   : > { %p2913_p13 = scmp.ne.s32.totalorder %s4752_s4, %s2912_s18  ;;  %p2919_p3 = scmp.lt.u32.totalorder %s2912_s18, %s4752_s4 }
  0xaa   : > { %p2915_p0 = pnand %p2913_p13, %p3337_p8 }
  0xac   : > { %p2916_p1 = pneg %p2915_p0 }
  0xae   : > { %p2921_p2 = pnand %p2919_p3, %p2916_p1 }
  0xb0   : > { %2924 = shalt.err (!%p2921_p2)
}
  0xb1   : > { %s2925_s12 = scalar_lea.vmem %s374_s17, 320  ;;  %p2933_p4 = scmp.lt.s32.totalorder %s374_s17, %s374_s17 }
  0xb2   : > { %p2926_p5 = scmp.ne.s32.totalorder %s374_s17, %s2925_s12  ;;  %p2934_p10 = scmp.lt.s32.totalorder %s2925_s12, %s2925_s12 }
  0xb4   : > { %p2928_p7 = pnand %p2926_p5, %p3337_p8  ;;  %p2935_p11 = por %p2934_p10, %p2933_p4 }
  0xb6   : > { %p2929_p9 = pneg %p2928_p7 }
  0xb8   : > { %p2936_p12 = pnand %p2935_p11, %p2929_p9 }
  0xba   : > { %2939 = shalt.err (!%p2936_p12)
}
  0xbb   : > { %s3185_s30 = smov 64   ;;  %s3186_s27 = smov 4  }
  0xbc   : > { %2561 = dma.hbm_to_vmem [thread:$0]  (!%p3321_p6), %s4752_s4, 320, %s374_s17, [#allocation10], %s3185_s30, %s3185_s30, %s3186_s27  }
  0xbd   : > { %s3187_s20 = smov [#allocation14]   ;;  %s3188_s14 = smov [#allocation17]  }
  0xbe   : > { %s400_s19 = sshll.u32 %s3187_s20, 4  ;;  %s422_s16 = sshll.u32 %s3188_s14, 4  ;;  %s401_s19 = int_to_ptr.vmem [resolvable:$true] %s400_s19  ;;  %s423_s16 = int_to_ptr.vmem [resolvable:$true] %s422_s16 }
  0xbf   : > { %s2940_s1 = scalar_lea.hbm %s4754_s6, 128 }
  0xc0   : > { %p2941_p13 = scmp.ne.s32.totalorder %s4754_s6, %s2940_s1  ;;  %p2947_p3 = scmp.lt.u32.totalorder %s2940_s1, %s4754_s6 }
  0xc2   : > { %p2943_p0 = pnand %p2941_p13, %p3337_p8 }
  0xc4   : > { %p2944_p1 = pneg %p2943_p0 }
  0xc6   : > { %p2949_p2 = pnand %p2947_p3, %p2944_p1 }
  0xc8   : > { %2952 = shalt.err (!%p2949_p2)
}
  0xc9   : > { %s2953_s17 = scalar_lea.vmem %s401_s19, 128  ;;  %p2961_p4 = scmp.lt.s32.totalorder %s401_s19, %s401_s19 }
  0xca   : > { %p2954_p5 = scmp.ne.s32.totalorder %s401_s19, %s2953_s17  ;;  %p2962_p10 = scmp.lt.s32.totalorder %s2953_s17, %s2953_s17 }
  0xcc   : > { %p2956_p7 = pnand %p2954_p5, %p3337_p8  ;;  %p2963_p11 = por %p2962_p10, %p2961_p4 }
  0xce   : > { %p2957_p9 = pneg %p2956_p7 }
  0xd0   : > { %p2964_p12 = pnand %p2963_p11, %p2957_p9 }
  0xd2   : > { %2967 = shalt.err (!%p2964_p12)
}
  0xd3   : > { %2567 = dma.hbm_to_vmem [thread:$0]  (!%p3321_p6), %s4754_s6, 128, %s401_s19, [#allocation13]  }
  0xd4   : > { %s2968_s20 = scalar_lea.hbm %s4756_s8, 256 }
  0xd5   : > { %p2969_p13 = scmp.ne.s32.totalorder %s4756_s8, %s2968_s20  ;;  %p2975_p3 = scmp.lt.u32.totalorder %s2968_s20, %s4756_s8 }
  0xd7   : > { %p2971_p0 = pnand %p2969_p13, %p3337_p8 }
  0xd9   : > { %p2972_p1 = pneg %p2971_p0 }
  0xdb   : > { %p2977_p2 = pnand %p2975_p3, %p2972_p1 }
  0xdd   : > { %2980 = shalt.err (!%p2977_p2)
}
  0xde   : > { %s2981_s3 = scalar_lea.vmem %s423_s16, 256  ;;  %p2989_p4 = scmp.lt.s32.totalorder %s423_s16, %s423_s16 }
  0xdf   : > { %p2982_p5 = scmp.ne.s32.totalorder %s423_s16, %s2981_s3  ;;  %p2990_p10 = scmp.lt.s32.totalorder %s2981_s3, %s2981_s3 }
  0xe1   : > { %p2984_p7 = pnand %p2982_p5, %p3337_p8  ;;  %p2991_p11 = por %p2990_p10, %p2989_p4 }
  0xe3   : > { %p2985_p9 = pneg %p2984_p7 }
  0xe5   : > { %p2992_p12 = pnand %p2991_p11, %p2985_p9 }
  0xe7   : > { %2995 = shalt.err (!%p2992_p12)
}
  0xe8   : > { %2573 = dma.hbm_to_vmem [thread:$0]  (!%p3321_p6), %s4756_s8, 256, %s423_s16, [#allocation16]  }
  0xe9   : > { %s3189_s0 = smov [#allocation20]   ;;  %s3190_s17 = smov [#allocation21]  }
  0xea   : > { %s444_s12 = sshll.u32 %s3189_s0, 4  ;;  %s455_s30 = sshll.u32 %s3190_s17, 4  ;;  %s445_s12 = int_to_ptr.vmem [resolvable:$true] %s444_s12  ;;  %s456_s30 = int_to_ptr.vmem [resolvable:$true] %s455_s30 }
  0xeb   : > { %s2996_s28 = scalar_lea.hbm %s4758_s10, 64 }
  0xec   : > { %p2997_p13 = scmp.ne.s32.totalorder %s4758_s10, %s2996_s28  ;;  %p3003_p3 = scmp.lt.u32.totalorder %s2996_s28, %s4758_s10 }
  0xee   : > { %p2999_p0 = pnand %p2997_p13, %p3337_p8 }
  0xf0   : > { %p3000_p1 = pneg %p2999_p0 }
  0xf2   : > { %p3005_p2 = pnand %p3003_p3, %p3000_p1 }
  0xf4   : > { %3008 = shalt.err (!%p3005_p2)
}
  0xf5   : > { %s3009_s16 = scalar_lea.vmem %s445_s12, 64  ;;  %p3017_p4 = scmp.lt.s32.totalorder %s445_s12, %s445_s12 }
  0xf6   : > { %p3010_p5 = scmp.ne.s32.totalorder %s445_s12, %s3009_s16  ;;  %p3018_p10 = scmp.lt.s32.totalorder %s3009_s16, %s3009_s16 }
  0xf8   : > { %p3012_p7 = pnand %p3010_p5, %p3337_p8  ;;  %p3019_p11 = por %p3018_p10, %p3017_p4 }
  0xfa   : > { %p3013_p9 = pneg %p3012_p7 }
  0xfc   : > { %p3020_p12 = pnand %p3019_p11, %p3013_p9 }
  0xfe   : > { %3023 = shalt.err (!%p3020_p12)
}
  0xff   : > { %2579 = dma.hbm_to_vmem [thread:$0]  (!%p3321_p6), %s4758_s10, 64, %s445_s12, [#allocation19]  }
 0x100   : > { %s3024_s0 = scalar_lea.hbm %s4759_s11, 128 }
 0x101   : > { %p3025_p13 = scmp.ne.s32.totalorder %s4759_s11, %s3024_s0  ;;  %p3031_p3 = scmp.lt.u32.totalorder %s3024_s0, %s4759_s11 }
 0x103   : > { %p3027_p0 = pnand %p3025_p13, %p3337_p8 }
 0x105   : > { %p3028_p1 = pneg %p3027_p0 }
 0x107   : > { %p3033_p2 = pnand %p3031_p3, %p3028_p1 }
 0x109   : > { %3036 = shalt.err (!%p3033_p2)
}
 0x10a   : > { %s3037_s20 = scalar_lea.vmem %s456_s30, 128  ;;  %p3045_p4 = scmp.lt.s32.totalorder %s456_s30, %s456_s30 }
 0x10b   : > { %p3038_p5 = scmp.ne.s32.totalorder %s456_s30, %s3037_s20  ;;  %p3046_p10 = scmp.lt.s32.totalorder %s3037_s20, %s3037_s20 }
 0x10d   : > { %p3040_p7 = pnand %p3038_p5, %p3337_p8  ;;  %p3047_p11 = por %p3046_p10, %p3045_p4 }
 0x10f   : > { %p3041_p9 = pneg %p3040_p7 }
 0x111   : > { %p3048_p12 = pnand %p3047_p11, %p3041_p9 }
 0x113   : > { %3051 = shalt.err (!%p3048_p12)
}
 0x114   : > { %s4830_s25 = sld [smem:[#allocation32_spill]]  ;;  %s2440_s15 = sadd.s32 4294967294, %s3172_s24  }
 0x115   : > { %2582 = dma.hbm_to_vmem [thread:$0]  (!%p3321_p6), %s4759_s11, 128, %s456_s30, [#allocation22]  }
 0x116   : > { %s3559_s13 = sadd.s32 1, %s3172_s24   ;;  %s41_s18 = sadd.s32 1, %s3168_s23 }
 0x117   : > { %s38_s16 = ssub.s32 %s3172_s24, %s3559_s13  ;;  %p48_p8 = scmp.ne.s32.totalorder %s3168_s23, %s3164_s22 }
 0x118   : > { %p39_p13 = scmp.eq.s32.totalorder %s38_s16, 0  ;;  %p49_p0 = scmp.eq.s32.totalorder %s3172_s24, 0 }
 0x119   : > { %p54_p1 = scmp.ne.s32.totalorder %s3164_s22, %s3160_s21  ;;  %p315_p9 = scmp.eq.s32.totalorder %s2440_s15, 1 }
 0x11a   : > { %p309_p3 = scmp.eq.s32.totalorder %s4830_s25, 1  ;;  %p50_p2 = por %p49_p0, %p48_p8 }
 0x11b   : > { %s3571_s1 = scalar_select %p39_p13, %s3168_s23, %s41_s18  }
 0x11c   : > { %p4831_p5 = scmp.eq.s32.totalorder %s4830_s25, 0  ;;  %p3579_p6 = por %p309_p3, %p48_p8 }
 0x11d   : > { %p2602_p4 = scmp.lt.s32.totalorder %s3172_s24, 2  ;;  %s466_s19 = sand.u32 1, %s3168_s23  }
 0x11e   : > { %p3575_p7 = por %p4831_p5, %p54_p1  ;;  %p3585_p10 = por %p315_p9, %p54_p1 }
 0x11f   : > { %s4833_s30 = scalar_select %p3579_p6, 1, 0 }
 0x120   : > { %s4834_s26 = scalar_select %p3585_p10, 1, 0 }
 0x121   : > { %s2454_s0 = sshll.u32 %s466_s19, 3  ;;  %s2495_s17 = sshll.u32 %s3172_s24, 7 }
 0x122   : > { %s4835_s28 = sld [smem:[#allocation48_spill]]  ;;  %s470_s12 = scalar_lea.vmem [#allocation3], %s2454_s0 }
 0x123   : > { %s478_s14 = sshll.u32 %s470_s12, 4  ;;  %p3595_p11 = pnand %p2602_p4, %p50_p2  ;;  %s3599_s14 = int_to_ptr.vmem [resolvable:$true] %s478_s14 }
 0x124   : > { %s467_s15 = scalar_lea.sflag [#allocation4], %s466_s19 }
 0x125   : > { %p3054_p8 = pneg %p3595_p11 }
 0x128   : > { %s3593_s20 = scalar_lea.hbm %s4835_s28, %s2495_s17  ;;  %s3057_s17 = scalar_lea.hbm %s4835_s28, 256 }
 0x129   : > { %s3052_s18 = scalar_lea.hbm %s3593_s20, 128  ;;  %p3058_p1 = scmp.lt.u32.totalorder %s3593_s20, %s4835_s28 }
 0x12a   : > { %p3053_p12 = scmp.ne.s32.totalorder %s3593_s20, %s3052_s18  ;;  %p3059_p3 = scmp.lt.u32.totalorder %s3057_s17, %s3052_s18 }
 0x12b   : > { %p3061_p5 = scmp.lt.u32.totalorder %s3052_s18, %s3593_s20 }
 0x12c   : > { %p3055_p13 = pnand %p3054_p8, %p3053_p12  ;;  %p3060_p2 = por %p3059_p3, %p3058_p1 }
 0x12e   : > { %p3056_p0 = pneg %p3055_p13  ;;  %p3062_p9 = por %p3061_p5, %p3060_p2 }
 0x130   : > { %p3063_p4 = pnand %p3062_p9, %p3056_p0 }
 0x132   : > { %3066 = shalt.err (!%p3063_p4)
}
 0x133   : > { %s3067_s19 = scalar_lea.vmem %s3599_s14, 128  ;;  %s3191_s12 = smov [#allocation3]  }
 0x134   : > { %p3068_p12 = scmp.ne.s32.totalorder %s3599_s14, %s3067_s19  ;;  %s3072_s16 = sshll.u32 %s3191_s12, 4  ;;  %s3073_s16 = int_to_ptr.vmem [resolvable:$false] %s3072_s16 }
 0x135   : > { %s3074_s0 = scalar_lea.vmem %s3073_s16, 256  ;;  %p3075_p6 = scmp.lt.s32.totalorder %s3599_s14, %s3073_s16 }
 0x136   : > { %p3070_p13 = pnand %p3068_p12, %p3054_p8  ;;  %p3076_p1 = scmp.lt.s32.totalorder %s3074_s0, %s3067_s19 }
 0x138   : > { %p3071_p10 = pneg %p3070_p13  ;;  %p3077_p3 = por %p3076_p1, %p3075_p6 }
 0x13a   : > { %p3078_p2 = pnand %p3077_p3, %p3071_p10 }
 0x13c   : > { %3081 = shalt.err (!%p3078_p2)
}
 0x13d   : > { %2586 = dma.hbm_to_vmem [thread:$0]  (!%p3595_p11), %s3593_s20, 128, %s3599_s14, %s467_s15  }
 0x13e   : > { %s4837_s18 = sld [smem:[#allocation33_spill]] }
 0x144   : > { %p4838_p0 = scmp.ne.s32.totalorder %s4837_s18, 0 }
 0x146   : > { %487 = sbr.rel (%p4838_p0) target bundleno = 1205 (0x4b5), region = 68 }
 0x14d   : > { %s3629_s17 = sand.u32 1, %s3164_s22  }
 0x14e   : > { %s2458_s27 = sshll.u32 %s3629_s17, 3  ;;  %s490_s29 = scalar_lea.sflag [#allocation4], %s3629_s17 }
 0x14f   : > { %s493_s19 = scalar_lea.vmem [#allocation3], %s2458_s27 }
 0x150   : > { %3127 = dma.done.wait (%p3575_p7), %s490_s29, 128  }
 0x151   : > { %3129 = vsyncadd (%p3575_p7), %s490_s29, 4294967168  ;;  %s4839_s25 = sld [smem:[#allocation32_spill]] }
 0x157   : > { %p4840_p6 = scmp.eq.s32.totalorder %s4839_s25, 0 }
 0x159   : > { %3131 = dma.done.wait (%p4840_p6), [#allocation7], 1536   ;;  %p4841_p10 = pmov %p4840_p6 }
 0x15a   : > { %p4842_p11 = pmov %p4840_p6 }
 0x15b   : > { %3133 = vsyncadd (%p4841_p10), [#allocation7], 4294965760 }
 0x15c   : > { %3135 = dma.done.wait (%p4842_p11), [#allocation10], 832   ;;  %p4843_p8 = pmov %p4840_p6 }
 0x15d   : > { %p4844_p5 = pmov %p4840_p6 }
 0x15e   : > { %3137 = vsyncadd (%p4843_p8), [#allocation10], 4294966464 }
 0x15f   : > { %3139 = dma.done.wait (%p4844_p5), [#allocation13], 768   ;;  %p4845_p9 = pmov %p4844_p5 }
 0x160   : > { %p4846_p7 = pmov %p4844_p5 }
 0x161   : > { %3141 = vsyncadd (%p4845_p9), [#allocation13], 4294966528 }
 0x162   : > { %3143 = dma.done.wait (%p4846_p7), [#allocation16], 384   ;;  %p4847_p4 = pmov %p4844_p5 }
 0x164   : > { %3145 = vsyncadd (%p4847_p4), [#allocation16], 4294966912  ;;  %p4848_p12 = pmov %p4847_p4 }
 0x165   : > { %p4849_p13 = pmov %p4847_p4 }
 0x166   : > { %3147 = dma.done.wait (%p4848_p12), [#allocation19], 192  }
 0x167   : > { %3149 = vsyncadd (%p4849_p13), [#allocation19], 4294967104  ;;  %p4850_p1 = pmov %p4847_p4 }
 0x169   : > { %3151 = dma.done.wait (%p4850_p1), [#allocation22], 128   ;;  %p4851_p3 = pmov %p4850_p1 }
 0x16a   : > { %v4800_v0 = vmov 0   ;;  %v3664_v1 = vld [vmem:[%s493_s19] sm:$0xff]  ;;  %vm644_vm0 = vcmask 1043456   ;;  %v2734_v5 = vld [vmem:[#allocation11] sm:$0xff]   ;;  %vm634_vm1 = vcmask 64512   ;;  %v2735_v13 = vld [vmem:[#allocation11 + $0x8] sm:$0xff]   ;;  %v720_v57 = vlaneseq }
 0x16b   : > { %3153 = vsyncadd (%p4851_p3), [#allocation22], 4294967168  ;;  %683 = vmatprep.mubr.bf16.mxu0 %v4800_v0  ;;  %2690 = vset.pattern.permute.xlu0 %v4800_v0  ;;  %4852 = vst [vmem:[#allocation34_spill] sm:$0xff] %v3664_v1  ;;  %v2475_v2 = vcombine.high %v3664_v1, %v3664_v1  ;;  %v2474_v3 = vcombine.low %v3664_v1, %v3664_v1  ;;  %v587_v6 = vld [vmem:[#allocation12 + $0x8] sm:$0xff]  ;;  %v589_v7 = vld [vmem:[#allocation12 + $0x18] sm:$0xff]  ;;  %v4802_v8 = vunpack.c.l.bf16 %v3664_v1  ;;  %v4801_v9 = vunpack.c.h.bf16 %v3664_v1  ;;  %s4780_s3 = smov 17  }
 0x16c   : > { %2691 = vset.pattern.permute.xlu1 %v4800_v0  ;;  %598 = vperm.xlu0 %2690, %v587_v6   ;;  %v588_v10 = vld [vmem:[#allocation12 + $0x10] sm:$0xff]  ;;  %v590_v11 = vld [vmem:[#allocation12 + $0x20] sm:$0xff]  ;;  %v2736_v14 = vld [vmem:[#allocation11 + $0x10] ss:$0 sps:$4 sm:$0xff]   ;;  %s3194_s20 = smov 15   ;;  %s4816_s14 = smov 16  }
 0x16d   : > { %2476 = vmatprep.subr.msk.bf16.mxu0 %vm644_vm0, %v2475_v2  ;;  %v646_v4 = vsel %vm644_vm0, %v2474_v3, 0  ;;  %608 = vperm.xlu1 %2691, %v589_v7   ;;  %v3680_v12 = vpack.i.bf16 %v4801_v9, %v4802_v8  ;;  %s4788_s15 = smov 1   ;;  %s4772_s12 = smov 127   ;;  %v3780_v37 = vld [vmem:[#allocation14] sm:$0xff]  ;;  %vm984_vm2 = vcmask 130048   ;;  %v730_v61 = vshrl.u32 %v720_v57, 7 }
 0x16e   : > { %652 = vmatpush1.bf16.msra.mxu0 %v646_v4  ;;  %s4790_s16 = smov 113   ;;  %s4786_s0 = smov 112   ;;  %v2481_v38 = vcombine.high %v3780_v37, %v3780_v37  ;;  %v3910_v63 = vand.u32 127, %v720_v57  ;;  %v727_v3 = vld [vmem:[#allocation6] ss:$8 sm:$0x3] }
 0x16f   : > { %s4774_s18 = smov 111   ;;  %s4776_s27 = smov 34   ;;  %v3914_v4 = vsub.s32 1, %v730_v61  ;;  %v759_v7 = vld [vmem:[#allocation6 + $0x1] ss:$8 sm:$0x3] }
 0x170   : > { %603 = vperm.xlu0 %2690, %v588_v10   ;;  %2482 = vmatprep.mubr.msk.bf16.mxu1 %vm984_vm2, %v2481_v38  ;;  %s3202_s29 = smov 33   ;;  %s3203_s19 = smov 32   ;;  %vm722_vm3 = vcmp.lt.s32.totalorder %v3910_v63, 17  ;;  %vm753_vm4 = vcmp.lt.s32.totalorder %v3910_v63, 16  ;;  %vm785_vm5 = vcmp.lt.s32.totalorder %v3910_v63, 15  ;;  %vm817_vm6 = vcmp.lt.s32.totalorder %v3910_v63, 1 }
 0x171   : > { %2477 = vmatmul.mubr.msk.bf16.vlgmr.msra.gmra.mrb[0].mxu0 %vm634_vm1, %v2734_v5  ;;  %613 = vperm.xlu1 %2691, %v590_v11   ;;  %v3916_v5 = vsub.s32 0, %v730_v61  ;;  %v736_v10 = vrot.slane %v727_v3, %v3914_v4  ;;  %vm851_vm7 = vcmp.lt.s32.totalorder %v3910_v63, 127  ;;  %vm883_vm8 = vcmp.lt.s32.totalorder %v3910_v63, 113  ;;  %v1076_v8 = vld [vmem:[#allocation8 + $0x1] ss:$8 sm:$0x3] }
 0x172   : > { %693 = vmatprep.mubr.bf16.mxu0 %v4800_v0  ;;  %vm915_vm9 = vcmp.lt.s32.totalorder %v3910_v63, 112  ;;  %vm947_vm10 = vcmp.lt.s32.totalorder %v3910_v63, 111  ;;  %vm1037_vm11 = vcmp.lt.s32.totalorder %v3910_v63, 34  ;;  %vm1070_vm12 = vcmp.lt.s32.totalorder %v3910_v63, 33  ;;  %p4898_p0 = scmp.ne.s32.totalorder %s4833_s30, 0 }
 0x173   : > { %vm1104_vm13 = vcmp.lt.s32.totalorder %v3910_v63, 32  ;;  %vm1138_vm14 = vcmp.lt.s32.totalorder %v3910_v63, 31  ;;  %vm1172_vm15 = vcmp.lt.s32.totalorder %v3910_v63, 30 }
 0x174   : > { %2693 = vrot.lane.b32.xlu0 %v3680_v12, %s4780_s3 }
 0x175   : > { %2698 = vrot.lane.b32.xlu1 %v3680_v12, %s4816_s14 }
 0x178   : > { %2703 = vrot.lane.b32.xlu0 %v3680_v12, %s3194_s20 }
 0x179   : > { %2478 = vmatmul.mubr.msk.bf16.gmra.mrb[4].mxu0 %vm634_vm1, %v2735_v13  ;;  %2708 = vrot.lane.b32.xlu1 %v3680_v12, %s4788_s15 }
 0x17a   : > { %703 = vmatprep.mubr.bf16.mxu0 %v4800_v0 }
 0x181   : > { %2479 = vmatmul.mubr.msk.bf16.gmra.mrb[8].mxu0 %vm634_vm1, %v2736_v14  ;;  %v732_v14 = vrot.slane %v727_v3, %v3916_v5 }
 0x1eb   : > { %v599_v17 = vpop.permute.xlu0 %598 }
 0x1ec   : > { %v3771_v35 = vpop.permute.xlu1 %608 }
 0x1ef   : > { %v604_v21 = vpop.permute.xlu0 %603 }
 0x1f0   : > { %v3786_v39 = vpop.permute.xlu1 %613 }
 0x1f3   : > { %v3830_v41 = vpop.permute.xlu0 %2693 }
 0x1f4   : > { %v3840_v43 = vpop.permute.xlu1 %2698 }
 0x1f5   : > { %4856 = vst [vmem:[#allocation38_spill] sm:$0xff] %v3840_v43 }
 0x1f7   : > { %v3838_v42 = vpop.permute.xlu0 %2703 }
 0x1f8   : > { %4855 = vst [vmem:[#allocation37_spill] sm:$0xff] %v3838_v42  ;;  %v3848_v45 = vpop.permute.xlu1 %2708 }
 0x1f9   : > { %4857 = vst [vmem:[#allocation39_spill] sm:$0xff] %v3848_v45  ;;  %v1081_v45 = vrot.slane %v1076_v8, %v3916_v5 }
 0x244   : > { %v3693_v15 = vpop.f32.mrb[0].mxu0 }
 0x245   : > { %4853 = vst [vmem:[#allocation35_spill] sm:$0xff] %v3693_v15  ;;  %v3695_v16 = vpop.f32.mrb[1].mxu0 }
 0x246   : > { %4854 = vst [vmem:[#allocation36_spill] sm:$0xff] %v3695_v16  ;;  %v689_v18 = vpop.f32.mrb[2].mxu0  ;;  %v972_v16 = vld [vmem:[#allocation15] sm:$0xff] }
 0x247   : > { %v3697_v19 = vadd.f32 %v689_v18, %v599_v17  ;;  %v691_v20 = vpop.f32.mrb[3].mxu0 }
 0x248   : > { %v3705_v25 = vadd.f32 %v691_v20, %v599_v17  ;;  %v764_v20 = vrot.slane %v759_v7, %v3916_v5 }
 0x249   : > { %712 = vrot.lane.b32.xlu0 %v3697_v19, %s4780_s3 }
 0x24c   : > { %v695_v22 = vpop.f32.mrb[4].mxu0 }
 0x24d   : > { %v3701_v23 = vadd.f32 %v695_v22, %v604_v21  ;;  %v697_v24 = vpop.f32.mrb[5].mxu0  ;;  %745 = vrot.lane.b32.xlu0 %v3697_v19, %s4816_s14 }
 0x24e   : > { %v3707_v26 = vadd.f32 %v697_v24, %v604_v21  ;;  %v699_v27 = vpop.f32.mrb[6].mxu0  ;;  %v768_v21 = vrot.slane %v759_v7, %v3914_v4  ;;  %v791_v24 = vld [vmem:[#allocation6 + $0x2] ss:$8 sm:$0x3] }
 0x24f   : > { %v3709_v28 = vpop.f32.mrb[7].mxu0  ;;  %714 = vrot.lane.b32.xlu1 %v3701_v23, %s4780_s3  ;;  %v841_v29 = vpack.c.bf16 %v3701_v23, %v3697_v19  ;;  %v3776_v36 = vadd.f32 %v699_v27, %v3771_v35  ;;  %v800_v61 = vrot.slane %v791_v24, %v3914_v4 }
 0x250   : > { %v842_v30 = vpack.c.bf16 %v3707_v26, %v3705_v25  ;;  %v3900_v59 = vadd.f32 %v3709_v28, %v3771_v35 }
 0x251   : > { %777 = vrot.lane.b32.xlu0 %v3697_v19, %s3194_s20 }
 0x253   : > { %747 = vrot.lane.b32.xlu1 %v3701_v23, %s4816_s14 }
 0x254   : > { %v705_v31 = vpop.f32.mrb[8].mxu0 }
 0x255   : > { %v3721_v32 = vpop.f32.mrb[9].mxu0  ;;  %809 = vrot.lane.b32.xlu0 %v3697_v19, %s4788_s15  ;;  %v3792_v40 = vadd.f32 %v705_v31, %v3786_v39 }
 0x256   : > { %v709_v33 = vpop.f32.mrb[10].mxu0  ;;  %v3933_v18 = vadd.f32 %v3721_v32, %v3786_v39 }
 0x257   : > { %779 = vrot.lane.b32.xlu1 %v3701_v23, %s3194_s20  ;;  %v710_v34 = vpop.f32.mrb[11].mxu0 }
 0x259   : > { %843 = vrot.lane.b32.xlu0 %v3697_v19, %s4772_s12 }
 0x25b   : > { %811 = vrot.lane.b32.xlu1 %v3701_v23, %s4788_s15 }
 0x25d   : > { %875 = vrot.lane.b32.xlu0 %v3697_v19, %s4790_s16 }
 0x25f   : > { %845 = vrot.lane.b32.xlu1 %v3701_v23, %s4772_s12 }
 0x261   : > { %907 = vrot.lane.b32.xlu0 %v3697_v19, %s4786_s0 }
 0x263   : > { %877 = vrot.lane.b32.xlu1 %v3701_v23, %s4790_s16 }
 0x265   : > { %939 = vrot.lane.b32.xlu0 %v3697_v19, %s4774_s18 }
 0x267   : > { %909 = vrot.lane.b32.xlu1 %v3701_v23, %s4786_s0 }
 0x269   : > { %716 = vrot.lane.b32.xlu0 %v3705_v25, %s4780_s3 }
 0x26b   : > { %941 = vrot.lane.b32.xlu1 %v3701_v23, %s4774_s18 }
 0x26d   : > { %749 = vrot.lane.b32.xlu0 %v3705_v25, %s4816_s14 }
 0x26f   : > { %718 = vrot.lane.b32.xlu1 %v3707_v26, %s4780_s3 }
 0x271   : > { %781 = vrot.lane.b32.xlu0 %v3705_v25, %s3194_s20 }
 0x273   : > { %751 = vrot.lane.b32.xlu1 %v3707_v26, %s4816_s14 }
 0x275   : > { %813 = vrot.lane.b32.xlu0 %v3705_v25, %s4788_s15 }
 0x277   : > { %783 = vrot.lane.b32.xlu1 %v3707_v26, %s3194_s20 }
 0x279   : > { %847 = vrot.lane.b32.xlu0 %v3705_v25, %s4772_s12 }
 0x27b   : > { %815 = vrot.lane.b32.xlu1 %v3707_v26, %s4788_s15 }
 0x27d   : > { %879 = vrot.lane.b32.xlu0 %v3705_v25, %s4790_s16 }
 0x27f   : > { %849 = vrot.lane.b32.xlu1 %v3707_v26, %s4772_s12  ;;  %s4778_s12 = smov 31  }
 0x281   : > { %911 = vrot.lane.b32.xlu0 %v3705_v25, %s4786_s0 }
 0x283   : > { %881 = vrot.lane.b32.xlu1 %v3707_v26, %s4790_s16 }
 0x285   : > { %943 = vrot.lane.b32.xlu0 %v3705_v25, %s4774_s18 }
 0x287   : > { %913 = vrot.lane.b32.xlu1 %v3707_v26, %s4786_s0 }
 0x289   : > { %1029 = vrot.lane.b32.xlu0 %v3776_v36, %s4776_s27 }
 0x28b   : > { %945 = vrot.lane.b32.xlu1 %v3707_v26, %s4774_s18  ;;  %s3205_s18 = smov 30  }
 0x28d   : > { %1062 = vrot.lane.b32.xlu0 %v3776_v36, %s3202_s29 }
 0x28f   : > { %1031 = vrot.lane.b32.xlu1 %v3792_v40, %s4776_s27  ;;  %s3206_s27 = smov 18  }
 0x291   : > { %1096 = vrot.lane.b32.xlu0 %v3776_v36, %s3203_s19 }
 0x293   : > { %1064 = vrot.lane.b32.xlu1 %v3792_v40, %s3202_s29 }
 0x295   : > { %1130 = vrot.lane.b32.xlu0 %v3776_v36, %s4778_s12 }
 0x297   : > { %1098 = vrot.lane.b32.xlu1 %v3792_v40, %s3203_s19 }
 0x299   : > { %1164 = vrot.lane.b32.xlu0 %v3776_v36, %s3205_s18 }
 0x29b   : > { %1132 = vrot.lane.b32.xlu1 %v3792_v40, %s4778_s12  ;;  %s4782_s12 = smov 14  }
 0x29d   : > { %1198 = vrot.lane.b32.xlu0 %v3776_v36, %s3206_s27 }
 0x29f   : > { %1166 = vrot.lane.b32.xlu1 %v3792_v40, %s3205_s18 }
 0x2a1   : > { %1232 = vrot.lane.b32.xlu0 %v3776_v36, %s4780_s3 }
 0x2a3   : > { %1200 = vrot.lane.b32.xlu1 %v3792_v40, %s3206_s27 }
 0x2a5   : > { %1265 = vrot.lane.b32.xlu0 %v3776_v36, %s4816_s14 }
 0x2a7   : > { %1234 = vrot.lane.b32.xlu1 %v3792_v40, %s4780_s3  ;;  %s4784_s3 = smov 2  }
 0x2a9   : > { %1298 = vrot.lane.b32.xlu0 %v3776_v36, %s3194_s20 }
 0x2ab   : > { %1267 = vrot.lane.b32.xlu1 %v3792_v40, %s4816_s14 }
 0x2ad   : > { %1331 = vrot.lane.b32.xlu0 %v3776_v36, %s4782_s12 }
 0x2af   : > { %1300 = vrot.lane.b32.xlu1 %v3792_v40, %s3194_s20 }
 0x2b1   : > { %1537 = vrot.lane.b32.xlu0 %v3776_v36, %s4790_s16 }
 0x2b3   : > { %1333 = vrot.lane.b32.xlu1 %v3792_v40, %s4782_s12  ;;  %s4858_s12 = smov 111  }
 0x2b5   : > { %1365 = vrot.lane.b32.xlu0 %v3776_v36, %s4784_s3 }
 0x2b7   : > { %1539 = vrot.lane.b32.xlu1 %v3792_v40, %s4790_s16  ;;  %s4796_s16 = smov 126  }
 0x2b9   : > { %1570 = vrot.lane.b32.xlu0 %v3776_v36, %s4786_s0 }
 0x2bb   : > { %1367 = vrot.lane.b32.xlu1 %v3792_v40, %s4784_s3  ;;  %v713_v44 = vpop.permute.xlu0 %712  ;;  %s4792_s3 = smov 110  }
 0x2bd   : > { %1399 = vrot.lane.b32.xlu0 %v3776_v36, %s4788_s15 }
 0x2bf   : > { %1572 = vrot.lane.b32.xlu1 %v3792_v40, %s4786_s0  ;;  %v3854_v46 = vpop.permute.xlu0 %745  ;;  %s4859_s0 = smov 127  }
 0x2c1   : > { %v715_v47 = vpop.permute.xlu1 %714  ;;  %1603 = vrot.lane.b32.xlu0 %v3776_v36, %s4858_s12 }
 0x2c3   : > { %1401 = vrot.lane.b32.xlu1 %v3792_v40, %s4788_s15  ;;  %v3860_v48 = vpop.permute.xlu0 %777  ;;  %s4794_s15 = smov 98  }
 0x2c5   : > { %v3862_v49 = vpop.permute.xlu1 %747  ;;  %1636 = vrot.lane.b32.xlu0 %v3776_v36, %s4792_s3 }
 0x2c7   : > { %1605 = vrot.lane.b32.xlu1 %v3792_v40, %s4858_s12  ;;  %v3868_v50 = vpop.permute.xlu0 %809 }
 0x2c9   : > { %v3870_v51 = vpop.permute.xlu1 %779  ;;  %1436 = vrot.lane.b32.xlu0 %v3776_v36, %s4859_s0 }
 0x2cb   : > { %1638 = vrot.lane.b32.xlu1 %v3792_v40, %s4792_s3  ;;  %v3876_v52 = vpop.permute.xlu0 %843  ;;  %s3212_s3 = smov 97  }
 0x2cd   : > { %v3878_v53 = vpop.permute.xlu1 %811  ;;  %1670 = vrot.lane.b32.xlu0 %v3776_v36, %s4794_s15 }
 0x2cf   : > { %1438 = vrot.lane.b32.xlu1 %v3792_v40, %s4859_s0  ;;  %v3884_v54 = vpop.permute.xlu0 %875 }
 0x2d1   : > { %v3886_v55 = vpop.permute.xlu1 %845  ;;  %1469 = vrot.lane.b32.xlu0 %v3776_v36, %s4796_s16 }
 0x2d3   : > { %1672 = vrot.lane.b32.xlu1 %v3792_v40, %s4794_s15  ;;  %v3892_v56 = vpop.permute.xlu0 %907  ;;  %s4860_s15 = smov 34  }
 0x2d5   : > { %v3894_v58 = vpop.permute.xlu1 %877  ;;  %1704 = vrot.lane.b32.xlu0 %v3776_v36, %s3212_s3 }
 0x2d7   : > { %1471 = vrot.lane.b32.xlu1 %v3792_v40, %s4796_s16  ;;  %v3904_v60 = vpop.permute.xlu0 %939  ;;  %s4798_s16 = smov 114  }
 0x2d9   : > { %v3906_v62 = vpop.permute.xlu1 %909  ;;  %1033 = vrot.lane.b32.xlu0 %v3900_v59, %s4860_s15 }
 0x2db   : > { %1706 = vrot.lane.b32.xlu1 %v3792_v40, %s3212_s3  ;;  %v717_v2 = vpop.permute.xlu0 %716 }
 0x2dc   : > { %v723_v13 = vsel %vm722_vm3, %v713_v44, %v717_v2  ;;  %v725_v17 = vsel %vm722_vm3, %v717_v2, %v713_v44  ;;  %v796_v44 = vrot.slane %v791_v24, %v3916_v5 }
 0x2dd   : > { %v3918_v6 = vpop.permute.xlu1 %941  ;;  %1066 = vrot.lane.b32.xlu0 %v3900_v59, %s3202_s29  ;;  %v740_v32 = vmul.f32 %v736_v10, %v723_v13  ;;  %v739_v38 = vmul.f32 %v732_v14, %v725_v17  ;;  %v823_v13 = vld [vmem:[#allocation6 + $0x3] ss:$8 sm:$0x3] }
 0x2df   : > { %1505 = vrot.lane.b32.xlu1 %v3792_v40, %s4798_s16  ;;  %v750_v11 = vpop.permute.xlu0 %749  ;;  %s4861_s16 = smov 31  }
 0x2e0   : > { %v756_v27 = vsel %vm753_vm4, %v750_v11, %v3854_v46  ;;  %v754_v33 = vsel %vm753_vm4, %v3854_v46, %v750_v11 }
 0x2e1   : > { %v719_v22 = vpop.permute.xlu1 %718  ;;  %1100 = vrot.lane.b32.xlu0 %v3900_v59, %s3203_s19  ;;  %v771_v57 = vmul.f32 %v764_v20, %v756_v27  ;;  %v772_v3 = vmul.f32 %v768_v21, %v754_v33  ;;  %v828_v27 = vrot.slane %v823_v13, %v3916_v5 }
 0x2e2   : > { %v726_v28 = vsel %vm722_vm3, %v719_v22, %v715_v47  ;;  %v724_v31 = vsel %vm722_vm3, %v715_v47, %v719_v22 }
 0x2e3   : > { %1035 = vrot.lane.b32.xlu1 %v3933_v18, %s4860_s15  ;;  %v782_v34 = vpop.permute.xlu0 %781  ;;  %v742_v35 = vmul.f32 %v736_v10, %v724_v31  ;;  %v741_v39 = vmul.f32 %v732_v14, %v726_v28  ;;  %v832_v28 = vrot.slane %v823_v13, %v3914_v4  ;;  %s4862_s15 = smov 17  }
 0x2e4   : > { %v786_v7 = vsel %vm785_vm5, %v3860_v48, %v782_v34  ;;  %v788_v14 = vsel %vm785_vm5, %v782_v34, %v3860_v48 }
 0x2e5   : > { %v752_v47 = vpop.permute.xlu1 %751  ;;  %1134 = vrot.lane.b32.xlu0 %v3900_v59, %s4861_s16  ;;  %v744_v2 = vpack.c.bf16 %v742_v35, %v740_v32  ;;  %v743_v46 = vpack.c.bf16 %v741_v39, %v739_v38 }
 0x2e6   : > { %v755_v10 = vsel %vm753_vm4, %v3862_v49, %v752_v47  ;;  %v757_v11 = vsel %vm753_vm4, %v752_v47, %v3862_v49 }
 0x2e7   : > { %v773_v17 = vmul.f32 %v764_v20, %v757_v11  ;;  %v774_v22 = vmul.f32 %v768_v21, %v755_v10  ;;  %1068 = vrot.lane.b32.xlu1 %v3933_v18, %s3202_s29  ;;  %988 = vmatprep.subr.bf16.mxu1 %v744_v2  ;;  %v814_v24 = vpop.permute.xlu0 %813  ;;  %v803_v20 = vmul.f32 %v796_v44, %v788_v14  ;;  %s4867_s29 = smov 1  }
 0x2e8   : > { %989 = vmatpush1.bf16.msra.mxu1 %v743_v46  ;;  %v804_v21 = vmul.f32 %v800_v61, %v786_v7  ;;  %v820_v34 = vsel %vm817_vm6, %v814_v24, %v3868_v50 }
 0x2e9   : > { %v784_v49 = vpop.permute.xlu1 %783  ;;  %1168 = vrot.lane.b32.xlu0 %v3900_v59, %s3205_s18  ;;  %v776_v31 = vpack.c.bf16 %v774_v22, %v772_v3  ;;  %v775_v48 = vpack.c.bf16 %v773_v17, %v771_v57  ;;  %v818_v57 = vsel %vm817_vm6, %v3868_v50, %v814_v24  ;;  %v835_v46 = vmul.f32 %v828_v27, %v820_v34  ;;  %v857_v3 = vld [vmem:[#allocation6 + $0x5] ss:$8 sm:$0x3]  ;;  %v889_v24 = vld [vmem:[#allocation6 + $0x6] ss:$8 sm:$0x3] }
 0x2ea   : > { %v787_v32 = vsel %vm785_vm5, %v3870_v51, %v784_v49  ;;  %v789_v33 = vsel %vm785_vm5, %v784_v49, %v3870_v51  ;;  %v836_v7 = vmul.f32 %v832_v28, %v818_v57  ;;  %v866_v13 = vrot.slane %v857_v3, %v3914_v4 }
 0x2eb   : > { %v805_v35 = vmul.f32 %v796_v44, %v789_v33  ;;  %v806_v38 = vmul.f32 %v800_v61, %v787_v32  ;;  %1102 = vrot.lane.b32.xlu1 %v3933_v18, %s3203_s19  ;;  %990 = vmatprep.subr.bf16.mxu1 %v776_v31  ;;  %v848_v39 = vpop.permute.xlu0 %847  ;;  %v898_v32 = vrot.slane %v889_v24, %v3914_v4  ;;  %s4868_s19 = smov 110  }
 0x2ec   : > { %991 = vmatpush1.bf16.msra.mxu1 %v775_v48  ;;  %v862_v48 = vrot.slane %v857_v3, %v3916_v5  ;;  %v894_v57 = vrot.slane %v889_v24, %v3916_v5 }
 0x2ed   : > { %v816_v47 = vpop.permute.xlu1 %815  ;;  %1202 = vrot.lane.b32.xlu0 %v3900_v59, %s3206_s27  ;;  %v808_v51 = vpack.c.bf16 %v806_v38, %v804_v21  ;;  %v807_v2 = vpack.c.bf16 %v805_v35, %v803_v20  ;;  %v852_v20 = vsel %vm851_vm7, %v3876_v52, %v848_v39  ;;  %v921_v35 = vld [vmem:[#allocation6 + $0x7] ss:$8 sm:$0x3] }
 0x2ee   : > { %v819_v44 = vsel %vm817_vm6, %v3878_v53, %v816_v47  ;;  %v821_v61 = vsel %vm817_vm6, %v816_v47, %v3878_v53  ;;  %v854_v53 = vsel %vm851_vm7, %v848_v39, %v3876_v52 }
 0x2ef   : > { %v837_v50 = vmul.f32 %v828_v27, %v821_v61  ;;  %v838_v10 = vmul.f32 %v832_v28, %v819_v44  ;;  %1136 = vrot.lane.b32.xlu1 %v3933_v18, %s4861_s16  ;;  %992 = vmatprep.subr.bf16.mxu1 %v808_v51  ;;  %v880_v11 = vpop.permute.xlu0 %879  ;;  %v870_v21 = vmul.f32 %v866_v13, %v854_v53  ;;  %v953_v44 = vld [vmem:[#allocation6 + $0x10] ss:$8 sm:$0x3]  ;;  %s4863_s16 = smov 14  }
 0x2f0   : > { %993 = vmatpush1.bf16.msra.mxu1 %v807_v2  ;;  %v884_v47 = vsel %vm883_vm8, %v3884_v54, %v880_v11 }
 0x2f1   : > { %v850_v14 = vpop.permute.xlu1 %849  ;;  %1236 = vrot.lane.b32.xlu0 %v3900_v59, %s4862_s15  ;;  %v840_v17 = vpack.c.bf16 %v838_v10, %v836_v7  ;;  %v839_v22 = vpack.c.bf16 %v837_v50, %v835_v46  ;;  %v901_v50 = vmul.f32 %v894_v57, %v884_v47  ;;  %v926_v10 = vrot.slane %v921_v35, %v3916_v5 }
 0x2f2   : > { %v855_v27 = vsel %vm851_vm7, %v850_v14, %v3886_v55  ;;  %v853_v28 = vsel %vm851_vm7, %v3886_v55, %v850_v14  ;;  %v886_v55 = vsel %vm883_vm8, %v880_v11, %v3884_v54  ;;  %v962_v14 = vrot.slane %v953_v44, %v3914_v4 }
 0x2f3   : > { %v872_v49 = vmul.f32 %v866_v13, %v855_v27  ;;  %1170 = vrot.lane.b32.xlu1 %v3933_v18, %s3205_s18  ;;  %994 = vmatprep.subr.bf16.mxu1 %v840_v17  ;;  %v912_v31 = vpop.permute.xlu0 %911  ;;  %v871_v34 = vmul.f32 %v862_v48, %v853_v28  ;;  %v902_v51 = vmul.f32 %v898_v32, %v886_v55  ;;  %s4864_s18 = smov 113  }
 0x2f4   : > { %995 = vmatpush1.bf16.msra.mxu1 %v839_v22  ;;  %v918_v46 = vsel %vm915_vm9, %v912_v31, %v3892_v56  ;;  %v916_v11 = vsel %vm915_vm9, %v3892_v56, %v912_v31 }
 0x2f5   : > { %v882_v33 = vpop.permute.xlu1 %881  ;;  %1269 = vrot.lane.b32.xlu0 %v3900_v59, %s4816_s14  ;;  %996 = vmatprep.subr.bf16.mxu1 %v842_v30  ;;  %v874_v26 = vpack.c.bf16 %v872_v49, %v870_v21  ;;  %v869_v30 = vmul.f32 %v862_v48, %v852_v20  ;;  %v933_v31 = vmul.f32 %v926_v10, %v916_v11 }
 0x2f6   : > { %v887_v52 = vsel %vm883_vm8, %v882_v33, %v3894_v58  ;;  %v885_v38 = vsel %vm883_vm8, %v3894_v58, %v882_v33  ;;  %v930_v58 = vrot.slane %v921_v35, %v3914_v4  ;;  %v958_v48 = vrot.slane %v953_v44, %v3916_v5 }
 0x2f7   : > { %v904_v39 = vmul.f32 %v898_v32, %v887_v52  ;;  %1204 = vrot.lane.b32.xlu1 %v3933_v18, %s3206_s27  ;;  %v944_v25 = vpop.permute.xlu0 %943  ;;  %v903_v3 = vmul.f32 %v894_v57, %v885_v38  ;;  %v873_v23 = vpack.c.bf16 %v871_v34, %v869_v30  ;;  %s4865_s27 = smov 2  }
 0x2f8   : > { %997 = vmatpush1.bf16.msra.mxu1 %v841_v29  ;;  %v934_v13 = vmul.f32 %v930_v58, %v918_v46  ;;  %v948_v20 = vsel %vm947_vm10, %v3904_v60, %v944_v25 }
 0x2f9   : > { %v914_v2 = vpop.permute.xlu1 %913  ;;  %1302 = vrot.lane.b32.xlu0 %v3900_v59, %s3194_s20  ;;  %998 = vmatprep.subr.bf16.mxu1 %v874_v26  ;;  %v906_v7 = vpack.c.bf16 %v904_v39, %v902_v51  ;;  %v905_v24 = vpack.c.bf16 %v903_v3, %v901_v50  ;;  %v965_v35 = vmul.f32 %v958_v48, %v948_v20 }
 0x2fa   : > { %v919_v19 = vsel %vm915_vm9, %v914_v2, %v3906_v62  ;;  %v917_v29 = vsel %vm915_vm9, %v3906_v62, %v914_v2  ;;  %v950_v62 = vsel %vm947_vm10, %v944_v25, %v3904_v60  ;;  %v2480_v39 = vcombine.low %v3780_v37, %v3780_v37 }
 0x2fb   : > { %v936_v54 = vmul.f32 %v930_v58, %v919_v19  ;;  %1238 = vrot.lane.b32.xlu1 %v3933_v18, %s4862_s15  ;;  %v4060_v61 = vpop.permute.xlu0 %1029  ;;  %v935_v22 = vmul.f32 %v926_v10, %v917_v29  ;;  %v966_v21 = vmul.f32 %v962_v14, %v950_v62  ;;  %s4869_s15 = smov 98   ;;  %v4176_v10 = vld [vmem:[#allocation17] sm:$0xff] }
 0x2fc   : > { %999 = vmatpush1.bf16.msra.mxu1 %v873_v23  ;;  %4872 = vst [vmem:[#allocation40_spill] sm:$0xff] %v4176_v10 }
 0x2fd   : > { %v946_v17 = vpop.permute.xlu1 %945  ;;  %1335 = vrot.lane.b32.xlu0 %v3900_v59, %s4863_s16  ;;  %1000 = vmatprep.subr.bf16.mxu1 %v906_v7  ;;  %v938_v49 = vpack.c.bf16 %v936_v54, %v934_v13  ;;  %v937_v33 = vpack.c.bf16 %v935_v22, %v933_v31  ;;  %v2484_v13 = vcombine.high %v4176_v10, %v4176_v10 }
 0x2fe   : > { %v951_v53 = vsel %vm947_vm10, %v946_v17, %v3918_v6  ;;  %v949_v56 = vsel %vm947_vm10, %v3918_v6, %v946_v17 }
 0x2ff   : > { %v968_v27 = vmul.f32 %v962_v14, %v951_v53  ;;  %1271 = vrot.lane.b32.xlu1 %v3933_v18, %s4816_s14  ;;  %v4080_v28 = vpop.permute.xlu0 %1062  ;;  %v967_v6 = vmul.f32 %v958_v48, %v949_v56  ;;  %1946 = vmatprep.mubr.bf16.mxu0 %v2484_v13  ;;  %v1042_v13 = vld [vmem:[#allocation8] ss:$8 sm:$0x3] }
 0x300   : > { %1001 = vmatpush1.bf16.msra.mxu1 %v905_v24  ;;  %v1051_v15 = vrot.slane %v1042_v13, %v3914_v4 }
 0x301   : > { %v4086_v32 = vpop.permute.xlu1 %1031  ;;  %1541 = vrot.lane.b32.xlu0 %v3900_v59, %s4864_s18  ;;  %1002 = vmatprep.subr.bf16.mxu1 %v938_v49  ;;  %v970_v34 = vpack.c.bf16 %v968_v27, %v966_v21  ;;  %v969_v60 = vpack.c.bf16 %v967_v6, %v965_v35 }
 0x303   : > { %1304 = vrot.lane.b32.xlu1 %v3933_v18, %s3194_s20  ;;  %v4092_v55 = vpop.permute.xlu0 %1096  ;;  %s4866_s20 = smov 112  }
 0x304   : > { %1003 = vmatpush1.bf16.msra.mxu1 %v937_v33 }
 0x305   : > { %v4094_v52 = vpop.permute.xlu1 %1064  ;;  %1369 = vrot.lane.b32.xlu0 %v3900_v59, %s4865_s27  ;;  %1004 = vmatprep.subr.bf16.mxu1 %v970_v34  ;;  %v1841_v34 = vld [vmem:[#allocation17 + $0x8] sm:$0xff] }
 0x307   : > { %1337 = vrot.lane.b32.xlu1 %v3933_v18, %s4863_s16  ;;  %v4100_v38 = vpop.permute.xlu0 %1130  ;;  %s4870_s16 = smov 126  }
 0x308   : > { %1005 = vmatpush1.bf16.msra.mxu1 %v969_v60  ;;  %v2486_v60 = vcombine.high %v1841_v34, %v1841_v34 }
 0x309   : > { %v4104_v25 = vpop.permute.xlu1 %1098  ;;  %1574 = vrot.lane.b32.xlu0 %v3900_v59, %s4866_s20 }
 0x30b   : > { %1543 = vrot.lane.b32.xlu1 %v3933_v18, %s4864_s18  ;;  %v4110_v26 = vpop.permute.xlu0 %1164  ;;  %1021 = vmatmul.mubr.bf16.vlgmr.msra.gmra.mrb[0].mxu1 %v2480_v39  ;;  %v1892_v39 = vld [vmem:[#allocation18] sm:$0xff] }
 0x30c   : > { %2487 = vmatprep.mubr.msk.bf16.mxu1 %vm984_vm2, %v2486_v60  ;;  %vm1206_vm2 = vcmp.lt.s32.totalorder %v3910_v63, 18 }
 0x30d   : > { %v4112_v30 = vpop.permute.xlu1 %1132  ;;  %1403 = vrot.lane.b32.xlu0 %v3900_v59, %s4867_s29 }
 0x30f   : > { %1371 = vrot.lane.b32.xlu1 %v3933_v18, %s4865_s27  ;;  %v4118_v37 = vpop.permute.xlu0 %1198  ;;  %s4871_s27 = smov 114  }
 0x311   : > { %v4120_v57 = vpop.permute.xlu1 %1166  ;;  %1607 = vrot.lane.b32.xlu0 %v3900_v59, %s4858_s12 }
 0x313   : > { %1576 = vrot.lane.b32.xlu1 %v3933_v18, %s4866_s20  ;;  %v4126_v47 = vpop.permute.xlu0 %1232 }
 0x315   : > { %v4128_v51 = vpop.permute.xlu1 %1200  ;;  %1640 = vrot.lane.b32.xlu0 %v3900_v59, %s4868_s19 }
 0x317   : > { %1405 = vrot.lane.b32.xlu1 %v3933_v18, %s4867_s29  ;;  %v4134_v58 = vpop.permute.xlu0 %1265  ;;  %s3214_s29 = smov 96  }
 0x319   : > { %v4136_v2 = vpop.permute.xlu1 %1234  ;;  %1440 = vrot.lane.b32.xlu0 %v3900_v59, %s4859_s0 }
 0x31b   : > { %1609 = vrot.lane.b32.xlu1 %v3933_v18, %s4858_s12  ;;  %v4142_v46 = vpop.permute.xlu0 %1298 }
 0x31d   : > { %v4144_v3 = vpop.permute.xlu1 %1267  ;;  %1674 = vrot.lane.b32.xlu0 %v3900_v59, %s4869_s15 }
 0x31f   : > { %1642 = vrot.lane.b32.xlu1 %v3933_v18, %s4868_s19  ;;  %v4150_v44 = vpop.permute.xlu0 %1331  ;;  %s2496_s19 = sshll.u32 %s4839_s25, 10  ;;  %s2249_s25 = scalar_lea.sflag [#allocation5], %s3629_s17 }
 0x321   : > { %v4152_v19 = vpop.permute.xlu1 %1300  ;;  %1473 = vrot.lane.b32.xlu0 %v3900_v59, %s4870_s16 }
 0x323   : > { %1442 = vrot.lane.b32.xlu1 %v3933_v18, %s4859_s0  ;;  %v4158_v23 = vpop.permute.xlu0 %1537 }
 0x325   : > { %v4160_v29 = vpop.permute.xlu1 %1333  ;;  %1708 = vrot.lane.b32.xlu0 %v3900_v59, %s3212_s3 }
 0x327   : > { %1676 = vrot.lane.b32.xlu1 %v3933_v18, %s4869_s15  ;;  %v4166_v54 = vpop.permute.xlu0 %1365 }
 0x329   : > { %v4168_v7 = vpop.permute.xlu1 %1539  ;;  %1503 = vrot.lane.b32.xlu0 %v3776_v36, %s4871_s27 }
 0x32b   : > { %1475 = vrot.lane.b32.xlu1 %v3933_v18, %s4870_s16  ;;  %v4174_v50 = vpop.permute.xlu0 %1570 }
 0x32d   : > { %v4178_v11 = vpop.permute.xlu1 %1367  ;;  %1507 = vrot.lane.b32.xlu0 %v3900_v59, %s4871_s27 }
 0x32f   : > { %1710 = vrot.lane.b32.xlu1 %v3933_v18, %s3212_s3  ;;  %v4186_v14 = vpop.permute.xlu0 %1399  ;;  %s3215_s3 = smov 95  }
 0x331   : > { %v4188_v17 = vpop.permute.xlu1 %1572  ;;  %1738 = vrot.lane.b32.xlu0 %v3776_v36, %s3214_s29 }
 0x333   : > { %1509 = vrot.lane.b32.xlu1 %v3933_v18, %s4871_s27  ;;  %v4193_v62 = vpop.permute.xlu0 %1603  ;;  %s4897_s27 = sld [smem:[#allocation51_spill]] }
 0x335   : > { %v4195_v22 = vpop.permute.xlu1 %1401  ;;  %1742 = vrot.lane.b32.xlu0 %v3900_v59, %s3214_s29 }
 0x337   : > { %1740 = vrot.lane.b32.xlu1 %v3792_v40, %s3214_s29  ;;  %v4199_v53 = vpop.permute.xlu0 %1636 }
 0x339   : > { %v4201_v24 = vpop.permute.xlu1 %1605  ;;  %2713 = vrot.lane.b32.xlu0 %v3680_v12, %s4859_s0  ;;  %s3216_s0 = smov 94  }
 0x33b   : > { %1744 = vrot.lane.b32.xlu1 %v3933_v18, %s3214_s29  ;;  %v4206_v56 = vpop.permute.xlu0 %1436  ;;  %s4701_s29 = scalar_lea.hbm %s4897_s27, %s2496_s19 }
 0x33d   : > { %v4208_v27 = vpop.permute.xlu1 %1638  ;;  %1772 = vrot.lane.b32.xlu0 %v3776_v36, %s3215_s3 }
 0x33f   : > { %2718 = vrot.lane.b32.xlu1 %v3680_v12, %s4864_s18  ;;  %v4213_v49 = vpop.permute.xlu0 %1670 }
 0x340   : > { %4873 = vst [vmem:[#allocation41_spill] sm:$0xff] %v4213_v49 }
 0x341   : > { %v4215_v31 = vpop.permute.xlu1 %1438  ;;  %1776 = vrot.lane.b32.xlu0 %v3900_v59, %s3215_s3 }
 0x343   : > { %1774 = vrot.lane.b32.xlu1 %v3792_v40, %s3215_s3  ;;  %v4219_v48 = vpop.permute.xlu0 %1469 }
 0x344   : > { %4874 = vst [vmem:[#allocation42_spill] sm:$0xff] %v4219_v48 }
 0x345   : > { %v4221_v20 = vpop.permute.xlu1 %1672  ;;  %2723 = vrot.lane.b32.xlu0 %v3680_v12, %s4866_s20 }
 0x346   : > { %4875 = vst [vmem:[#allocation43_spill] sm:$0xff] %v4221_v20 }
 0x347   : > { %1778 = vrot.lane.b32.xlu1 %v3933_v18, %s3215_s3  ;;  %v4226_v21 = vpop.permute.xlu0 %1704 }
 0x348   : > { %4876 = vst [vmem:[#allocation44_spill] sm:$0xff] %v4226_v21 }
 0x349   : > { %v4228_v6 = vpop.permute.xlu1 %1471  ;;  %1806 = vrot.lane.b32.xlu0 %v3776_v36, %s3216_s0 }
 0x34a   : > { %4877 = vst [vmem:[#allocation45_spill] sm:$0xff] %v4228_v6 }
 0x34b   : > { %2728 = vrot.lane.b32.xlu1 %v3680_v12, %s4858_s12  ;;  %v1034_v33 = vpop.permute.xlu0 %1033  ;;  %v1047_v12 = vrot.slane %v1042_v13, %v3916_v5  ;;  %v1085_v13 = vrot.slane %v1076_v8, %v3914_v4  ;;  %s2470_s12 = sshll.u32 %s3629_s17, 6 }
 0x34c   : > { %v1040_v34 = vsel %vm1037_vm11, %v1034_v33, %v4060_v61  ;;  %v1038_v60 = vsel %vm1037_vm11, %v4060_v61, %v1034_v33  ;;  %s4686_s18 = scalar_lea.vmem [#allocation23], %s2470_s12 }
 0x34d   : > { %v4233_v35 = vpop.permute.xlu1 %1706  ;;  %1810 = vrot.lane.b32.xlu0 %v3900_v59, %s3216_s0  ;;  %v1055_v61 = vmul.f32 %v1051_v15, %v1038_v60  ;;  %s2262_s20 = sshll.u32 %s4686_s18, 4  ;;  %s4696_s20 = int_to_ptr.vmem [resolvable:$true] %s2262_s20 }
 0x34e   : > { %4878 = vst [vmem:[#allocation46_spill] sm:$0xff] %v4233_v35  ;;  %v1110_v35 = vld [vmem:[#allocation8 + $0x2] ss:$8 sm:$0x3]  ;;  %s3082_s3 = scalar_lea.vmem %s4696_s20, 1024 }
 0x34f   : > { %1808 = vrot.lane.b32.xlu1 %v3792_v40, %s3216_s0  ;;  %v1067_v0 = vpop.permute.xlu0 %1066  ;;  %v1115_v42 = vrot.slane %v1110_v35, %v3916_v5  ;;  %v1119_v49 = vrot.slane %v1110_v35, %v3914_v4  ;;  %p3083_p2 = scmp.ne.s32.totalorder %s4696_s20, %s3082_s3 }
 0x350   : > { %v1073_v33 = vsel %vm1070_vm12, %v1067_v0, %v4080_v28  ;;  %v1071_v8 = vsel %vm1070_vm12, %v4080_v28, %v1067_v0  ;;  %v1144_v28 = vld [vmem:[#allocation8 + $0x3] ss:$8 sm:$0x3] }
 0x351   : > { %v4239_v9 = vpop.permute.xlu1 %1505  ;;  %1895 = vperm.xlu0 %2690, %v1892_v39   ;;  %v586_v39 = vld [vmem:[#allocation12] sm:$0xff]  ;;  %v1088_v60 = vmul.f32 %v1081_v45, %v1073_v33  ;;  %v1089_v0 = vmul.f32 %v1085_v13, %v1071_v8  ;;  %p3084_p6 = pnand %p3083_p2, %p4898_p0 }
 0x352   : > { %4879 = vst [vmem:[#allocation47_spill] sm:$0xff] %v4239_v9  ;;  %v1054_v9 = vmul.f32 %v1047_v12, %v1040_v34  ;;  %v2184_v34 = vld [vmem:[#allocation21] sm:$0xff] }
 0x353   : > { %1812 = vrot.lane.b32.xlu1 %v3933_v18, %s3216_s0  ;;  %v1101_v10 = vpop.permute.xlu0 %1100  ;;  %p3085_p10 = pneg %p3084_p6  ;;  %s3217_s0 = smov [#allocation23]  }
 0x354   : > { %s3086_s12 = sshll.u32 %s3217_s0, 4  ;;  %s3087_s12 = int_to_ptr.vmem [resolvable:$false] %s3086_s12 }
 0x355   : > { %v1036_v1 = vpop.permute.xlu1 %1035  ;;  %975 = vperm.xlu0 %2690, %v972_v16   ;;  %s3088_s14 = scalar_lea.vmem %s3087_s12, 2048  ;;  %p3089_p11 = scmp.lt.s32.totalorder %s4696_s20, %s3087_s12 }
 0x356   : > { %v1039_v21 = vsel %vm1037_vm11, %v4086_v32, %v1036_v1  ;;  %v1041_v43 = vsel %vm1037_vm11, %v1036_v1, %v4086_v32  ;;  %vm1339_vm11 = vcmp.lt.s32.totalorder %v3910_v63, 14  ;;  %p3090_p8 = scmp.lt.s32.totalorder %s3088_s14, %s3082_s3 }
 0x357   : > { %v1056_v6 = vmul.f32 %v1047_v12, %v1041_v43  ;;  %v1057_v48 = vmul.f32 %v1051_v15, %v1039_v21  ;;  %593 = vperm.xlu1 %2691, %v586_v39   ;;  %v1135_v16 = vpop.permute.xlu0 %1134 }
 0x358   : > { %p3091_p5 = por %p3090_p8, %p3089_p11 }
 0x359   : > { %v1058_v20 = vpack.c.bf16 %v1056_v6, %v1054_v9  ;;  %v1069_v1 = vpop.permute.xlu1 %1068  ;;  %v1059_v32 = vpack.c.bf16 %v1057_v48, %v1055_v61  ;;  %v1105_v48 = vsel %vm1104_vm13, %v4092_v55, %v1101_v10  ;;  %v1107_v6 = vsel %vm1104_vm13, %v1101_v10, %v4092_v55  ;;  %v1178_v10 = vld [vmem:[#allocation8 + $0x4] ss:$8 sm:$0x3] }
 0x35a   : > { %v1072_v15 = vsel %vm1070_vm12, %v4094_v52, %v1069_v1  ;;  %v1074_v43 = vsel %vm1070_vm12, %v1069_v1, %v4094_v52  ;;  %v1122_v8 = vmul.f32 %v1115_v42, %v1107_v6  ;;  %v1123_v55 = vmul.f32 %v1119_v49, %v1105_v48  ;;  %p3092_p9 = pnand %p3091_p5, %p3085_p10 }
 0x35b   : > { %v1090_v21 = vmul.f32 %v1081_v45, %v1074_v43  ;;  %v1091_v12 = vmul.f32 %v1085_v13, %v1072_v15  ;;  %2187 = vperm.xlu1 %2691, %v2184_v34   ;;  %1914 = vmatprep.subr.bf16.mxu0 %v1059_v32  ;;  %v1169_v9 = vpop.permute.xlu0 %1168  ;;  %v1149_v45 = vrot.slane %v1144_v28, %v3916_v5  ;;  %vm1373_vm12 = vcmp.lt.s32.totalorder %v3910_v63, 2 }
 0x35c   : > { %1915 = vmatpush1.bf16.msra.mxu0 %v1058_v20  ;;  %v1153_v13 = vrot.slane %v1144_v28, %v3914_v4  ;;  %v1139_v32 = vsel %vm1138_vm14, %v4100_v38, %v1135_v16 }
 0x35d   : > { %v1092_v35 = vpack.c.bf16 %v1090_v21, %v1088_v60  ;;  %v1103_v52 = vpop.permute.xlu1 %1102  ;;  %v1093_v39 = vpack.c.bf16 %v1091_v12, %v1089_v0  ;;  %v1141_v60 = vsel %vm1138_vm14, %v1135_v16, %v4100_v38  ;;  %v1183_v0 = vrot.slane %v1178_v10, %v3916_v5  ;;  %v1212_v16 = vld [vmem:[#allocation8 + $0x5] ss:$8 sm:$0x3] }
 0x35e   : > { %v1106_v61 = vsel %vm1104_vm13, %v4104_v25, %v1103_v52  ;;  %v1108_v33 = vsel %vm1104_vm13, %v1103_v52, %v4104_v25  ;;  %v1156_v21 = vmul.f32 %v1149_v45, %v1141_v60  ;;  %v1157_v38 = vmul.f32 %v1153_v13, %v1139_v32 }
 0x35f   : > { %v1124_v20 = vmul.f32 %v1115_v42, %v1108_v33  ;;  %v1125_v34 = vmul.f32 %v1119_v49, %v1106_v61  ;;  %1916 = vmatprep.subr.bf16.mxu0 %v1093_v39  ;;  %v1203_v1 = vpop.permute.xlu0 %1202  ;;  %v1187_v42 = vrot.slane %v1178_v10, %v3914_v4  ;;  %v1175_v52 = vsel %vm1172_vm15, %v1169_v9, %v4110_v26 }
 0x360   : > { %1917 = vmatpush1.bf16.msra.mxu0 %v1092_v35  ;;  %v1173_v35 = vsel %vm1172_vm15, %v4110_v26, %v1169_v9  ;;  %v1217_v33 = vrot.slane %v1212_v16, %v3916_v5  ;;  %v1245_v9 = vld [vmem:[#allocation8 + $0x6] ss:$8 sm:$0x3]  ;;  %v1207_v32 = vsel %vm1206_vm2, %v4118_v37, %v1203_v1  ;;  %v1209_v60 = vsel %vm1206_vm2, %v1203_v1, %v4118_v37 }
 0x361   : > { %v1126_v15 = vpack.c.bf16 %v1124_v20, %v1122_v8  ;;  %v1137_v25 = vpop.permute.xlu1 %1136  ;;  %v1127_v43 = vpack.c.bf16 %v1125_v34, %v1123_v55  ;;  %v1190_v55 = vmul.f32 %v1183_v0, %v1175_v52  ;;  %v1191_v26 = vmul.f32 %v1187_v42, %v1173_v35 }
 0x362   : > { %v1140_v49 = vsel %vm1138_vm14, %v4112_v30, %v1137_v25  ;;  %v1142_v28 = vsel %vm1138_vm14, %v1137_v25, %v4112_v30  ;;  %vm1644_vm13 = vcmp.lt.s32.totalorder %v3910_v63, 110  ;;  %vm1678_vm14 = vcmp.lt.s32.totalorder %v3910_v63, 98 }
 0x363   : > { %v1158_v12 = vmul.f32 %v1149_v45, %v1142_v28  ;;  %v1159_v48 = vmul.f32 %v1153_v13, %v1140_v49  ;;  %1918 = vmatprep.subr.bf16.mxu0 %v1127_v43  ;;  %v1237_v6 = vpop.permute.xlu0 %1236  ;;  %v1221_v45 = vrot.slane %v1212_v16, %v3914_v4  ;;  %v1254_v49 = vrot.slane %v1245_v9, %v3914_v4 }
 0x364   : > { %1919 = vmatpush1.bf16.msra.mxu0 %v1126_v15  ;;  %v1224_v28 = vmul.f32 %v1217_v33, %v1209_v60 }
 0x365   : > { %v1160_v39 = vpack.c.bf16 %v1158_v12, %v1156_v21  ;;  %v1171_v30 = vpop.permute.xlu1 %1170  ;;  %v1161_v61 = vpack.c.bf16 %v1159_v48, %v1157_v38  ;;  %v1225_v21 = vmul.f32 %v1221_v45, %v1207_v32  ;;  %v1278_v38 = vld [vmem:[#allocation8 + $0x7] ss:$8 sm:$0x3]  ;;  %v1240_v12 = vsel %vm722_vm3, %v4126_v47, %v1237_v6 }
 0x366   : > { %v1174_v13 = vsel %vm1172_vm15, %v4120_v57, %v1171_v30  ;;  %v1176_v8 = vsel %vm1172_vm15, %v1171_v30, %v4120_v57  ;;  %v1250_v57 = vrot.slane %v1245_v9, %v3916_v5  ;;  %v1242_v48 = vsel %vm722_vm3, %v1237_v6, %v4126_v47 }
 0x367   : > { %v1192_v10 = vmul.f32 %v1183_v0, %v1176_v8  ;;  %v1193_v20 = vmul.f32 %v1187_v42, %v1174_v13  ;;  %1920 = vmatprep.subr.bf16.mxu0 %v1161_v61  ;;  %v1270_v34 = vpop.permute.xlu0 %1269  ;;  %v1287_v30 = vrot.slane %v1278_v38, %v3914_v4  ;;  %v1258_v13 = vmul.f32 %v1254_v49, %v1240_v12  ;;  %v1311_v8 = vld [vmem:[#allocation8 + $0x10] ss:$8 sm:$0x3] }
 0x368   : > { %1921 = vmatpush1.bf16.msra.mxu0 %v1160_v39  ;;  %v1275_v9 = vsel %vm753_vm4, %v1270_v34, %v4134_v58  ;;  %v1320_v60 = vrot.slane %v1311_v8, %v3914_v4  ;;  %vm1712_vm15 = vcmp.lt.s32.totalorder %v3910_v63, 97 }
 0x369   : > { %v1194_v15 = vpack.c.bf16 %v1192_v10, %v1190_v55  ;;  %v1205_v25 = vpop.permute.xlu1 %1204  ;;  %v1195_v43 = vpack.c.bf16 %v1193_v20, %v1191_v26  ;;  %v1273_v26 = vsel %vm753_vm4, %v4134_v58, %v1270_v34 }
 0x36a   : > { %v1208_v0 = vsel %vm1206_vm2, %v4128_v51, %v1205_v25  ;;  %v1210_v42 = vsel %vm1206_vm2, %v1205_v25, %v4128_v51  ;;  %v1283_v51 = vrot.slane %v1278_v38, %v3916_v5  ;;  %vm1511_vm2 = vcmp.lt.s32.totalorder %v3910_v63, 114 }
 0x36b   : > { %v1226_v37 = vmul.f32 %v1217_v33, %v1210_v42  ;;  %v1227_v1 = vmul.f32 %v1221_v45, %v1208_v0  ;;  %1922 = vmatprep.subr.bf16.mxu0 %v1195_v43  ;;  %v1303_v16 = vpop.permute.xlu0 %1302  ;;  %v1257_v45 = vmul.f32 %v1250_v57, %v1242_v48 }
 0x36c   : > { %1923 = vmatpush1.bf16.msra.mxu0 %v1194_v15  ;;  %v1290_v43 = vmul.f32 %v1283_v51, %v1275_v9  ;;  %v1306_v42 = vsel %vm785_vm5, %v4142_v46, %v1303_v16 }
 0x36d   : > { %v1228_v35 = vpack.c.bf16 %v1226_v37, %v1224_v28  ;;  %v1239_v52 = vpop.permute.xlu1 %1238  ;;  %v1229_v39 = vpack.c.bf16 %v1227_v1, %v1225_v21  ;;  %v1308_v28 = vsel %vm785_vm5, %v1303_v16, %v4142_v46  ;;  %v1324_v46 = vmul.f32 %v1320_v60, %v1306_v42  ;;  %v1550_v16 = vld [vmem:[#allocation8 + $0x20] ss:$8 sm:$0x3] }
 0x36e   : > { %v1241_v61 = vsel %vm722_vm3, %v4136_v2, %v1239_v52  ;;  %v1243_v33 = vsel %vm722_vm3, %v1239_v52, %v4136_v2  ;;  %v1316_v2 = vrot.slane %v1311_v8, %v3916_v5  ;;  %v1559_v8 = vrot.slane %v1550_v16, %v3914_v4 }
 0x36f   : > { %v1259_v47 = vmul.f32 %v1250_v57, %v1243_v33  ;;  %v1260_v6 = vmul.f32 %v1254_v49, %v1241_v61  ;;  %1924 = vmatprep.subr.bf16.mxu0 %v1229_v39  ;;  %v1336_v55 = vpop.permute.xlu0 %1335  ;;  %v1291_v57 = vmul.f32 %v1287_v30, %v1273_v26  ;;  %v1345_v49 = vld [vmem:[#allocation8 + $0x11] ss:$8 sm:$0x3] }
 0x370   : > { %1925 = vmatpush1.bf16.msra.mxu0 %v1228_v35  ;;  %v1350_v37 = vrot.slane %v1345_v49, %v3916_v5  ;;  %v1354_v1 = vrot.slane %v1345_v49, %v3914_v4  ;;  %v1323_v35 = vmul.f32 %v1316_v2, %v1308_v28  ;;  %v1342_v61 = vsel %vm1339_vm11, %v1336_v55, %v4150_v44 }
 0x371   : > { %v1261_v10 = vpack.c.bf16 %v1259_v47, %v1257_v45  ;;  %v1272_v20 = vpop.permute.xlu1 %1271  ;;  %v1262_v32 = vpack.c.bf16 %v1260_v6, %v1258_v13 }
 0x372   : > { %v1274_v15 = vsel %vm753_vm4, %v4144_v3, %v1272_v20  ;;  %v1276_v25 = vsel %vm753_vm4, %v1272_v20, %v4144_v3  ;;  %v1357_v26 = vmul.f32 %v1350_v37, %v1342_v61 }
 0x373   : > { %v1292_v58 = vmul.f32 %v1283_v51, %v1276_v25  ;;  %v1293_v34 = vmul.f32 %v1287_v30, %v1274_v15  ;;  %1926 = vmatprep.subr.bf16.mxu0 %v1262_v32  ;;  %v1542_v0 = vpop.permute.xlu0 %1541  ;;  %v1340_v30 = vsel %vm1339_vm11, %v4150_v44, %v1336_v55 }
 0x374   : > { %1927 = vmatpush1.bf16.msra.mxu0 %v1261_v10  ;;  %v1358_v9 = vmul.f32 %v1354_v1, %v1340_v30  ;;  %v1379_v10 = vld [vmem:[#allocation8 + $0x12] ss:$8 sm:$0x3]  ;;  %v1545_v32 = vsel %vm883_vm8, %v4158_v23, %v1542_v0 }
 0x375   : > { %v1294_v21 = vpack.c.bf16 %v1292_v58, %v1290_v43  ;;  %v1305_v3 = vpop.permute.xlu1 %1304  ;;  %v1295_v38 = vpack.c.bf16 %v1293_v34, %v1291_v57  ;;  %v1384_v25 = vrot.slane %v1379_v10, %v3916_v5  ;;  %v1388_v43 = vrot.slane %v1379_v10, %v3914_v4  ;;  %v1583_v34 = vld [vmem:[#allocation8 + $0x21] ss:$8 sm:$0x3] }
 0x376   : > { %v1307_v12 = vsel %vm785_vm5, %v4152_v19, %v1305_v3  ;;  %v1309_v48 = vsel %vm785_vm5, %v1305_v3, %v4152_v19  ;;  %v1555_v19 = vrot.slane %v1550_v16, %v3916_v5 }
 0x377   : > { %v1325_v52 = vmul.f32 %v1316_v2, %v1309_v48  ;;  %v1326_v39 = vmul.f32 %v1320_v60, %v1307_v12  ;;  %1928 = vmatprep.subr.bf16.mxu0 %v1295_v38  ;;  %v1370_v51 = vpop.permute.xlu0 %1369  ;;  %v1547_v2 = vsel %vm883_vm8, %v1542_v0, %v4158_v23  ;;  %v1592_v12 = vrot.slane %v1583_v34, %v3914_v4 }
 0x378   : > { %1929 = vmatpush1.bf16.msra.mxu0 %v1294_v21  ;;  %v1562_v58 = vmul.f32 %v1555_v19, %v1545_v32  ;;  %v1563_v23 = vmul.f32 %v1559_v8, %v1547_v2  ;;  %v1374_v21 = vsel %vm1373_vm12, %v4166_v54, %v1370_v51  ;;  %v1376_v3 = vsel %vm1373_vm12, %v1370_v51, %v4166_v54 }
 0x379   : > { %v1327_v33 = vpack.c.bf16 %v1325_v52, %v1323_v35  ;;  %v1338_v45 = vpop.permute.xlu1 %1337  ;;  %v1328_v13 = vpack.c.bf16 %v1326_v39, %v1324_v46  ;;  %v1391_v46 = vmul.f32 %v1384_v25, %v1376_v3  ;;  %v1392_v16 = vmul.f32 %v1388_v43, %v1374_v21  ;;  %v1412_v52 = vld [vmem:[#allocation8 + $0x13] ss:$8 sm:$0x3] }
 0x37a   : > { %v1341_v47 = vsel %vm1339_vm11, %v4160_v29, %v1338_v45  ;;  %v1343_v6 = vsel %vm1339_vm11, %v1338_v45, %v4160_v29  ;;  %v1433_v21 = vpack.c.bf16 %v3933_v18, %v3900_v59  ;;  %v2696_v59 = vunpack.i.h.bf16 %v3830_v41 }
 0x37b   : > { %v1359_v44 = vmul.f32 %v1350_v37, %v1343_v6  ;;  %v1360_v55 = vmul.f32 %v1354_v1, %v1341_v47  ;;  %1930 = vmatprep.subr.bf16.mxu0 %v1328_v13  ;;  %v1575_v20 = vpop.permute.xlu0 %1574  ;;  %v2695_v18 = vunpack.i.l.bf16 %v3830_v41 }
 0x37c   : > { %1931 = vmatpush1.bf16.msra.mxu0 %v1327_v33  ;;  %v1578_v30 = vsel %vm915_vm9, %v4174_v50, %v1575_v20  ;;  %v1580_v61 = vsel %vm915_vm9, %v1575_v20, %v4174_v50 }
 0x37d   : > { %v1361_v60 = vpack.c.bf16 %v1359_v44, %v1357_v26  ;;  %v1544_v29 = vpop.permute.xlu1 %1543  ;;  %v1362_v15 = vpack.c.bf16 %v1360_v55, %v1358_v9  ;;  %v1596_v26 = vmul.f32 %v1592_v12, %v1580_v61  ;;  %v1616_v9 = vld [vmem:[#allocation8 + $0x22] ss:$8 sm:$0x3] }
 0x37e   : > { %v1546_v57 = vsel %vm883_vm8, %v4168_v7, %v1544_v29  ;;  %v1548_v49 = vsel %vm883_vm8, %v1544_v29, %v4168_v7  ;;  %v1588_v7 = vrot.slane %v1583_v34, %v3916_v5  ;;  %v1625_v29 = vrot.slane %v1616_v9, %v3914_v4 }
 0x37f   : > { %v1564_v0 = vmul.f32 %v1555_v19, %v1546_v57  ;;  %v1565_v42 = vmul.f32 %v1559_v8, %v1548_v49  ;;  %1932 = vmatprep.subr.bf16.mxu0 %v1362_v15  ;;  %v1404_v28 = vpop.permute.xlu0 %1403  ;;  %v1421_v19 = vrot.slane %v1412_v52, %v3914_v4  ;;  %v1650_v49 = vld [vmem:[#allocation8 + $0x23] ss:$8 sm:$0x3] }
 0x380   : > { %1933 = vmatpush1.bf16.msra.mxu0 %v1361_v60  ;;  %v1595_v6 = vmul.f32 %v1588_v7, %v1578_v30  ;;  %v1407_v55 = vsel %vm817_vm6, %v4186_v14, %v1404_v28  ;;  %v1409_v20 = vsel %vm817_vm6, %v1404_v28, %v4186_v14  ;;  %v1655_v3 = vrot.slane %v1650_v49, %v3916_v5 }
 0x381   : > { %v1566_v38 = vpack.c.bf16 %v1564_v0, %v1562_v58  ;;  %v1372_v37 = vpop.permute.xlu1 %1371  ;;  %v1567_v1 = vpack.c.bf16 %v1565_v42, %v1563_v23  ;;  %v1425_v57 = vmul.f32 %v1421_v19, %v1407_v55 }
 0x382   : > { %v1375_v48 = vsel %vm1373_vm12, %v4178_v11, %v1372_v37  ;;  %v1377_v35 = vsel %vm1373_vm12, %v1372_v37, %v4178_v11  ;;  %v1417_v11 = vrot.slane %v1412_v52, %v3916_v5 }
 0x383   : > { %v1393_v54 = vmul.f32 %v1384_v25, %v1377_v35  ;;  %v1394_v39 = vmul.f32 %v1388_v43, %v1375_v48  ;;  %v1608_v51 = vpop.permute.xlu0 %1607  ;;  %1955 = vmatprep.subr.bf16.mxu1 %v1567_v1 }
 0x384   : > { %1956 = vmatpush1.bf16.msra.mxu1 %v1566_v38  ;;  %v1424_v43 = vmul.f32 %v1417_v11, %v1409_v20  ;;  %v1611_v34 = vsel %vm947_vm10, %v4193_v62, %v1608_v51  ;;  %v1613_v0 = vsel %vm947_vm10, %v1608_v51, %v4193_v62  ;;  %v1659_v38 = vrot.slane %v1650_v49, %v3914_v4 }
 0x385   : > { %v1395_v33 = vpack.c.bf16 %v1393_v54, %v1391_v46  ;;  %v1577_v45 = vpop.permute.xlu1 %1576  ;;  %v1396_v13 = vpack.c.bf16 %v1394_v39, %v1392_v16  ;;  %v1432_v51 = vpack.c.bf16 %v3792_v40, %v3776_v36  ;;  %v4484_v36 = vsel %vm722_vm3, %v2695_v18, %v2696_v59 }
 0x386   : > { %v1579_v8 = vsel %vm915_vm9, %v4188_v17, %v1577_v45  ;;  %v1581_v47 = vsel %vm915_vm9, %v1577_v45, %v4188_v17  ;;  %v1621_v17 = vrot.slane %v1616_v9, %v3916_v5 }
 0x387   : > { %v1597_v50 = vmul.f32 %v1588_v7, %v1579_v8  ;;  %v1598_v10 = vmul.f32 %v1592_v12, %v1581_v47  ;;  %1934 = vmatprep.subr.bf16.mxu0 %v1396_v13  ;;  %v1641_v44 = vpop.permute.xlu0 %1640  ;;  %v1629_v7 = vmul.f32 %v1625_v29, %v1613_v0  ;;  %v1449_v12 = vld [vmem:[#allocation8 + $0x15] ss:$8 sm:$0x3]  ;;  %v1684_v13 = vld [vmem:[#allocation8 + $0x24] ss:$8 sm:$0x3] }
 0x388   : > { %1935 = vmatpush1.bf16.msra.mxu0 %v1395_v33  ;;  %v1628_v1 = vmul.f32 %v1621_v17, %v1611_v34  ;;  %v1645_v16 = vsel %vm1644_vm13, %v4199_v53, %v1641_v44  ;;  %v1647_v52 = vsel %vm1644_vm13, %v1641_v44, %v4199_v53  ;;  %v1454_v30 = vrot.slane %v1449_v12, %v3916_v5 }
 0x389   : > { %v1599_v32 = vpack.c.bf16 %v1597_v50, %v1595_v6  ;;  %v1406_v2 = vpop.permute.xlu1 %1405  ;;  %v1600_v60 = vpack.c.bf16 %v1598_v10, %v1596_v26  ;;  %v1458_v41 = vrot.slane %v1449_v12, %v3914_v4  ;;  %v1662_v33 = vmul.f32 %v1655_v3, %v1645_v16  ;;  %v4499_v10 = vld [vmem:[#allocation9 + $0x2] ss:$8 sm:$0x3] }
 0x38a   : > { %v1408_v15 = vsel %vm817_vm6, %v4195_v22, %v1406_v2  ;;  %v1410_v25 = vsel %vm817_vm6, %v1406_v2, %v4195_v22  ;;  %v1663_v45 = vmul.f32 %v1659_v38, %v1647_v52  ;;  %v4496_v6 = vsel %vm722_vm3, %v2696_v59, %v2695_v18  ;;  %v4540_v52 = vld [vmem:[#allocation9 + $0x1] ss:$8 sm:$0x3] }
 0x38b   : > { %v1426_v14 = vmul.f32 %v1417_v11, %v1410_v25  ;;  %v1427_v58 = vmul.f32 %v1421_v19, %v1408_v15  ;;  %v1441_v23 = vpop.permute.xlu0 %1440  ;;  %1957 = vmatprep.subr.bf16.mxu1 %v1600_v60  ;;  %v1689_v44 = vrot.slane %v1684_v13, %v3916_v5  ;;  %v1693_v55 = vrot.slane %v1684_v13, %v3914_v4  ;;  %v1483_v60 = vld [vmem:[#allocation8 + $0x16] ss:$8 sm:$0x3] }
 0x38c   : > { %1958 = vmatpush1.bf16.msra.mxu1 %v1599_v32  ;;  %v1444_v40 = vsel %vm851_vm7, %v4206_v56, %v1441_v23  ;;  %v1446_v47 = vsel %vm851_vm7, %v1441_v23, %v4206_v56  ;;  %vm1477_vm3 = vcmp.lt.s32.totalorder %v3910_v63, 126  ;;  %v1488_v0 = vrot.slane %v1483_v60, %v3916_v5 }
 0x38d   : > { %v1428_v42 = vpack.c.bf16 %v1426_v14, %v1424_v43  ;;  %v1610_v22 = vpop.permute.xlu1 %1609  ;;  %v1429_v28 = vpack.c.bf16 %v1427_v58, %v1425_v57  ;;  %v1461_v32 = vmul.f32 %v1454_v30, %v1444_v40  ;;  %v1462_v2 = vmul.f32 %v1458_v41, %v1446_v47  ;;  %v4880_v57 = vld [vmem:[#allocation41_spill] sm:$0xff]  ;;  %v4885_v47 = vld [vmem:[#allocation38_spill] sm:$0xff] }
 0x38e   : > { %v1612_v37 = vsel %vm947_vm10, %v4201_v24, %v1610_v22  ;;  %v1614_v62 = vsel %vm947_vm10, %v1610_v22, %v4201_v24  ;;  %v2055_v14 = vrot.slane %v4499_v10, %v3916_v5  ;;  %v4881_v22 = vld [vmem:[#allocation43_spill] sm:$0xff]  ;;  %v2059_v12 = vrot.slane %v4499_v10, %v3914_v4 }
 0x38f   : > { %v1630_v48 = vmul.f32 %v1621_v17, %v1612_v37  ;;  %v1631_v35 = vmul.f32 %v1625_v29, %v1614_v62  ;;  %1936 = vmatprep.subr.bf16.mxu0 %v1429_v28  ;;  %v1675_v46 = vpop.permute.xlu0 %1674  ;;  %v1718_v37 = vld [vmem:[#allocation8 + $0x25] ss:$8 sm:$0x3]  ;;  %v2032_v40 = vrot.slane %v4540_v52, %v3916_v5 }
 0x390   : > { %1937 = vmatpush1.bf16.msra.mxu0 %v1428_v42  ;;  %v1679_v49 = vsel %vm1678_vm14, %v4880_v57, %v1675_v46  ;;  %v1492_v42 = vrot.slane %v1483_v60, %v3914_v4 }
 0x391   : > { %v1632_v24 = vpack.c.bf16 %v1630_v48, %v1628_v1  ;;  %v1643_v54 = vpop.permute.xlu1 %1642  ;;  %1938 = vmatprep.subr.bf16.mxu0 %v1433_v21  ;;  %v1633_v39 = vpack.c.bf16 %v1631_v35, %v1629_v7  ;;  %v4882_v48 = vld [vmem:[#allocation37_spill] sm:$0xff] }
 0x392   : > { %v1646_v61 = vsel %vm1644_vm13, %v4208_v27, %v1643_v54  ;;  %v1648_v53 = vsel %vm1644_vm13, %v1643_v54, %v4208_v27  ;;  %v4492_v27 = vld [vmem:[#allocation9] ss:$8 sm:$0x3]  ;;  %v2706_v35 = vunpack.i.h.bf16 %v4882_v48  ;;  %v2705_v16 = vunpack.i.l.bf16 %v4882_v48 }
 0x393   : > { %v1664_v11 = vmul.f32 %v1655_v3, %v1646_v61  ;;  %v1665_v19 = vmul.f32 %v1659_v38, %v1648_v53  ;;  %v1474_v8 = vpop.permute.xlu0 %1473  ;;  %1959 = vmatprep.subr.bf16.mxu1 %v1633_v39  ;;  %v2009_v25 = vrot.slane %v4492_v27, %v3916_v5  ;;  %v2013_v43 = vrot.slane %v4492_v27, %v3914_v4 }
 0x394   : > { %1939 = vmatpush1.bf16.msra.mxu0 %v1432_v51  ;;  %1960 = vmatpush1.bf16.msra.mxu1 %v1632_v24  ;;  %v1696_v3 = vmul.f32 %v1689_v44, %v1679_v49  ;;  %v1723_v51 = vrot.slane %v1718_v37, %v3916_v5 }
 0x395   : > { %v1666_v26 = vpack.c.bf16 %v1664_v11, %v1662_v33  ;;  %v1443_v9 = vpop.permute.xlu1 %1442  ;;  %v1667_v50 = vpack.c.bf16 %v1665_v19, %v1663_v45  ;;  %v1517_v19 = vld [vmem:[#allocation8 + $0x17] ss:$8 sm:$0x3] }
 0x396   : > { %v1445_v56 = vsel %vm851_vm7, %v4215_v31, %v1443_v9  ;;  %v1447_v20 = vsel %vm851_vm7, %v1443_v9, %v4215_v31  ;;  %v1681_v31 = vsel %vm1678_vm14, %v1675_v46, %v4880_v57  ;;  %v4883_v46 = vld [vmem:[#allocation42_spill] sm:$0xff]  ;;  %v4886_v9 = vld [vmem:[#allocation44_spill] sm:$0xff]  ;;  %v1526_v60 = vrot.slane %v1517_v19, %v3914_v4 }
 0x397   : > { %v1463_v17 = vmul.f32 %v1454_v30, %v1445_v56  ;;  %v1464_v29 = vmul.f32 %v1458_v41, %v1447_v20  ;;  %v1709_v15 = vpop.permute.xlu0 %1708  ;;  %1961 = vmatprep.subr.bf16.mxu1 %v1667_v50  ;;  %v1697_v38 = vmul.f32 %v1693_v55, %v1681_v31  ;;  %v1478_v59 = vsel %vm1477_vm3, %v4883_v46, %v1474_v8  ;;  %v4884_v41 = vld [vmem:[#allocation45_spill] sm:$0xff] }
 0x398   : > { %1962 = vmatpush1.bf16.msra.mxu1 %v1666_v26  ;;  %v1480_v18 = vsel %vm1477_vm3, %v1474_v8, %v4883_v46  ;;  %v1727_v30 = vrot.slane %v1718_v37, %v3914_v4  ;;  %v1495_v33 = vmul.f32 %v1488_v0, %v1478_v59  ;;  %v2701_v26 = vunpack.i.h.bf16 %v4885_v47 }
 0x399   : > { %v1465_v58 = vpack.c.bf16 %v1463_v17, %v1461_v32  ;;  %v1677_v23 = vpop.permute.xlu1 %1676  ;;  %v1466_v34 = vpack.c.bf16 %v1464_v29, %v1462_v2  ;;  %v1496_v45 = vmul.f32 %v1492_v42, %v1480_v18  ;;  %v1713_v50 = vsel %vm1712_vm15, %v4886_v9, %v1709_v15  ;;  %v4887_v17 = vld [vmem:[#allocation46_spill] sm:$0xff] }
 0x39a   : > { %v1680_v28 = vsel %vm1678_vm14, %v4881_v22, %v1677_v23  ;;  %v1682_v21 = vsel %vm1678_vm14, %v1677_v23, %v4881_v22  ;;  %v1522_v2 = vrot.slane %v1517_v19, %v3916_v5  ;;  %v1730_v57 = vmul.f32 %v1723_v51, %v1713_v50  ;;  %v4889_v18 = vld [vmem:[#allocation34_spill] sm:$0xff] }
 0x39b   : > { %v1698_v62 = vmul.f32 %v1689_v44, %v1680_v28  ;;  %v1699_v1 = vmul.f32 %v1693_v55, %v1682_v21  ;;  %1940 = vmatprep.subr.bf16.mxu0 %v1466_v34  ;;  %v1504_v7 = vpop.permute.xlu0 %1503  ;;  %v1715_v44 = vsel %vm1712_vm15, %v1709_v15, %v4886_v9  ;;  %v2700_v55 = vunpack.i.l.bf16 %v4885_v47 }
 0x39c   : > { %1941 = vmatpush1.bf16.msra.mxu0 %v1465_v58  ;;  %v1731_v49 = vmul.f32 %v1727_v30, %v1715_v44  ;;  %v2016_v34 = vadd.f32 %v2009_v25, %v4496_v6  ;;  %v2036_v28 = vrot.slane %v4540_v52, %v3914_v4  ;;  %v4890_v52 = vunpack.c.l.bf16 %v4889_v18 }
 0x39d   : > { %v1700_v24 = vpack.c.bf16 %v1698_v62, %v1696_v3  ;;  %v1476_v54 = vpop.permute.xlu1 %1475  ;;  %v1701_v39 = vpack.c.bf16 %v1699_v1, %v1697_v38  ;;  %v2025_v21 = vsel %vm753_vm4, %v2701_v26, %v2700_v55  ;;  %v2024_v27 = vsel %vm753_vm4, %v2700_v55, %v2701_v26 }
 0x39e   : > { %v1479_v61 = vsel %vm1477_vm3, %v4884_v41, %v1476_v54  ;;  %v1481_v53 = vsel %vm1477_vm3, %v1476_v54, %v4884_v41  ;;  %v4891_v54 = vunpack.c.h.bf16 %v4889_v18  ;;  %v1752_v41 = vld [vmem:[#allocation8 + $0x26] ss:$8 sm:$0x3]  ;;  %vm1746_vm4 = vcmp.lt.s32.totalorder %v3910_v63, 96 }
 0x39f   : > { %v1497_v13 = vmul.f32 %v1488_v0, %v1479_v61  ;;  %v1498_v11 = vmul.f32 %v1492_v42, %v1481_v53  ;;  %v1508_v8 = vpop.permute.xlu0 %1507  ;;  %1963 = vmatprep.subr.bf16.mxu1 %v1701_v39  ;;  %v2017_v0 = vadd.f32 %v2013_v43, %v4484_v36  ;;  %v2047_v36 = vsel %vm785_vm5, %v2705_v16, %v2706_v35  ;;  %v4888_v43 = vld [vmem:[#allocation47_spill] sm:$0xff] }
 0x3a0   : > { %1964 = vmatpush1.bf16.msra.mxu1 %v1700_v24  ;;  %v1512_v42 = vsel %vm1511_vm2, %v1504_v7, %v1508_v8  ;;  %v1514_v22 = vsel %vm1511_vm2, %v1508_v8, %v1504_v7  ;;  %v2018_v24 = vmax.f32 %v4890_v52, %v2016_v34  ;;  %v2040_v61 = vadd.f32 %v2036_v28, %v2024_v27 }
 0x3a1   : > { %v1499_v56 = vpack.c.bf16 %v1497_v13, %v1495_v33  ;;  %v1711_v20 = vpop.permute.xlu1 %1710  ;;  %v1500_v32 = vpack.c.bf16 %v1498_v11, %v1496_v45  ;;  %v1529_v62 = vmul.f32 %v1522_v2, %v1512_v42  ;;  %v1530_v1 = vmul.f32 %v1526_v60, %v1514_v22  ;;  %v2073_v13 = vld [vmem:[#allocation9 + $0x3] ss:$8 sm:$0x3]  ;;  %v4892_v11 = vld [vmem:[#allocation39_spill] sm:$0xff] }
 0x3a2   : > { %v1714_v29 = vsel %vm1712_vm15, %v4887_v17, %v1711_v20  ;;  %v1716_v15 = vsel %vm1712_vm15, %v1711_v20, %v4887_v17  ;;  %v2019_v39 = vmax.f32 %v4891_v54, %v2017_v0  ;;  %v2711_v19 = vunpack.i.h.bf16 %v4892_v11 }
 0x3a3   : > { %v1732_v31 = vmul.f32 %v1723_v51, %v1714_v29  ;;  %v1733_v58 = vmul.f32 %v1727_v30, %v1716_v15  ;;  %1942 = vmatprep.subr.bf16.mxu0 %v1500_v32  ;;  %v1739_v23 = vpop.permute.xlu0 %1738  ;;  %v2048_v51 = vsel %vm785_vm5, %v2706_v35, %v2705_v16  ;;  %v2039_v30 = vadd.f32 %v2032_v40, %v2025_v21  ;;  %v4893_v16 = vld [vmem:[#allocation40_spill] sm:$0xff] }
 0x3a4   : > { %1943 = vmatpush1.bf16.msra.mxu0 %v1499_v56  ;;  %v2710_v8 = vunpack.i.l.bf16 %v4892_v11  ;;  %v1757_v47 = vrot.slane %v1752_v41, %v3916_v5  ;;  %v1761_v48 = vrot.slane %v1752_v41, %v3914_v4  ;;  %v2483_v40 = vcombine.low %v4893_v16, %v4893_v16 }
 0x3a5   : > { %v1734_v3 = vpack.c.bf16 %v1732_v31, %v1730_v57  ;;  %v1510_v6 = vpop.permute.xlu1 %1509  ;;  %v1735_v25 = vpack.c.bf16 %v1733_v58, %v1731_v49  ;;  %v2062_v26 = vadd.f32 %v2055_v14, %v2048_v51  ;;  %v2063_v9 = vadd.f32 %v2059_v12, %v2047_v36  ;;  %v2096_v31 = vld [vmem:[#allocation9 + $0x5] ss:$8 sm:$0x3]  ;;  %v2142_v51 = vld [vmem:[#allocation9 + $0x7] ss:$8 sm:$0x3] }
 0x3a6   : > { %v1513_v38 = vsel %vm1511_vm2, %v4888_v43, %v1510_v6  ;;  %v1515_v37 = vsel %vm1511_vm2, %v1510_v6, %v4888_v43  ;;  %v2041_v55 = vmax.f32 %v2018_v24, %v2039_v30  ;;  %v2042_v56 = vmax.f32 %v2019_v39, %v2040_v61 }
 0x3a7   : > { %v1531_v7 = vmul.f32 %v1522_v2, %v1513_v38  ;;  %v1532_v46 = vmul.f32 %v1526_v60, %v1515_v37  ;;  %v1743_v59 = vpop.permute.xlu0 %1742  ;;  %1965 = vmatprep.subr.bf16.mxu1 %v1735_v25  ;;  %v2078_v20 = vrot.slane %v2073_v13, %v3916_v5  ;;  %v2082_v32 = vrot.slane %v2073_v13, %v3914_v4  ;;  %v2119_v25 = vld [vmem:[#allocation9 + $0x6] ss:$8 sm:$0x3] }
 0x3a8   : > { %1966 = vmatpush1.bf16.msra.mxu1 %v1734_v3  ;;  %v1747_v50 = vsel %vm1746_vm4, %v1739_v23, %v1743_v59  ;;  %v1749_v44 = vsel %vm1746_vm4, %v1743_v59, %v1739_v23  ;;  %v2070_v14 = vsel %vm817_vm6, %v2710_v8, %v2711_v19  ;;  %v2071_v10 = vsel %vm817_vm6, %v2711_v19, %v2710_v8 }
 0x3a9   : > { %v1533_v53 = vpack.c.bf16 %v1531_v7, %v1529_v62  ;;  %v1741_v33 = vpop.permute.xlu1 %1740  ;;  %v1534_v45 = vpack.c.bf16 %v1532_v46, %v1530_v1  ;;  %v1764_v17 = vmul.f32 %v1757_v47, %v1747_v50  ;;  %v1765_v29 = vmul.f32 %v1761_v48, %v1749_v44  ;;  %v1786_v7 = vld [vmem:[#allocation8 + $0x27] ss:$8 sm:$0x3] }
 0x3aa   : > { %v4894_v34 = vmov 0   ;;  %v2064_v0 = vmax.f32 %v2041_v55, %v2062_v26  ;;  %v2065_v42 = vmax.f32 %v2042_v56, %v2063_v9  ;;  %v2085_v3 = vadd.f32 %v2078_v20, %v2071_v10 }
 0x3ab   : > { %1944 = vmatprep.subr.bf16.mxu0 %v1534_v45  ;;  %v2714_v35 = vpop.permute.xlu0 %2713  ;;  %v2086_v6 = vadd.f32 %v2082_v32, %v2070_v14  ;;  %v2101_v43 = vrot.slane %v2096_v31, %v3916_v5  ;;  %v2105_v38 = vrot.slane %v2096_v31, %v3914_v4  ;;  %v2124_v46 = vrot.slane %v2119_v25, %v3916_v5 }
 0x3ac   : > { %1945 = vmatpush1.bf16.msra.mxu0 %v1533_v53  ;;  %v2716_v58 = vunpack.i.h.bf16 %v2714_v35  ;;  %v2715_v23 = vunpack.i.l.bf16 %v2714_v35  ;;  %v2128_v59 = vrot.slane %v2119_v25, %v3914_v4  ;;  %vm1780_vm5 = vcmp.lt.s32.totalorder %v3910_v63, 95 }
 0x3ad   : > { %v1745_v2 = vpop.permute.xlu1 %1744  ;;  %v2087_v52 = vmax.f32 %v2064_v0, %v2085_v3  ;;  %v2088_v24 = vmax.f32 %v2065_v42, %v2086_v6  ;;  %v1791_v61 = vrot.slane %v1786_v7, %v3916_v5  ;;  %v1795_v53 = vrot.slane %v1786_v7, %v3914_v4  ;;  %v1820_v0 = vld [vmem:[#allocation8 + $0x30] ss:$8 sm:$0x3] }
 0x3ae   : > { %v1748_v12 = vsel %vm1746_vm4, %v1741_v33, %v1745_v2  ;;  %v1750_v60 = vsel %vm1746_vm4, %v1745_v2, %v1741_v33  ;;  %v2093_v62 = vsel %vm851_vm7, %v2715_v23, %v2716_v58  ;;  %v2094_v1 = vsel %vm851_vm7, %v2716_v58, %v2715_v23 }
 0x3af   : > { %v1766_v15 = vmul.f32 %v1757_v47, %v1748_v12  ;;  %v1767_v57 = vmul.f32 %v1761_v48, %v1750_v60  ;;  %1947 = vmatmul.mubr.bf16.vlgmr.msra.gmra.mrb[12].mxu0 %v2483_v40  ;;  %v1773_v49 = vpop.permute.xlu0 %1772  ;;  %v2108_v30 = vadd.f32 %v2101_v43, %v2093_v62  ;;  %v2109_v41 = vadd.f32 %v2105_v38, %v2094_v1  ;;  %v2165_v40 = vld [vmem:[#allocation9 + $0x10] ss:$8 sm:$0x3] }
 0x3b0   : > { %2231 = vmatprep.mubr.bf16.mxu0 %v4894_v34  ;;  %v2147_v48 = vrot.slane %v2142_v51, %v3916_v5  ;;  %v2151_v35 = vrot.slane %v2142_v51, %v3914_v4  ;;  %v2170_v12 = vrot.slane %v2165_v40, %v3916_v5  ;;  %v2174_v60 = vrot.slane %v2165_v40, %v3914_v4  ;;  %v2181_v51 = vld [vmem:[#allocation20] sm:$0xf] }
 0x3b1   : > { %v1768_v22 = vpack.c.bf16 %v1766_v15, %v1764_v17  ;;  %v2719_v28 = vpop.permute.xlu1 %2718  ;;  %v1769_v21 = vpack.c.bf16 %v1767_v57, %v1765_v29  ;;  %v2110_v14 = vmax.f32 %v2087_v52, %v2108_v30  ;;  %v2111_v10 = vmax.f32 %v2088_v24, %v2109_v41 }
 0x3b2   : > { %v2721_v36 = vunpack.i.h.bf16 %v2719_v28  ;;  %v2720_v27 = vunpack.i.l.bf16 %v2719_v28  ;;  %vm1814_vm6 = vcmp.lt.s32.totalorder %v3910_v63, 94  ;;  %v1829_v43 = vrot.slane %v1820_v0, %v3914_v4 }
 0x3b3   : > { %v1777_v37 = vpop.permute.xlu0 %1776  ;;  %1967 = vmatprep.subr.bf16.mxu1 %v1769_v21 }
 0x3b4   : > { %1968 = vmatpush1.bf16.msra.mxu1 %v1768_v22  ;;  %v2116_v54 = vsel %vm883_vm8, %v2720_v27, %v2721_v36  ;;  %v2117_v39 = vsel %vm883_vm8, %v2721_v36, %v2720_v27  ;;  %v1781_v45 = vsel %vm1780_vm5, %v1773_v49, %v1777_v37  ;;  %v1783_v13 = vsel %vm1780_vm5, %v1777_v37, %v1773_v49 }
 0x3b5   : > { %v1775_v18 = vpop.permute.xlu1 %1774  ;;  %v2131_v8 = vadd.f32 %v2124_v46, %v2116_v54  ;;  %v2132_v47 = vadd.f32 %v2128_v59, %v2117_v39  ;;  %v1798_v55 = vmul.f32 %v1791_v61, %v1781_v45  ;;  %v1799_v56 = vmul.f32 %v1795_v53, %v1783_v13  ;;  %v4896_v13 = vld [vmem:[#allocation36_spill] sm:$0xff] }
 0x3b6   : > { %v1825_v27 = vrot.slane %v1820_v0, %v3916_v5 }
 0x3b7   : > { %v2724_v33 = vpop.permute.xlu0 %2723  ;;  %v2133_v23 = vmax.f32 %v2110_v14, %v2131_v8  ;;  %v2134_v34 = vmax.f32 %v2111_v10, %v2132_v47 }
 0x3b8   : > { %v2726_v11 = vunpack.i.h.bf16 %v2724_v33  ;;  %v2725_v19 = vunpack.i.l.bf16 %v2724_v33  ;;  %v4895_v33 = vld [vmem:[#allocation35_spill] sm:$0xff] }
 0x3b9   : > { %v1779_v16 = vpop.permute.xlu1 %1778 }
 0x3ba   : > { %v2139_v26 = vsel %vm915_vm9, %v2725_v19, %v2726_v11  ;;  %v2140_v9 = vsel %vm915_vm9, %v2726_v11, %v2725_v19  ;;  %v1782_v50 = vsel %vm1780_vm5, %v1775_v18, %v1779_v16  ;;  %v1784_v44 = vsel %vm1780_vm5, %v1779_v16, %v1775_v18 }
 0x3bb   : > { %v1800_v20 = vmul.f32 %v1791_v61, %v1782_v50  ;;  %v1801_v32 = vmul.f32 %v1795_v53, %v1784_v44  ;;  %v1807_v2 = vpop.permute.xlu0 %1806  ;;  %v2154_v17 = vadd.f32 %v2147_v48, %v2139_v26  ;;  %v2155_v29 = vadd.f32 %v2151_v35, %v2140_v9  ;;  %v2743_v61 = vld [vmem:[#allocation17 + $0x8] sm:$0xff] }
 0x3bc   : > { %v2485_v53 = vcombine.low %v2743_v61, %v2743_v61 }
 0x3bd   : > { %v1802_v15 = vpack.c.bf16 %v1800_v20, %v1798_v55  ;;  %v2729_v57 = vpop.permute.xlu1 %2728  ;;  %v1803_v49 = vpack.c.bf16 %v1801_v32, %v1799_v56  ;;  %v2157_v21 = vmax.f32 %v2134_v34, %v2155_v29  ;;  %v2156_v36 = vmax.f32 %v2133_v23, %v2154_v17 }
 0x3be   : > { %v2731_v31 = vunpack.i.h.bf16 %v2729_v57  ;;  %v2730_v58 = vunpack.i.l.bf16 %v2729_v57 }
 0x3bf   : > { %1969 = vmatprep.subr.bf16.mxu1 %v1803_v49  ;;  %v1811_v28 = vpop.permute.xlu0 %1810 }
 0x3c0   : > { %v2162_v42 = vsel %vm947_vm10, %v2730_v58, %v2731_v31  ;;  %v2163_v22 = vsel %vm947_vm10, %v2731_v31, %v2730_v58  ;;  %1970 = vmatpush1.bf16.msra.mxu1 %v1802_v15  ;;  %v1815_v38 = vsel %vm1814_vm6, %v1807_v2, %v1811_v28  ;;  %v1817_v1 = vsel %vm1814_vm6, %v1811_v28, %v1807_v2 }
 0x3c1   : > { %v2177_v3 = vadd.f32 %v2170_v12, %v2162_v42  ;;  %v2178_v6 = vadd.f32 %v2174_v60, %v2163_v22  ;;  %v1809_v25 = vpop.permute.xlu1 %1808  ;;  %v1832_v18 = vmul.f32 %v1825_v27, %v1815_v38  ;;  %v1833_v4 = vmul.f32 %v1829_v43, %v1817_v1 }
 0x3c3   : > { %v2180_v37 = vmax.f32 %v2157_v21, %v2178_v6  ;;  %v2179_v62 = vmax.f32 %v2156_v36, %v2177_v3 }
 0x3c5   : > { %v1813_v7 = vpop.permute.xlu1 %1812  ;;  %v2183_v46 = vpack.c.bf16 %v2180_v37, %v2180_v37  ;;  %v2182_v59 = vpack.c.bf16 %v2179_v62, %v2179_v62 }
 0x3c6   : > { %v1816_v52 = vsel %vm1814_vm6, %v1809_v25, %v1813_v7  ;;  %v1818_v5 = vsel %vm1814_vm6, %v1813_v7, %v1809_v25 }
 0x3c7   : > { %v1834_v24 = vmul.f32 %v1825_v27, %v1816_v52  ;;  %v1835_v54 = vmul.f32 %v1829_v43, %v1818_v5  ;;  %2488 = vmatprep.subr.msk.bf16.mxu0 %vm644_vm0, %v2183_v46  ;;  %v2194_v39 = vsel %vm644_vm0, %v2182_v59, 0 }
 0x3c8   : > { %2200 = vmatpush1.bf16.msra.mxu0 %v2194_v39 }
 0x3c9   : > { %v1836_v30 = vpack.c.bf16 %v1834_v24, %v1832_v18  ;;  %v1837_v41 = vpack.c.bf16 %v1835_v54, %v1833_v4 }
 0x3cb   : > { %1971 = vmatprep.subr.bf16.mxu1 %v1837_v41  ;;  %2489 = vmatmul.mubr.msk.bf16.vlgmr.msra.gmra.mrb[16].mxu0 %vm634_vm1, %v2181_v51 }
 0x3cc   : > { %1972 = vmatpush1.bf16.msra.mxu1 %v1836_v30 }
 0x3cf   : > { %1988 = vmatmul.mubr.bf16.vlgmr.msra.gmra.mrb[4].mxu1 %v2485_v53 }
 0x3d0   : > { %v1896_v19 = vpop.permute.xlu0 %1895 }
 0x3d4   : > { %v976_v8 = vpop.permute.xlu0 %975 }
 0x3d6   : > { %v594_v63 = vpop.permute.xlu1 %593 }
 0x3d7   : > { %v686_v45 = vadd.f32 %v4895_v33, %v594_v63  ;;  %v688_v11 = vadd.f32 %v4896_v13, %v594_v63 }
 0x3d9   : > { %2240 = vst [vmem:[%s4686_s18] sm:$0xff] %v686_v45  ;;  %2241 = vst [vmem:[%s4686_s18 + $0x8] sm:$0xff] %v688_v11 }
 0x3da   : > { %v2188_v56 = vpop.permute.xlu1 %2187 }
 0x3de   : > { %v1022_v47 = vpop.f32.mrb[0].mxu1 }
 0x3df   : > { %v1023_v48 = vadd.f32 %v1022_v47, %v976_v8  ;;  %v1024_v35 = vpop.f32.mrb[1].mxu1 }
 0x3e0   : > { %v1025_v16 = vadd.f32 %v1024_v35, %v976_v8  ;;  %v1026_v40 = vpop.f32.mrb[2].mxu1 }
 0x3e1   : > { %2242 = vst [vmem:[%s4686_s18 + $0x10] sm:$0xff] %v1023_v48  ;;  %v1027_v26 = vpop.f32.mrb[3].mxu1 }
 0x3e2   : > { %2243 = vst [vmem:[%s4686_s18 + $0x18] sm:$0xff] %v1025_v16 }
 0x482   : > { %v1948_v9 = vpop.f32.mrb[12].mxu0 }
 0x483   : > { %v1950_v50 = vpop.f32.mrb[13].mxu0  ;;  %v1949_v12 = vadd.f32 %v1948_v9, %v1896_v19 }
 0x484   : > { %v1952_v44 = vpop.f32.mrb[14].mxu0  ;;  %v1951_v17 = vadd.f32 %v1950_v50, %v1896_v19 }
 0x485   : > { %v1953_v55 = vpop.f32.mrb[15].mxu0 }
 0x49e   : > { %v2233_v20 = vpop.f32.mrb[16].mxu0 }
 0x49f   : > { %v2234_v32 = vadd.f32 %v2233_v20, %v2188_v56  ;;  %v2235_v2 = vpop.f32.mrb[17].mxu0 }
 0x4a0   : > { %v2236_v14 = vadd.f32 %v2235_v2, %v2188_v56  ;;  %v2237_v10 = vpop.f32.mrb[18].mxu0 }
 0x4a1   : > { %2246 = vst [vmem:[%s4686_s18 + $0x30] sm:$0xff] %v2234_v32  ;;  %v2238_v60 = vpop.f32.mrb[19].mxu0 }
 0x4a2   : > { %2247 = vst [vmem:[%s4686_s18 + $0x38] sm:$0xff] %v2236_v14  ;;  %v1989_v29 = vpop.f32.mrb[4].mxu1 }
 0x4a3   : > { %v1990_v15 = vadd.f32 %v1989_v29, %v1949_v12  ;;  %v1991_v57 = vpop.f32.mrb[5].mxu1 }
 0x4a4   : > { %v1992_v49 = vadd.f32 %v1991_v57, %v1951_v17  ;;  %v1993_v31 = vpop.f32.mrb[6].mxu1 }
 0x4a5   : > { %2244 = vst [vmem:[%s4686_s18 + $0x20] sm:$0xff] %v1990_v15  ;;  %v1994_v58 = vpop.f32.mrb[7].mxu1 }
 0x4a6   : > { %2245 = vst [vmem:[%s4686_s18 + $0x28] sm:$0xff] %v1992_v49 }
 0x4a7   : > { %3095 = shalt.err (!%p3092_p9)
}
 0x4a8   : > { %s3096_s18 = scalar_lea.hbm %s4701_s29, 1024  ;;  %s3100_s16 = scalar_lea.hbm %s4897_s27, 2048 }
 0x4a9   : > { %p3097_p7 = scmp.ne.s32.totalorder %s4701_s29, %s3096_s18  ;;  %p3101_p13 = scmp.lt.u32.totalorder %s4701_s29, %s4897_s27 }
 0x4aa   : > { %p3102_p1 = scmp.lt.u32.totalorder %s3100_s16, %s3096_s18  ;;  %p3104_p2 = scmp.lt.u32.totalorder %s3096_s18, %s4701_s29 }
 0x4ab   : > { %p3098_p4 = pnand %p3097_p7, %p4898_p0 }
 0x4ac   : > { %p3103_p3 = por %p3102_p1, %p3101_p13 }
 0x4ad   : > { %p3099_p12 = pneg %p3098_p4 }
 0x4ae   : > { %p3105_p6 = por %p3104_p2, %p3103_p3 }
 0x4b0   : > { %p3106_p10 = pnand %p3105_p6, %p3099_p12 }
 0x4b2   : > { %3109 = shalt.err (!%p3106_p10)
}
 0x4b3   : > { %s3218_s14 = smov 256   ;;  %s4899_s3 = smov 16  }
 0x4b4   : > { %2547 = dma.vmem_to_hbm [thread:$0]  (%p4898_p0), %s4696_s20, 1024, %s4701_s29, %s2249_s25, %s3218_s14, %s3218_s14, %s4899_s3  }
 0x4b5 PF: > { %s2277_s19 = sand.u32 1, %s3160_s21   ;;  %p4900_p11 = scmp.ne.s32.totalorder %s4834_s26, 0 }
 0x4b6   : > { %p4901_p8 = scmp.ge.s32.totalorder %s3172_s24, 2  ;;  %s2278_s18 = scalar_lea.sflag [#allocation5], %s2277_s19 }
 0x4b8   : > { %p2588_p5 = pnand %p4901_p8, %p4900_p11 }
 0x4ba   : > { %3155 = dma.done.wait (!%p2588_p5), %s2278_s18, 1024  }
 0x4bb   : > { %3157 = vsyncadd (!%p2588_p5), %s2278_s18, 4294966272  ;;  %p31_p9 = scmp.ge.s32.totalorder %s3559_s13, 4   ;;  %s4902_s21 = smov %s3164_s22 }
 0x4bc   : > { %s4903_s22 = smov %s3168_s23  ;;  %s4904_s23 = smov %s3571_s1 }
 0x4bd   : > { %s4905_s24 = smov %s3559_s13  ;;  %33 = sbr.rel (!%p31_p9) target bundleno = 16 (0x10), region = 194 }
 0x4c4   :  { %2283 = vsyncpa [#allocation4], 1 }
 0x4c5   :  { %2285 = vsyncpa [#allocation4 + $0x1], 1 }
 0x4c6   :  { %2286 = vsyncpa [#allocation7], 1 }
 0x4c7   :  { %2287 = vsyncpa [#allocation10], 1 }
 0x4c8   :  { %2288 = vsyncpa [#allocation13], 1 }
 0x4c9   :  { %2289 = vsyncpa [#allocation16], 1 }
 0x4ca   :  { %2290 = vsyncpa [#allocation19], 1 }
 0x4cb   :  { %2291 = vsyncpa [#allocation22], 1 }
 0x4cc   :  { %2292 = vsyncpa [#allocation5], 1 }
 0x4cd   :  { %2294 = vsyncpa [#allocation5 + $0x1], 1 }

</bundles_post_ra>
